<compile_context>
chip_gen: v7x
topology: tpu7x:2x2x1
jax: 0.10.0
libtpu: 0.0.40
codegen_flags: <defaults>
</compile_context>

<pallas_src>
import functools

import jax
import jax.numpy as jnp
from jax import lax
from jax.experimental import pallas as pl
from jax.experimental.pallas import tpu as pltpu


def _resblock_kernel(x_ref, w1_ref, b1_ref, w2_ref, b2_ref, o_ref,
                     xpad_ref, hpad_ref, *, H, W, C, res_scale):
    # x_ref : (1, H*W, C)   input tile (also the residual identity)
    # w*_ref: (9*C, C)      conv weights, HWIO flattened to (kh*kw*cin, cout)
    # b*_ref: (1, C)        bias
    # o_ref : (1, H*W, C)
    # xpad_ref / hpad_ref : (H+2, W+2, C) f32 VMEM halo scratch
    x2d = x_ref[0].astype(jnp.float32)                      # (H*W, C)

    # Zero the halo scratches (borders must be 0; interiors are overwritten).
    xpad_ref[...] = jnp.zeros_like(xpad_ref)
    hpad_ref[...] = jnp.zeros_like(hpad_ref)
    xpad_ref[1:H + 1, 1:W + 1, :] = x2d.reshape(H, W, C)

    def conv3x3(pad_ref, w_ref, b_ref):
        # im2col: 9 shifted (H, W, C) taps -> (H*W, 9C) patch matrix,
        # single wide-K matmul on the MXU, f32 accumulation.
        taps = [pad_ref[dh:dh + H, dw:dw + W, :]
                for dh in range(3) for dw in range(3)]
        patches = jnp.concatenate(taps, axis=-1).reshape(H * W, 9 * C)
        return jnp.dot(patches, w_ref[...],
                       preferred_element_type=jnp.float32) + b_ref[...]

    # conv1 + ReLU, kept entirely in VMEM.
    h2d = jnp.maximum(conv3x3(xpad_ref, w1_ref, b1_ref), 0.0)  # (H*W, C)
    hpad_ref[1:H + 1, 1:W + 1, :] = h2d.reshape(H, W, C)

    # conv2 + residual add (identity in f32, single downcast at the end).
    out2d = conv3x3(hpad_ref, w2_ref, b2_ref)                  # (H*W, C)
    o_ref[0] = (x2d + res_scale * out2d).astype(o_ref.dtype)


def residual_block_no_bn(x_nchw, params, *, res_scale=1.0):
    """x_nchw: (N, C, H, W) float32.  Returns (N, C, H, W)."""
    N, C, H, W = x_nchw.shape

    # Boundary layout plumbing (free): NCHW -> (N, H*W, C); HWIO -> (9C, C).
    x2d = jnp.transpose(x_nchw, (0, 2, 3, 1)).reshape(N, H * W, C)
    w1 = params["w1"].reshape(9 * C, C)
    w2 = params["w2"].reshape(9 * C, C)
    b1 = params["b1"].reshape(1, C)
    b2 = params["b2"].reshape(1, C)

    kernel = functools.partial(_resblock_kernel, H=H, W=W, C=C,
                               res_scale=float(res_scale))

    # Scheduling hints.
    flops = int(N * 2 * 2 * 9 * H * W * C * C)               # two 3x3 convs
    bytes_accessed = int(4 * (2 * N * H * W * C + 2 * 9 * C * C + 2 * C))
    cost = pl.CostEstimate(flops=flops, transcendentals=0,
                           bytes_accessed=bytes_accessed)

    # Rough per-step VMEM footprint (double-buffered I/O blocks, weights,
    # two halo scratches, im2col temporaries) with headroom; clamp so it is
    # safe on every generation (<= 48 MiB, >= 32 MiB).
    blk = H * W * C * 4
    pad = (H + 2) * (W + 2) * C * 4
    est = 4 * blk + 2 * pad + 4 * 9 * C * C * 4 + 2 * (H * W * 9 * C * 4) + (4 << 20)
    vmem_limit = int(min(max(2 * est, 32 << 20), 48 << 20))

    y2d = pl.pallas_call(
        kernel,
        out_shape=jax.ShapeDtypeStruct((N, H * W, C), x_nchw.dtype),
        grid_spec=pltpu.PrefetchScalarGridSpec(
            num_scalar_prefetch=0,
            grid=(N,),
            in_specs=[
                pl.BlockSpec((1, H * W, C), lambda n: (n, 0, 0)),
                pl.BlockSpec((9 * C, C), lambda n: (0, 0)),
                pl.BlockSpec((1, C), lambda n: (0, 0)),
                pl.BlockSpec((9 * C, C), lambda n: (0, 0)),
                pl.BlockSpec((1, C), lambda n: (0, 0)),
            ],
            out_specs=pl.BlockSpec((1, H * W, C), lambda n: (n, 0, 0)),
            scratch_shapes=[
                pltpu.VMEM((H + 2, W + 2, C), jnp.float32),   # padded x
                pltpu.VMEM((H + 2, W + 2, C), jnp.float32),   # padded h
            ],
        ),
        compiler_params=pltpu.CompilerParams(
            dimension_semantics=("parallel",),
            vmem_limit_bytes=vmem_limit),
        cost_estimate=cost,
    )(x2d, w1, b1, w2, b2)

    return jnp.transpose(y2d.reshape(N, H, W, C), (0, 3, 1, 2))


def init_params(key, num_feat):
    """default_init_weights: kaiming_normal (fan_in, gain=sqrt(2)) * 0.1, bias=0.
       Weights stored in HWIO layout."""
    k1, k2 = jax.random.split(key)
    fan_in = num_feat * 3 * 3
    std = (2.0 / fan_in) ** 0.5 * 0.1
    w1 = jax.random.normal(k1, (3, 3, num_feat, num_feat), jnp.float32) * std
    w2 = jax.random.normal(k2, (3, 3, num_feat, num_feat), jnp.float32) * std
    b1 = jnp.zeros((num_feat,), jnp.float32)
    b2 = jnp.zeros((num_feat,), jnp.float32)
    return {"w1": w1, "b1": b1, "w2": w2, "b2": b2}


def _reference(x_nchw, params, res_scale):
    # pure-JAX reference using lax.conv (NHWC / HWIO)
    x = jnp.transpose(x_nchw, (0, 2, 3, 1))
    dn = lax.conv_dimension_numbers(x.shape, params["w1"].shape,
                                    ("NHWC", "HWIO", "NHWC"))
    h = lax.conv_general_dilated(x, params["w1"], (1, 1), "SAME",
                                 dimension_numbers=dn) + params["b1"]
    h = jnp.maximum(h, 0.0)
    o = lax.conv_general_dilated(h, params["w2"], (1, 1), "SAME",
                                 dimension_numbers=dn) + params["b2"]
    y = x + res_scale * o
    return jnp.transpose(y, (0, 3, 1, 2))


if __name__ == "__main__":
    key = jax.random.PRNGKey(0)
    kx, kp = jax.random.split(key)

    N, C, H, W = 2, 64, 16, 16      # num_feat = 64 (module default), small spatial
    res_scale = 1.0

    x = jax.random.normal(kx, (N, C, H, W), jnp.float32)
    params = init_params(kp, C)

    out = residual_block_no_bn(x, params, res_scale=res_scale)
    out = jax.block_until_ready(out)

    ref = _reference(x, params, res_scale)
    assert out.shape == (N, C, H, W)
    assert jnp.allclose(out, ref, atol=2e-4, rtol=2e-4), "mismatch vs reference"

    print("KERNEL_OK")
</pallas_src>

<mosaic_0001>
module attributes {stable_mosaic.version = 11 : i64} {
  func.func @_resblock_kernel(%arg0: i32, %arg1: memref<1x256x64xf32, #tpu.memory_space<vmem>>, %arg2: memref<576x64xf32, #tpu.memory_space<vmem>>, %arg3: memref<1x64xf32, #tpu.memory_space<vmem>>, %arg4: memref<576x64xf32, #tpu.memory_space<vmem>>, %arg5: memref<1x64xf32, #tpu.memory_space<vmem>>, %arg6: memref<1x256x64xf32, #tpu.memory_space<vmem>>, %arg7: memref<18x18x64xf32, #tpu.memory_space<vmem>>, %arg8: memref<18x18x64xf32, #tpu.memory_space<vmem>>) attributes {dimension_semantics = [#tpu.dimension_semantics<parallel>], iteration_bounds = array<i64: 2>, scalar_prefetch = 0 : i64, scratch_operands = 2 : i64, tpu.core_type = #tpu.core_type<tc>, window_params = [{transform_indices = @transform_0, window_bounds = array<i64: 1, 256, 64>}, {pipeline_mode = #tpu.pipeline_mode<synchronous>, transform_indices = @transform_1, window_bounds = array<i64: 576, 64>}, {pipeline_mode = #tpu.pipeline_mode<synchronous>, transform_indices = @transform_2, window_bounds = array<i64: 1, 64>}, {pipeline_mode = #tpu.pipeline_mode<synchronous>, transform_indices = @transform_3, window_bounds = array<i64: 576, 64>}, {pipeline_mode = #tpu.pipeline_mode<synchronous>, transform_indices = @transform_4, window_bounds = array<i64: 1, 64>}, {transform_indices = @transform_5, window_bounds = array<i64: 1, 256, 64>}]} {
    %c0 = arith.constant 0 : index
    %c0_0 = arith.constant 0 : index
    %c0_1 = arith.constant 0 : index
    %0 = vector.load %arg1[%c0, %c0_0, %c0_1] : memref<1x256x64xf32, #tpu.memory_space<vmem>>, vector<1x256x64xf32>
    %1 = vector.shape_cast %0 : vector<1x256x64xf32> to vector<256x64xf32>
    %cst = arith.constant 0.000000e+00 : f32
    %2 = vector.broadcast %cst : f32 to vector<18x18x64xf32>
    %c0_2 = arith.constant 0 : index
    %c0_3 = arith.constant 0 : index
    %c0_4 = arith.constant 0 : index
    %3 = vector.load %arg7[%c0_2, %c0_3, %c0_4] : memref<18x18x64xf32, #tpu.memory_space<vmem>>, vector<18x18x64xf32>
    tpu.vector_store %arg7[%c0_2, %c0_3, %c0_4], %2 {strides = array<i32>} : memref<18x18x64xf32, #tpu.memory_space<vmem>>, vector<18x18x64xf32>,
    %cst_5 = arith.constant 0.000000e+00 : f32
    %4 = vector.broadcast %cst_5 : f32 to vector<18x18x64xf32>
    %c0_6 = arith.constant 0 : index
    %c0_7 = arith.constant 0 : index
    %c0_8 = arith.constant 0 : index
    %5 = vector.load %arg8[%c0_6, %c0_7, %c0_8] : memref<18x18x64xf32, #tpu.memory_space<vmem>>, vector<18x18x64xf32>
    tpu.vector_store %arg8[%c0_6, %c0_7, %c0_8], %4 {strides = array<i32>} : memref<18x18x64xf32, #tpu.memory_space<vmem>>, vector<18x18x64xf32>,
    %6 = vector.shape_cast %1 : vector<256x64xf32> to vector<16x16x64xf32>
    %c1 = arith.constant 1 : index
    %c1_9 = arith.constant 1 : index
    %c0_10 = arith.constant 0 : index
    %7 = vector.load %arg7[%c1, %c1_9, %c0_10] : memref<18x18x64xf32, #tpu.memory_space<vmem>>, vector<16x16x64xf32>
    tpu.vector_store %arg7[%c1, %c1_9, %c0_10], %6 {strides = array<i32>} : memref<18x18x64xf32, #tpu.memory_space<vmem>>, vector<16x16x64xf32>,
    %c0_11 = arith.constant 0 : index
    %c0_12 = arith.constant 0 : index
    %c0_13 = arith.constant 0 : index
    %8 = vector.load %arg7[%c0_11, %c0_12, %c0_13] : memref<18x18x64xf32, #tpu.memory_space<vmem>>, vector<16x16x64xf32>
    %c0_14 = arith.constant 0 : index
    %c1_15 = arith.constant 1 : index
    %c0_16 = arith.constant 0 : index
    %9 = vector.load %arg7[%c0_14, %c1_15, %c0_16] : memref<18x18x64xf32, #tpu.memory_space<vmem>>, vector<16x16x64xf32>
    %c0_17 = arith.constant 0 : index
    %c2 = arith.constant 2 : index
    %c0_18 = arith.constant 0 : index
    %10 = vector.load %arg7[%c0_17, %c2, %c0_18] : memref<18x18x64xf32, #tpu.memory_space<vmem>>, vector<16x16x64xf32>
    %c1_19 = arith.constant 1 : index
    %c0_20 = arith.constant 0 : index
    %c0_21 = arith.constant 0 : index
    %11 = vector.load %arg7[%c1_19, %c0_20, %c0_21] : memref<18x18x64xf32, #tpu.memory_space<vmem>>, vector<16x16x64xf32>
    %c1_22 = arith.constant 1 : index
    %c1_23 = arith.constant 1 : index
    %c0_24 = arith.constant 0 : index
    %12 = vector.load %arg7[%c1_22, %c1_23, %c0_24] : memref<18x18x64xf32, #tpu.memory_space<vmem>>, vector<16x16x64xf32>
    %c1_25 = arith.constant 1 : index
    %c2_26 = arith.constant 2 : index
    %c0_27 = arith.constant 0 : index
    %13 = vector.load %arg7[%c1_25, %c2_26, %c0_27] : memref<18x18x64xf32, #tpu.memory_space<vmem>>, vector<16x16x64xf32>
    %c2_28 = arith.constant 2 : index
    %c0_29 = arith.constant 0 : index
    %c0_30 = arith.constant 0 : index
    %14 = vector.load %arg7[%c2_28, %c0_29, %c0_30] : memref<18x18x64xf32, #tpu.memory_space<vmem>>, vector<16x16x64xf32>
    %c2_31 = arith.constant 2 : index
    %c1_32 = arith.constant 1 : index
    %c0_33 = arith.constant 0 : index
    %15 = vector.load %arg7[%c2_31, %c1_32, %c0_33] : memref<18x18x64xf32, #tpu.memory_space<vmem>>, vector<16x16x64xf32>
    %c2_34 = arith.constant 2 : index
    %c2_35 = arith.constant 2 : index
    %c0_36 = arith.constant 0 : index
    %16 = vector.load %arg7[%c2_34, %c2_35, %c0_36] : memref<18x18x64xf32, #tpu.memory_space<vmem>>, vector<16x16x64xf32>
    %17 = tpu.concatenate %8, %9, %10, %11, %12, %13, %14, %15, %16 in 2 : vector<16x16x64xf32>, vector<16x16x64xf32>, vector<16x16x64xf32>, vector<16x16x64xf32>, vector<16x16x64xf32>, vector<16x16x64xf32>, vector<16x16x64xf32>, vector<16x16x64xf32>, vector<16x16x64xf32> -> vector<16x16x576xf32>
    %18 = vector.shape_cast %17 : vector<16x16x576xf32> to vector<256x576xf32>
    %c0_37 = arith.constant 0 : index
    %c0_38 = arith.constant 0 : index
    %19 = vector.load %arg2[%c0_37, %c0_38] : memref<576x64xf32, #tpu.memory_space<vmem>>, vector<576x64xf32>
    %cst_39 = arith.constant dense<0.000000e+00> : vector<256x64xf32>
    %20 = tpu.matmul %18, %19, %cst_39 {dimension_numbers = #tpu.dot_dimension_numbers<[1], [0], [0], [1], [0, 0, 1, 1], [], []>} : vector<256x576xf32>, vector<576x64xf32>, vector<256x64xf32> -> vector<256x64xf32>
    %c0_40 = arith.constant 0 : index
    %c0_41 = arith.constant 0 : index
    %21 = vector.load %arg3[%c0_40, %c0_41] : memref<1x64xf32, #tpu.memory_space<vmem>>, vector<1x64xf32>
    %22 = vector.broadcast %21 : vector<1x64xf32> to vector<256x64xf32>
    %23 = arith.addf %20, %22 : vector<256x64xf32>
    %cst_42 = arith.constant 0.000000e+00 : f32
    %24 = vector.broadcast %cst_42 : f32 to vector<256x64xf32>
    %25 = arith.maximumf %23, %24 : vector<256x64xf32>
    %26 = vector.shape_cast %25 : vector<256x64xf32> to vector<16x16x64xf32>
    %c1_43 = arith.constant 1 : index
    %c1_44 = arith.constant 1 : index
    %c0_45 = arith.constant 0 : index
    %27 = vector.load %arg8[%c1_43, %c1_44, %c0_45] : memref<18x18x64xf32, #tpu.memory_space<vmem>>, vector<16x16x64xf32>
    tpu.vector_store %arg8[%c1_43, %c1_44, %c0_45], %26 {strides = array<i32>} : memref<18x18x64xf32, #tpu.memory_space<vmem>>, vector<16x16x64xf32>,
    %c0_46 = arith.constant 0 : index
    %c0_47 = arith.constant 0 : index
    %c0_48 = arith.constant 0 : index
    %28 = vector.load %arg8[%c0_46, %c0_47, %c0_48] : memref<18x18x64xf32, #tpu.memory_space<vmem>>, vector<16x16x64xf32>
    %c0_49 = arith.constant 0 : index
    %c1_50 = arith.constant 1 : index
    %c0_51 = arith.constant 0 : index
    %29 = vector.load %arg8[%c0_49, %c1_50, %c0_51] : memref<18x18x64xf32, #tpu.memory_space<vmem>>, vector<16x16x64xf32>
    %c0_52 = arith.constant 0 : index
    %c2_53 = arith.constant 2 : index
    %c0_54 = arith.constant 0 : index
    %30 = vector.load %arg8[%c0_52, %c2_53, %c0_54] : memref<18x18x64xf32, #tpu.memory_space<vmem>>, vector<16x16x64xf32>
    %c1_55 = arith.constant 1 : index
    %c0_56 = arith.constant 0 : index
    %c0_57 = arith.constant 0 : index
    %31 = vector.load %arg8[%c1_55, %c0_56, %c0_57] : memref<18x18x64xf32, #tpu.memory_space<vmem>>, vector<16x16x64xf32>
    %c1_58 = arith.constant 1 : index
    %c1_59 = arith.constant 1 : index
    %c0_60 = arith.constant 0 : index
    %32 = vector.load %arg8[%c1_58, %c1_59, %c0_60] : memref<18x18x64xf32, #tpu.memory_space<vmem>>, vector<16x16x64xf32>
    %c1_61 = arith.constant 1 : index
    %c2_62 = arith.constant 2 : index
    %c0_63 = arith.constant 0 : index
    %33 = vector.load %arg8[%c1_61, %c2_62, %c0_63] : memref<18x18x64xf32, #tpu.memory_space<vmem>>, vector<16x16x64xf32>
    %c2_64 = arith.constant 2 : index
    %c0_65 = arith.constant 0 : index
    %c0_66 = arith.constant 0 : index
    %34 = vector.load %arg8[%c2_64, %c0_65, %c0_66] : memref<18x18x64xf32, #tpu.memory_space<vmem>>, vector<16x16x64xf32>
    %c2_67 = arith.constant 2 : index
    %c1_68 = arith.constant 1 : index
    %c0_69 = arith.constant 0 : index
    %35 = vector.load %arg8[%c2_67, %c1_68, %c0_69] : memref<18x18x64xf32, #tpu.memory_space<vmem>>, vector<16x16x64xf32>
    %c2_70 = arith.constant 2 : index
    %c2_71 = arith.constant 2 : index
    %c0_72 = arith.constant 0 : index
    %36 = vector.load %arg8[%c2_70, %c2_71, %c0_72] : memref<18x18x64xf32, #tpu.memory_space<vmem>>, vector<16x16x64xf32>
    %37 = tpu.concatenate %28, %29, %30, %31, %32, %33, %34, %35, %36 in 2 : vector<16x16x64xf32>, vector<16x16x64xf32>, vector<16x16x64xf32>, vector<16x16x64xf32>, vector<16x16x64xf32>, vector<16x16x64xf32>, vector<16x16x64xf32>, vector<16x16x64xf32>, vector<16x16x64xf32> -> vector<16x16x576xf32>
    %38 = vector.shape_cast %37 : vector<16x16x576xf32> to vector<256x576xf32>
    %c0_73 = arith.constant 0 : index
    %c0_74 = arith.constant 0 : index
    %39 = vector.load %arg4[%c0_73, %c0_74] : memref<576x64xf32, #tpu.memory_space<vmem>>, vector<576x64xf32>
    %cst_75 = arith.constant dense<0.000000e+00> : vector<256x64xf32>
    %40 = tpu.matmul %38, %39, %cst_75 {dimension_numbers = #tpu.dot_dimension_numbers<[1], [0], [0], [1], [0, 0, 1, 1], [], []>} : vector<256x576xf32>, vector<576x64xf32>, vector<256x64xf32> -> vector<256x64xf32>
    %c0_76 = arith.constant 0 : index
    %c0_77 = arith.constant 0 : index
    %41 = vector.load %arg5[%c0_76, %c0_77] : memref<1x64xf32, #tpu.memory_space<vmem>>, vector<1x64xf32>
    %42 = vector.broadcast %41 : vector<1x64xf32> to vector<256x64xf32>
    %43 = arith.addf %40, %42 : vector<256x64xf32>
    %cst_78 = arith.constant 1.000000e+00 : f32
    %44 = vector.broadcast %cst_78 : f32 to vector<256x64xf32>
    %45 = arith.mulf %44, %43 : vector<256x64xf32>
    %46 = arith.addf %1, %45 : vector<256x64xf32>
    %c0_79 = arith.constant 0 : index
    %c0_80 = arith.constant 0 : index
    %c0_81 = arith.constant 0 : index
    %47 = vector.load %arg6[%c0_79, %c0_80, %c0_81] : memref<1x256x64xf32, #tpu.memory_space<vmem>>, vector<1x256x64xf32>
    %48 = vector.shape_cast %47 : vector<1x256x64xf32> to vector<256x64xf32>
    %49 = vector.shape_cast %46 : vector<256x64xf32> to vector<1x256x64xf32>
    tpu.vector_store %arg6[%c0_79, %c0_80, %c0_81], %49 {strides = array<i32>} : memref<1x256x64xf32, #tpu.memory_space<vmem>>, vector<1x256x64xf32>,
    return
  }
  func.func @transform_0(%arg0: i32) -> (i32, i32, i32) {
    %c0_i32 = arith.constant 0 : i32
    %c0_i32_0 = arith.constant 0 : i32
    %c0_i32_1 = arith.constant 0 : i32
    return %arg0, %c0_i32, %c0_i32_0 : i32, i32, i32
  }
  func.func @transform_1(%arg0: i32) -> (i32, i32) {
    %c0_i32 = arith.constant 0 : i32
    %c0_i32_0 = arith.constant 0 : i32
    %c0_i32_1 = arith.constant 0 : i32
    return %c0_i32, %c0_i32_0 : i32, i32
  }
  func.func @transform_2(%arg0: i32) -> (i32, i32) {
    %c0_i32 = arith.constant 0 : i32
    %c0_i32_0 = arith.constant 0 : i32
    %c0_i32_1 = arith.constant 0 : i32
    return %c0_i32, %c0_i32_0 : i32, i32
  }
  func.func @transform_3(%arg0: i32) -> (i32, i32) {
    %c0_i32 = arith.constant 0 : i32
    %c0_i32_0 = arith.constant 0 : i32
    %c0_i32_1 = arith.constant 0 : i32
    return %c0_i32, %c0_i32_0 : i32, i32
  }
  func.func @transform_4(%arg0: i32) -> (i32, i32) {
    %c0_i32 = arith.constant 0 : i32
    %c0_i32_0 = arith.constant 0 : i32
    %c0_i32_1 = arith.constant 0 : i32
    return %c0_i32, %c0_i32_0 : i32, i32
  }
  func.func @transform_5(%arg0: i32) -> (i32, i32, i32) {
    %c0_i32 = arith.constant 0 : i32
    %c0_i32_0 = arith.constant 0 : i32
    %c0_i32_1 = arith.constant 0 : i32
    return %arg0, %c0_i32, %c0_i32_0 : i32, i32, i32
  }
}

</mosaic_0001>

<bundles_post_ra>
// kernel: tpu_custom_call.1
= control target key start
LH: loop header
LB: loop body
LE: loop exit
PB: predicated region body
PF: predicated region fallthrough
CT: control target
= control target key end

     0   :  { %s5547_s18 = smov 0   ;;  %s8086_s0 = inlined_call_operand.vmem [shape: f32[2,256,64], index: 0, kind: input, shape index: {}]   ;;  %s8087_s1 = inlined_call_operand.vmem [shape: f32[576,64], index: 1, kind: input, shape index: {}]   ;;  %s8088_s2 = inlined_call_operand.vmem [shape: f32[1,64], index: 2, kind: input, shape index: {}]   ;;  %s8089_s3 = inlined_call_operand.vmem [shape: f32[576,64], index: 3, kind: input, shape index: {}]   ;;  %s8090_s4 = inlined_call_operand.vmem [shape: f32[1,64], index: 4, kind: input, shape index: {}]   ;;  %s8091_s5 = inlined_call_operand.vmem [shape: f32[2,256,64], index: 5, kind: output, shape index: {}]  }
   0x1 LB: > { %s4142_s19 = sadd.s32 4294967295, %s5512_s18   ;;  %p4146_p0 = scmp.ge.s32.totalorder %s5512_s18, 1  ;;  %s5512_s18 = sphi %s5547_s18, %s15_s18  }
   0x2   : > { %p187_p1 = scmp.lt.s32.totalorder %s5512_s18, 3 }
   0x4   : > { %p188_p2 = pnand %p4146_p0, %p187_p1 }
   0x6   : > { %191 = sbr.rel (%p188_p2) target bundleno = 1169 (0x491), region = 40 }
   0xd   : > { %p5557_p3 = scmp.lt.s32.totalorder %s4142_s19, 1  ;;  %vm257_vm0 = vcmask 523264   ;;  %vm260_vm1 = vcmask 517120   ;;  %v5514_v0 = vmov 0.0   ;;  %v8092_v1 = vmov 0.0|0.0   ;;  %v1329_v2 = vld [vmem:[%s8087_s1] sm:$0xff] }
   0xe   : > { %258 = vst.msk [vmem:[#allocation2] sm:$0xff] %vm257_vm0, %v5514_v0  ;;  %259 = vst.msk [vmem:[#allocation2 + $0x8] sm:$0xff] %vm257_vm0, %v5514_v0  ;;  %4429 = vmatprep.subr.bf16.mxu0 %v8092_v1  ;;  %v1330_v3 = vld [vmem:[%s8087_s1 + $0x8] sm:$0xff]  ;;  %v1331_v4 = vld [vmem:[%s8087_s1 + $0x10] sm:$0xff]  ;;  %s5516_s22 = smov 64  }
   0xf   : > { %262 = vst.msk [vmem:[#allocation2 + $0x18] sm:$0xff] %vm257_vm0, %v5514_v0  ;;  %263 = vst.msk [vmem:[#allocation2 + $0x20] sm:$0xff] %vm257_vm0, %v5514_v0  ;;  %s8311_s19 = smov (!%p5557_p3, %s4142_s19), 1  ;;  %v4430_v5 = vpack.c.bf16 %v1330_v3, %v1329_v2  ;;  %v1332_v6 = vld [vmem:[%s8087_s1 + $0x18] sm:$0xff]  ;;  %v1333_v8 = vld [vmem:[%s8087_s1 + $0x20] sm:$0xff] }
  0x10   : > { %265 = vst.msk [vmem:[#allocation2 + $0x30] sm:$0xff] %vm257_vm0, %v5514_v0  ;;  %266 = vst.msk [vmem:[#allocation2 + $0x38] sm:$0xff] %vm257_vm0, %v5514_v0  ;;  %s4219_s29 = sshll.u32 %s8311_s19, 8  ;;  %v4433_v7 = vpack.c.bf16 %v1332_v6, %v1331_v4  ;;  %v1334_v9 = vld [vmem:[%s8087_s1 + $0x28] sm:$0xff]  ;;  %v1335_v18 = vld [vmem:[%s8087_s1 + $0x30] sm:$0xff] }
  0x11   : > { %268 = vst.msk [vmem:[#allocation2 + $0x48] sm:$0xff] %vm257_vm0, %v5514_v0  ;;  %269 = vst.msk [vmem:[#allocation2 + $0x50] sm:$0xff] %vm257_vm0, %v5514_v0  ;;  %4431 = vmatpush1.bf16.msra.mxu0 %v4430_v5  ;;  %s5802_s7 = scalar_lea.vmem %s8086_s0, %s4219_s29  ;;  %v4436_v17 = vpack.c.bf16 %v1334_v9, %v1333_v8  ;;  %v1336_v19 = vld [vmem:[%s8087_s1 + $0x38] sm:$0xff]  ;;  %v1337_v30 = vld [vmem:[%s8087_s1 + $0x40] sm:$0xff]  ;;  %s7935_s24 = scalar_lea.vmem %s8091_s5, %s4219_s29 }
  0x12   : > { %271 = vst.msk [vmem:[#allocation2 + $0x60] sm:$0xff] %vm257_vm0, %v5514_v0  ;;  %272 = vst.msk [vmem:[#allocation2 + $0x68] sm:$0xff] %vm257_vm0, %v5514_v0  ;;  %4432 = vmatprep.subr.bf16.mxu0 %v8092_v1  ;;  %v5812_v10 = vld [vmem:[%s5802_s7] sm:$0xff]  ;;  %v5815_v11 = vld [vmem:[%s5802_s7 + $0x8] sm:$0xff]  ;;  %v4439_v33 = vpack.c.bf16 %v1336_v19, %v1335_v18 }
  0x13   : > { %274 = vst.msk [vmem:[#allocation2 + $0x78] sm:$0xff] %vm257_vm0, %v5514_v0  ;;  %275 = vst.msk [vmem:[#allocation2 + $0x80] sm:$0xff] %vm257_vm0, %v5514_v0  ;;  %v5818_v12 = vld [vmem:[%s5802_s7 + $0x10] sm:$0xff]  ;;  %v5827_v13 = vld [vmem:[%s5802_s7 + $0x18] sm:$0xff] }
  0x14   : > { %277 = vst.msk [vmem:[#allocation2 + $0x90] sm:$0xff] %vm257_vm0, %v5514_v0  ;;  %278 = vst.msk [vmem:[#allocation2 + $0x98] sm:$0xff] %vm257_vm0, %v5514_v0  ;;  %v5830_v14 = vld [vmem:[%s5802_s7 + $0x20] sm:$0xff]  ;;  %v5833_v15 = vld [vmem:[%s5802_s7 + $0x28] sm:$0xff] }
  0x15   : > { %280 = vst.msk [vmem:[#allocation2 + $0xa8] sm:$0xff] %vm257_vm0, %v5514_v0  ;;  %281 = vst.msk [vmem:[#allocation2 + $0xb0] sm:$0xff] %vm257_vm0, %v5514_v0  ;;  %v5842_v16 = vld [vmem:[%s5802_s7 + $0x30] sm:$0xff]  ;;  %4434 = vmatpush1.bf16.msra.mxu0 %v4433_v7  ;;  %v5853_v20 = vld [vmem:[%s5802_s7 + $0x38] sm:$0xff] }
  0x16   : > { %283 = vst.msk [vmem:[#allocation2 + $0xc0] sm:$0xff] %vm257_vm0, %v5514_v0  ;;  %284 = vst.msk [vmem:[#allocation2 + $0xc8] sm:$0xff] %vm257_vm0, %v5514_v0  ;;  %v5856_v21 = vld [vmem:[%s5802_s7 + $0x40] sm:$0xff]  ;;  %v5859_v22 = vld [vmem:[%s5802_s7 + $0x48] sm:$0xff]  ;;  %4435 = vmatprep.subr.bf16.mxu0 %v8092_v1 }
  0x17   : > { %286 = vst.msk [vmem:[#allocation2 + $0xd8] sm:$0xff] %vm257_vm0, %v5514_v0  ;;  %287 = vst.msk [vmem:[#allocation2 + $0xe0] sm:$0xff] %vm257_vm0, %v5514_v0  ;;  %v432_v23 = vld [vmem:[#allocation2 + $0x1] sm:$0xff]  ;;  %v5869_v24 = vld [vmem:[%s5802_s7 + $0x50] sm:$0xff] }
  0x18   : > { %289 = vst.msk [vmem:[#allocation2 + $0xf0] sm:$0xff] %vm257_vm0, %v5514_v0  ;;  %290 = vst.msk [vmem:[#allocation2 + $0xf8] sm:$0xff] %vm257_vm0, %v5514_v0  ;;  %v5872_v25 = vld [vmem:[%s5802_s7 + $0x58] sm:$0xff]  ;;  %v5875_v26 = vld [vmem:[%s5802_s7 + $0x60] sm:$0xff] }
  0x19   : > { %292 = vst.msk [vmem:[#allocation2 + $0x108] sm:$0xff] %vm257_vm0, %v5514_v0  ;;  %293 = vst.msk [vmem:[#allocation2 + $0x110] sm:$0xff] %vm257_vm0, %v5514_v0  ;;  %v5884_v27 = vld [vmem:[%s5802_s7 + $0x68] sm:$0xff]  ;;  %v5887_v28 = vld [vmem:[%s5802_s7 + $0x70] sm:$0xff]  ;;  %4437 = vmatpush1.bf16.msra.mxu0 %v4436_v17 }
  0x1a   : > { %295 = vst.msk [vmem:[#allocation2 + $0x120] sm:$0xff] %vm257_vm0, %v5514_v0  ;;  %296 = vst.msk [vmem:[#allocation2 + $0x128] sm:$0xff] %vm257_vm0, %v5514_v0  ;;  %v5890_v29 = vld [vmem:[%s5802_s7 + $0x78] sm:$0xff]  ;;  %v1338_v31 = vld [vmem:[%s8087_s1 + $0x48] sm:$0xff]  ;;  %4438 = vmatprep.subr.bf16.mxu0 %v8092_v1 }
  0x1b   : > { %298 = vst.msk [vmem:[#allocation2 + $0x138] sm:$0xff] %vm257_vm0, %v5514_v0  ;;  %299 = vst.msk [vmem:[#allocation2 + $0x140] sm:$0xff] %vm257_vm0, %v5514_v0  ;;  %v5905_v32 = vld [vmem:[%s5802_s7 + $0x80] sm:$0xff]  ;;  %v5908_v34 = vld [vmem:[%s5802_s7 + $0x88] sm:$0xff]  ;;  %v4442_v47 = vpack.c.bf16 %v1338_v31, %v1337_v30 }
  0x1c   : > { %301 = vst.msk [vmem:[#allocation2 + $0x150] sm:$0xff] %vm257_vm0, %v5514_v0  ;;  %302 = vst.msk [vmem:[#allocation2 + $0x158] sm:$0xff] %vm257_vm0, %v5514_v0  ;;  %v5911_v35 = vld [vmem:[%s5802_s7 + $0x90] sm:$0xff]  ;;  %v5921_v37 = vld [vmem:[%s5802_s7 + $0x98] sm:$0xff] }
  0x1d   : > { %304 = vst.msk [vmem:[#allocation2 + $0x168] sm:$0xff] %vm257_vm0, %v5514_v0  ;;  %305 = vst.msk [vmem:[#allocation2 + $0x170] sm:$0xff] %vm257_vm0, %v5514_v0  ;;  %v5924_v38 = vld [vmem:[%s5802_s7 + $0xa0] sm:$0xff]  ;;  %4440 = vmatpush1.bf16.msra.mxu0 %v4439_v33  ;;  %v1339_v49 = vld [vmem:[%s8087_s1 + $0x50] sm:$0xff] }
  0x1e   : > { %307 = vst.msk [vmem:[#allocation2 + $0x180] sm:$0xff] %vm257_vm0, %v5514_v0  ;;  %308 = vst.msk [vmem:[#allocation2 + $0x188] sm:$0xff] %vm257_vm0, %v5514_v0  ;;  %4441 = vmatprep.subr.bf16.mxu0 %v8092_v1  ;;  %v1340_v50 = vld [vmem:[%s8087_s1 + $0x58] sm:$0xff]  ;;  %v1341_v58 = vld [vmem:[%s8087_s1 + $0x60] sm:$0xff] }
  0x1f   : > { %310 = vst.msk [vmem:[#allocation2 + $0x198] sm:$0xff] %vm257_vm0, %v5514_v0  ;;  %311 = vst.msk [vmem:[#allocation2 + $0x1a0] sm:$0xff] %vm257_vm0, %v5514_v0  ;;  %v4445_v56 = vpack.c.bf16 %v1340_v50, %v1339_v49  ;;  %v1342_v59 = vld [vmem:[%s8087_s1 + $0x68] sm:$0xff]  ;;  %v1343_v4 = vld [vmem:[%s8087_s1 + $0x70] sm:$0xff] }
  0x20   : > { %313 = vst.msk [vmem:[#allocation3] sm:$0xff] %vm257_vm0, %v5514_v0  ;;  %314 = vst.msk [vmem:[#allocation3 + $0x8] sm:$0xff] %vm257_vm0, %v5514_v0  ;;  %v4448_v2 = vpack.c.bf16 %v1342_v59, %v1341_v58  ;;  %v1344_v5 = vld [vmem:[%s8087_s1 + $0x78] sm:$0xff]  ;;  %v6002_v18 = vld [vmem:[%s5802_s7 + $0xa8] sm:$0xff] }
  0x21   : > { %316 = vst.msk [vmem:[#allocation3 + $0x18] sm:$0xff] %vm257_vm0, %v5514_v0  ;;  %317 = vst.msk [vmem:[#allocation3 + $0x20] sm:$0xff] %vm257_vm0, %v5514_v0  ;;  %4443 = vmatpush1.bf16.msra.mxu0 %v4442_v47  ;;  %v4451_v19 = vpack.c.bf16 %v1344_v5, %v1343_v4  ;;  %v1345_v31 = vld [vmem:[%s8087_s1 + $0x80] sm:$0xff]  ;;  %v1346_v33 = vld [vmem:[%s8087_s1 + $0x88] sm:$0xff] }
  0x22   : > { %319 = vst.msk [vmem:[#allocation3 + $0x30] sm:$0xff] %vm257_vm0, %v5514_v0  ;;  %320 = vst.msk [vmem:[#allocation3 + $0x38] sm:$0xff] %vm257_vm0, %v5514_v0  ;;  %4444 = vmatprep.subr.bf16.mxu0 %v8092_v1  ;;  %v4454_v49 = vpack.c.bf16 %v1346_v33, %v1345_v31  ;;  %v6043_v50 = vld [vmem:[%s5802_s7 + $0xc8] sm:$0xff]  ;;  %v6058_v58 = vld [vmem:[%s5802_s7 + $0xd0] sm:$0xff] }
  0x23   : > { %322 = vst.msk [vmem:[#allocation3 + $0x48] sm:$0xff] %vm257_vm0, %v5514_v0  ;;  %323 = vst.msk [vmem:[#allocation3 + $0x50] sm:$0xff] %vm257_vm0, %v5514_v0  ;;  %v1349_v31 = vld [vmem:[%s8087_s1 + $0xa0] sm:$0xff]  ;;  %v1350_v33 = vld [vmem:[%s8087_s1 + $0xa8] sm:$0xff] }
  0x24   : > { %325 = vst.msk [vmem:[#allocation3 + $0x60] sm:$0xff] %vm257_vm0, %v5514_v0  ;;  %326 = vst.msk [vmem:[#allocation3 + $0x68] sm:$0xff] %vm257_vm0, %v5514_v0 }
  0x25   : > { %328 = vst.msk [vmem:[#allocation3 + $0x78] sm:$0xff] %vm257_vm0, %v5514_v0  ;;  %329 = vst.msk [vmem:[#allocation3 + $0x80] sm:$0xff] %vm257_vm0, %v5514_v0  ;;  %4446 = vmatpush1.bf16.msra.mxu0 %v4445_v56  ;;  %v1347_v56 = vld [vmem:[%s8087_s1 + $0x90] sm:$0xff] }
  0x26   : > { %331 = vst.msk [vmem:[#allocation3 + $0x90] sm:$0xff] %vm257_vm0, %v5514_v0  ;;  %332 = vst.msk [vmem:[#allocation3 + $0x98] sm:$0xff] %vm257_vm0, %v5514_v0  ;;  %4447 = vmatprep.subr.bf16.mxu0 %v8092_v1 }
  0x27   : > { %334 = vst.msk [vmem:[#allocation3 + $0xa8] sm:$0xff] %vm257_vm0, %v5514_v0  ;;  %335 = vst.msk [vmem:[#allocation3 + $0xb0] sm:$0xff] %vm257_vm0, %v5514_v0 }
  0x28   : > { %337 = vst.msk [vmem:[#allocation3 + $0xc0] sm:$0xff] %vm257_vm0, %v5514_v0  ;;  %338 = vst.msk [vmem:[#allocation3 + $0xc8] sm:$0xff] %vm257_vm0, %v5514_v0 }
  0x29   : > { %340 = vst.msk [vmem:[#allocation3 + $0xd8] sm:$0xff] %vm257_vm0, %v5514_v0  ;;  %341 = vst.msk [vmem:[#allocation3 + $0xe0] sm:$0xff] %vm257_vm0, %v5514_v0  ;;  %4449 = vmatpush1.bf16.msra.mxu0 %v4448_v2 }
  0x2a   : > { %343 = vst.msk [vmem:[#allocation3 + $0xf0] sm:$0xff] %vm257_vm0, %v5514_v0  ;;  %344 = vst.msk [vmem:[#allocation3 + $0xf8] sm:$0xff] %vm257_vm0, %v5514_v0  ;;  %4450 = vmatprep.subr.bf16.mxu0 %v8092_v1 }
  0x2b   : > { %346 = vst.msk [vmem:[#allocation3 + $0x108] sm:$0xff] %vm257_vm0, %v5514_v0  ;;  %347 = vst.msk [vmem:[#allocation3 + $0x110] sm:$0xff] %vm257_vm0, %v5514_v0 }
  0x2c   : > { %349 = vst.msk [vmem:[#allocation3 + $0x120] sm:$0xff] %vm257_vm0, %v5514_v0  ;;  %350 = vst.msk [vmem:[#allocation3 + $0x128] sm:$0xff] %vm257_vm0, %v5514_v0 }
  0x2d   : > { %352 = vst.msk [vmem:[#allocation3 + $0x138] sm:$0xff] %vm257_vm0, %v5514_v0  ;;  %353 = vst.msk [vmem:[#allocation3 + $0x140] sm:$0xff] %vm257_vm0, %v5514_v0  ;;  %4452 = vmatpush1.bf16.msra.mxu0 %v4451_v19 }
  0x2e   : > { %355 = vst.msk [vmem:[#allocation3 + $0x150] sm:$0xff] %vm257_vm0, %v5514_v0  ;;  %356 = vst.msk [vmem:[#allocation3 + $0x158] sm:$0xff] %vm257_vm0, %v5514_v0  ;;  %4453 = vmatprep.subr.bf16.mxu0 %v8092_v1 }
  0x2f   : > { %358 = vst.msk [vmem:[#allocation3 + $0x168] sm:$0xff] %vm257_vm0, %v5514_v0  ;;  %359 = vst.msk [vmem:[#allocation3 + $0x170] sm:$0xff] %vm257_vm0, %v5514_v0 }
  0x30   : > { %361 = vst.msk [vmem:[#allocation3 + $0x180] sm:$0xff] %vm257_vm0, %v5514_v0  ;;  %362 = vst.msk [vmem:[#allocation3 + $0x188] sm:$0xff] %vm257_vm0, %v5514_v0 }
  0x31   : > { %364 = vst.msk [vmem:[#allocation3 + $0x198] sm:$0xff] %vm257_vm0, %v5514_v0  ;;  %365 = vst.msk [vmem:[#allocation3 + $0x1a0] sm:$0xff] %vm257_vm0, %v5514_v0  ;;  %4455 = vmatpush1.bf16.msra.mxu0 %v4454_v49 }
  0x32   : > { %261 = vst.msk [vmem:[#allocation2 + $0x10] sm:$0x3] %vm260_vm1, %v5514_v0  ;;  %264 = vst.msk [vmem:[#allocation2 + $0x28] sm:$0x3] %vm260_vm1, %v5514_v0  ;;  %4456 = vmatprep.subr.bf16.mxu0 %v8092_v1 }
  0x33   : > { %267 = vst.msk [vmem:[#allocation2 + $0x40] sm:$0x3] %vm260_vm1, %v5514_v0  ;;  %270 = vst.msk [vmem:[#allocation2 + $0x58] sm:$0x3] %vm260_vm1, %v5514_v0 }
  0x34   : > { %273 = vst.msk [vmem:[#allocation2 + $0x70] sm:$0x3] %vm260_vm1, %v5514_v0  ;;  %276 = vst.msk [vmem:[#allocation2 + $0x88] sm:$0x3] %vm260_vm1, %v5514_v0 }
  0x35   : > { %279 = vst.msk [vmem:[#allocation2 + $0xa0] sm:$0x3] %vm260_vm1, %v5514_v0  ;;  %282 = vst.msk [vmem:[#allocation2 + $0xb8] sm:$0x3] %vm260_vm1, %v5514_v0 }
  0x36   : > { %285 = vst.msk [vmem:[#allocation2 + $0xd0] sm:$0x3] %vm260_vm1, %v5514_v0  ;;  %288 = vst.msk [vmem:[#allocation2 + $0xe8] sm:$0x3] %vm260_vm1, %v5514_v0 }
  0x37   : > { %291 = vst.msk [vmem:[#allocation2 + $0x100] sm:$0x3] %vm260_vm1, %v5514_v0  ;;  %294 = vst.msk [vmem:[#allocation2 + $0x118] sm:$0x3] %vm260_vm1, %v5514_v0 }
  0x38   : > { %297 = vst.msk [vmem:[#allocation2 + $0x130] sm:$0x3] %vm260_vm1, %v5514_v0  ;;  %300 = vst.msk [vmem:[#allocation2 + $0x148] sm:$0x3] %vm260_vm1, %v5514_v0 }
  0x39   : > { %303 = vst.msk [vmem:[#allocation2 + $0x160] sm:$0x3] %vm260_vm1, %v5514_v0  ;;  %306 = vst.msk [vmem:[#allocation2 + $0x178] sm:$0x3] %vm260_vm1, %v5514_v0  ;;  %v433_v36 = vld [vmem:[#allocation2 + $0x9] sm:$0xff] }
  0x3a   : > { %309 = vst.msk [vmem:[#allocation2 + $0x190] sm:$0x3] %vm260_vm1, %v5514_v0  ;;  %312 = vst.msk [vmem:[#allocation2 + $0x1a8] sm:$0x3] %vm260_vm1, %v5514_v0 }
  0x3b   : > { %315 = vst.msk [vmem:[#allocation3 + $0x10] sm:$0x3] %vm260_vm1, %v5514_v0  ;;  %318 = vst.msk [vmem:[#allocation3 + $0x28] sm:$0x3] %vm260_vm1, %v5514_v0 }
  0x3c   : > { %321 = vst.msk [vmem:[#allocation3 + $0x40] sm:$0x3] %vm260_vm1, %v5514_v0  ;;  %324 = vst.msk [vmem:[#allocation3 + $0x58] sm:$0x3] %vm260_vm1, %v5514_v0 }
  0x3d   : > { %327 = vst.msk [vmem:[#allocation3 + $0x70] sm:$0x3] %vm260_vm1, %v5514_v0  ;;  %330 = vst.msk [vmem:[#allocation3 + $0x88] sm:$0x3] %vm260_vm1, %v5514_v0 }
  0x3e   : > { %333 = vst.msk [vmem:[#allocation3 + $0xa0] sm:$0x3] %vm260_vm1, %v5514_v0  ;;  %336 = vst.msk [vmem:[#allocation3 + $0xb8] sm:$0x3] %vm260_vm1, %v5514_v0 }
  0x3f   : > { %339 = vst.msk [vmem:[#allocation3 + $0xd0] sm:$0x3] %vm260_vm1, %v5514_v0  ;;  %342 = vst.msk [vmem:[#allocation3 + $0xe8] sm:$0x3] %vm260_vm1, %v5514_v0 }
  0x40   : > { %345 = vst.msk [vmem:[#allocation3 + $0x100] sm:$0x3] %vm260_vm1, %v5514_v0  ;;  %348 = vst.msk [vmem:[#allocation3 + $0x118] sm:$0x3] %vm260_vm1, %v5514_v0 }
  0x41   : > { %351 = vst.msk [vmem:[#allocation3 + $0x130] sm:$0x3] %vm260_vm1, %v5514_v0  ;;  %354 = vst.msk [vmem:[#allocation3 + $0x148] sm:$0x3] %vm260_vm1, %v5514_v0 }
  0x42   : > { %357 = vst.msk [vmem:[#allocation3 + $0x160] sm:$0x3] %vm260_vm1, %v5514_v0  ;;  %360 = vst.msk [vmem:[#allocation3 + $0x178] sm:$0x3] %vm260_vm1, %v5514_v0 }
  0x43   : > { %363 = vst.msk [vmem:[#allocation3 + $0x190] sm:$0x3] %vm260_vm1, %v5514_v0  ;;  %366 = vst.msk [vmem:[#allocation3 + $0x1a8] sm:$0x3] %vm260_vm1, %v5514_v0 }
  0x44   : > { %8164 = vst [vmem:[#allocation4_spill] sm:$0xff] %v5812_v10  ;;  %8165 = vst [vmem:[#allocation5_spill] sm:$0xff] %v5815_v11 }
  0x45   : > { %8166 = vst [vmem:[#allocation6_spill] sm:$0xff] %v5818_v12  ;;  %368 = vst.msk [vmem:[#allocation2 + $0x19] sm:$0xff] %vm257_vm0, %v5812_v10 }
  0x46   : > { %369 = vst.msk [vmem:[#allocation2 + $0x21] sm:$0xff] %vm257_vm0, %v5815_v11  ;;  %370 = vst.msk [vmem:[#allocation2 + $0x31] sm:$0xff] %vm257_vm0, %v5818_v12 }
  0x47   : > { %8167 = vst [vmem:[#allocation7_spill] sm:$0xff] %v5827_v13  ;;  %8168 = vst [vmem:[#allocation8_spill] sm:$0xff] %v5830_v14 }
  0x48   : > { %8169 = vst [vmem:[#allocation9_spill] sm:$0xff] %v5833_v15  ;;  %371 = vst.msk [vmem:[#allocation2 + $0x39] sm:$0xff] %vm257_vm0, %v5827_v13 }
  0x49   : > { %372 = vst.msk [vmem:[#allocation2 + $0x49] sm:$0xff] %vm257_vm0, %v5830_v14  ;;  %373 = vst.msk [vmem:[#allocation2 + $0x51] sm:$0xff] %vm257_vm0, %v5833_v15 }
  0x4a   : > { %8170 = vst [vmem:[#allocation10_spill] sm:$0xff] %v5842_v16  ;;  %374 = vst.msk [vmem:[#allocation2 + $0x61] sm:$0xff] %vm257_vm0, %v5842_v16 }
  0x4b   : > { %8171 = vst [vmem:[#allocation11_spill] sm:$0xff] %v5853_v20  ;;  %8172 = vst [vmem:[#allocation12_spill] sm:$0xff] %v5856_v21 }
  0x4c   : > { %8173 = vst [vmem:[#allocation13_spill] sm:$0xff] %v5859_v22  ;;  %375 = vst.msk [vmem:[#allocation2 + $0x69] sm:$0xff] %vm257_vm0, %v5853_v20  ;;  %v5926_v39 = vld [vmem:[#allocation2 + $0x18] sm:$0xff] }
  0x4d   : > { %376 = vst.msk [vmem:[#allocation2 + $0x79] sm:$0xff] %vm257_vm0, %v5856_v21  ;;  %377 = vst.msk [vmem:[#allocation2 + $0x81] sm:$0xff] %vm257_vm0, %v5859_v22  ;;  %v5928_v40 = vld [vmem:[#allocation2 + $0x20] sm:$0xff]  ;;  %v4864_v42 = vpack.i.bf16 %v432_v23, %v5926_v39  ;;  %v5935_v43 = vld [vmem:[#allocation2 + $0x30] sm:$0xff] }
  0x4e   : > { %8174 = vst [vmem:[#allocation14_spill] sm:$0xff] %v5869_v24  ;;  %8175 = vst [vmem:[#allocation15_spill] sm:$0xff] %v5872_v25  ;;  %v434_v41 = vld [vmem:[#allocation2 + $0x19] sm:$0xff]  ;;  %v435_v44 = vld [vmem:[#allocation2 + $0x21] sm:$0xff]  ;;  %v4869_v48 = vpack.i.bf16 %v433_v36, %v5928_v40 }
  0x4f   : > { %8176 = vst [vmem:[#allocation16_spill] sm:$0xff] %v5875_v26  ;;  %378 = vst.msk [vmem:[#allocation2 + $0x91] sm:$0xff] %vm257_vm0, %v5869_v24  ;;  %v5937_v45 = vld [vmem:[#allocation2 + $0x38] sm:$0xff]  ;;  %v4874_v46 = vpack.i.bf16 %v434_v41, %v5935_v43  ;;  %4865 = vrot.lane.b32.xlu0 %v4864_v42, %s5516_s22  ;;  %v6007_v23 = vld [vmem:[%s5802_s7 + $0xb0] sm:$0xff] }
  0x50   : > { %379 = vst.msk [vmem:[#allocation2 + $0x99] sm:$0xff] %vm257_vm0, %v5872_v25  ;;  %380 = vst.msk [vmem:[#allocation2 + $0xa9] sm:$0xff] %vm257_vm0, %v5875_v26  ;;  %v4879_v51 = vpack.i.bf16 %v435_v44, %v5937_v45  ;;  %v5951_v52 = vld [vmem:[#allocation2 + $0x31] sm:$0xff]  ;;  %v5953_v53 = vld [vmem:[#allocation2 + $0x48] sm:$0xff] }
  0x51   : > { %8177 = vst [vmem:[#allocation17_spill] sm:$0xff] %v5884_v27  ;;  %8178 = vst [vmem:[#allocation18_spill] sm:$0xff] %v5887_v28  ;;  %4875 = vrot.lane.b32.xlu1 %v4874_v46, %s5516_s22  ;;  %v5955_v54 = vld [vmem:[#allocation2 + $0x39] sm:$0xff]  ;;  %v5957_v55 = vld [vmem:[#allocation2 + $0x50] sm:$0xff]  ;;  %v4884_v57 = vpack.i.bf16 %v5951_v52, %v5953_v53 }
  0x52   : > { %8179 = vst [vmem:[#allocation19_spill] sm:$0xff] %v5890_v29  ;;  %381 = vst.msk [vmem:[#allocation2 + $0xb1] sm:$0xff] %vm257_vm0, %v5884_v27  ;;  %v4889_v60 = vpack.i.bf16 %v5955_v54, %v5957_v55  ;;  %v5972_v61 = vld [vmem:[#allocation2 + $0x49] sm:$0xff]  ;;  %v5974_v62 = vld [vmem:[#allocation2 + $0x60] sm:$0xff] }
  0x53   : > { %382 = vst.msk [vmem:[#allocation2 + $0xc1] sm:$0xff] %vm257_vm0, %v5887_v28  ;;  %383 = vst.msk [vmem:[#allocation2 + $0xc9] sm:$0xff] %vm257_vm0, %v5890_v29  ;;  %4870 = vrot.lane.b32.xlu0 %v4869_v48, %s5516_s22  ;;  %v5976_v63 = vld [vmem:[#allocation2 + $0x51] sm:$0xff]  ;;  %v5978_v0 = vld [vmem:[#allocation2 + $0x68] sm:$0xff]  ;;  %v4894_v3 = vpack.i.bf16 %v5972_v61, %v5974_v62 }
  0x54   : > { %8180 = vst [vmem:[#allocation20_spill] sm:$0xff] %v5905_v32  ;;  %8181 = vst [vmem:[#allocation21_spill] sm:$0xff] %v5908_v34  ;;  %v4899_v6 = vpack.i.bf16 %v5976_v63, %v5978_v0  ;;  %v5993_v7 = vld [vmem:[#allocation2 + $0x61] sm:$0xff]  ;;  %v5995_v8 = vld [vmem:[#allocation2 + $0x78] sm:$0xff] }
  0x55   : > { %8182 = vst [vmem:[#allocation22_spill] sm:$0xff] %v5911_v35  ;;  %384 = vst.msk [vmem:[#allocation2 + $0xd9] sm:$0xff] %vm257_vm0, %v5905_v32  ;;  %4880 = vrot.lane.b32.xlu1 %v4879_v51, %s5516_s22  ;;  %v5997_v9 = vld [vmem:[#allocation2 + $0x69] sm:$0xff]  ;;  %v5999_v17 = vld [vmem:[#allocation2 + $0x80] sm:$0xff]  ;;  %v4904_v30 = vpack.i.bf16 %v5993_v7, %v5995_v8 }
  0x56   : > { %385 = vst.msk [vmem:[#allocation2 + $0xe1] sm:$0xff] %vm257_vm0, %v5908_v34  ;;  %386 = vst.msk [vmem:[#allocation2 + $0xf1] sm:$0xff] %vm257_vm0, %v5911_v35  ;;  %v4909_v36 = vpack.i.bf16 %v5997_v9, %v5999_v17  ;;  %v6024_v41 = vld [vmem:[#allocation2 + $0x79] sm:$0xff]  ;;  %v6026_v42 = vld [vmem:[#allocation2 + $0x90] sm:$0xff] }
  0x57   : > { %8183 = vst [vmem:[#allocation23_spill] sm:$0xff] %v5921_v37  ;;  %8184 = vst [vmem:[#allocation24_spill] sm:$0xff] %v5924_v38  ;;  %4885 = vrot.lane.b32.xlu0 %v4884_v57, %s5516_s22  ;;  %v6029_v44 = vld [vmem:[%s5802_s7 + $0xb8] sm:$0xff]  ;;  %v6031_v46 = vld [vmem:[#allocation2 + $0x81] sm:$0xff]  ;;  %v4914_v51 = vpack.i.bf16 %v6024_v41, %v6026_v42 }
  0x58   : > { %387 = vst.msk [vmem:[#allocation2 + $0xf9] sm:$0xff] %vm257_vm0, %v5921_v37  ;;  %388 = vst.msk [vmem:[#allocation2 + $0x109] sm:$0xff] %vm257_vm0, %v5924_v38  ;;  %v6033_v47 = vld [vmem:[#allocation2 + $0x98] sm:$0xff]  ;;  %v6038_v48 = vld [vmem:[%s5802_s7 + $0xc0] sm:$0xff] }
  0x59   : > { %4890 = vrot.lane.b32.xlu1 %v4889_v60, %s5516_s22  ;;  %8185 = vst [vmem:[#allocation25_spill] sm:$0xff] %v6002_v18  ;;  %389 = vst.msk [vmem:[#allocation2 + $0x111] sm:$0xff] %vm257_vm0, %v6002_v18  ;;  %v1348_v57 = vld [vmem:[%s8087_s1 + $0x98] sm:$0xff]  ;;  %v4919_v59 = vpack.i.bf16 %v6031_v46, %v6033_v47  ;;  %v6065_v2 = vld [vmem:[#allocation2 + $0xa8] sm:$0xff] }
  0x5a   : > { %8186 = vst [vmem:[#allocation26_spill] sm:$0xff] %v6007_v23  ;;  %390 = vst.msk [vmem:[#allocation2 + $0x121] sm:$0xff] %vm257_vm0, %v6007_v23  ;;  %v6063_v60 = vld [vmem:[#allocation2 + $0x91] sm:$0xff]  ;;  %v6072_v4 = vld [vmem:[#allocation2 + $0x99] sm:$0xff]  ;;  %v4457_v19 = vpack.c.bf16 %v1348_v57, %v1347_v56 }
  0x5b   : > { %4895 = vrot.lane.b32.xlu0 %v4894_v3, %s5516_s22  ;;  %8187 = vst [vmem:[#allocation27_spill] sm:$0xff] %v6029_v44  ;;  %391 = vst.msk [vmem:[#allocation2 + $0x129] sm:$0xff] %vm257_vm0, %v6029_v44  ;;  %v6070_v3 = vld [vmem:[%s5802_s7 + $0xd8] sm:$0xff]  ;;  %v6074_v5 = vld [vmem:[#allocation2 + $0xb0] sm:$0xff] }
  0x5c   : > { %8188 = vst [vmem:[#allocation28_spill] sm:$0xff] %v6038_v48  ;;  %392 = vst.msk [vmem:[#allocation2 + $0x139] sm:$0xff] %vm257_vm0, %v6038_v48  ;;  %v4929_v49 = vpack.i.bf16 %v6072_v4, %v6074_v5  ;;  %v6101_v56 = vld [vmem:[#allocation2 + $0xc0] sm:$0xff]  ;;  %v6105_v57 = vld [vmem:[#allocation2 + $0xb1] sm:$0xff]  ;;  %4458 = vmatpush1.bf16.msra.mxu0 %v4457_v19 }
  0x5d   : > { %4900 = vrot.lane.b32.xlu1 %v4899_v6, %s5516_s22  ;;  %8189 = vst [vmem:[#allocation29_spill] sm:$0xff] %v6043_v50  ;;  %393 = vst.msk [vmem:[#allocation2 + $0x141] sm:$0xff] %vm257_vm0, %v6043_v50  ;;  %v6079_v6 = vld [vmem:[%s5802_s7 + $0xe0] sm:$0xff]  ;;  %v6107_v1 = vld [vmem:[#allocation2 + $0xc8] sm:$0xff] }
  0x5e   : > { %8190 = vst [vmem:[#allocation30_spill] sm:$0xff] %v6058_v58  ;;  %8191 = vst [vmem:[#allocation31_spill] sm:$0xff] %v6065_v2  ;;  %v6120_v48 = vld [vmem:[%s5802_s7 + $0xf0] sm:$0xff]  ;;  %v4939_v19 = vpack.i.bf16 %v6105_v57, %v6107_v1  ;;  %v6133_v50 = vld [vmem:[#allocation2 + $0xe0] sm:$0xff] }
  0x5f   : > { %4905 = vrot.lane.b32.xlu0 %v4904_v30, %s5516_s22  ;;  %394 = vst.msk [vmem:[#allocation2 + $0x151] sm:$0xff] %vm257_vm0, %v6058_v58  ;;  %8192 = vst [vmem:[#allocation32_spill] sm:$0xff] %v6070_v3  ;;  %v4924_v30 = vpack.i.bf16 %v6063_v60, %v6065_v2  ;;  %v8198_v58 = vmov 0.0|0.0   ;;  %v6136_v44 = vld [vmem:[%s5802_s7 + $0xf8] sm:$0xff]  ;;  %v1353_v38 = vld [vmem:[%s8087_s1 + $0xc0] sm:$0xff] }
  0x60   : > { %8193 = vst [vmem:[#allocation33_spill] sm:$0xff] %v6074_v5  ;;  %395 = vst.msk [vmem:[#allocation2 + $0x159] sm:$0xff] %vm257_vm0, %v6070_v3  ;;  %4459 = vmatprep.subr.bf16.mxu0 %v8198_v58  ;;  %v1351_v3 = vld [vmem:[%s8087_s1 + $0xb0] sm:$0xff]  ;;  %v6159_v18 = vld [vmem:[#allocation2 + $0xe1] sm:$0xff] }
  0x61   : > { %4910 = vrot.lane.b32.xlu1 %v4909_v36, %s5516_s22  ;;  %8194 = vst [vmem:[#allocation34_spill] sm:$0xff] %v6079_v6  ;;  %396 = vst.msk [vmem:[#allocation2 + $0x169] sm:$0xff] %vm257_vm0, %v6079_v6  ;;  %v6094_v36 = vld [vmem:[%s5802_s7 + $0xe8] sm:$0xff]  ;;  %v4460_v6 = vpack.c.bf16 %v1350_v33, %v1349_v31  ;;  %v6127_v31 = vld [vmem:[#allocation2 + $0xd8] sm:$0xff] }
  0x62   : > { %8195 = vst [vmem:[#allocation35_spill] sm:$0xff] %v6094_v36  ;;  %8196 = vst [vmem:[#allocation36_spill] sm:$0xff] %v6101_v56  ;;  %v6131_v33 = vld [vmem:[#allocation2 + $0xc9] sm:$0xff]  ;;  %v6161_v37 = vld [vmem:[#allocation2 + $0xf8] sm:$0xff] }
  0x63   : > { %4915 = vrot.lane.b32.xlu0 %v4914_v51, %s5516_s22  ;;  %v6099_v51 = vld [vmem:[#allocation2 + $0xa9] sm:$0xff]  ;;  %397 = vst.msk [vmem:[#allocation2 + $0x171] sm:$0xff] %vm257_vm0, %v6094_v36  ;;  %8197 = vst [vmem:[#allocation37_spill] sm:$0xff] %v6107_v1  ;;  %v1352_v36 = vld [vmem:[%s8087_s1 + $0xb8] sm:$0xff]  ;;  %4461 = vmatpush1.bf16.msra.mxu0 %v4460_v6 }
  0x64   : > { %8199 = vst [vmem:[#allocation38_spill] sm:$0xff] %v6120_v48  ;;  %8200 = vst [vmem:[#allocation39_spill] sm:$0xff] %v6127_v31  ;;  %v4463_v23 = vpack.c.bf16 %v1352_v36, %v1351_v3  ;;  %4462 = vmatprep.subr.bf16.mxu0 %v8198_v58  ;;  %v4949_v3 = vpack.i.bf16 %v6131_v33, %v6133_v50  ;;  %v6153_v6 = vld [vmem:[#allocation2 + $0xd9] sm:$0xff]  ;;  %v6155_v36 = vld [vmem:[#allocation2 + $0xf0] sm:$0xff] }
  0x65   : > { %4920 = vrot.lane.b32.xlu1 %v4919_v59, %s5516_s22  ;;  %v4934_v59 = vpack.i.bf16 %v6099_v51, %v6101_v56  ;;  %398 = vst.msk [vmem:[#allocation2 + $0x181] sm:$0xff] %vm257_vm0, %v6120_v48  ;;  %8201 = vst [vmem:[#allocation40_spill] sm:$0xff] %v6133_v50  ;;  %v1354_v48 = vld [vmem:[%s8087_s1 + $0xc8] sm:$0xff]  ;;  %v1355_v35 = vld [vmem:[%s8087_s1 + $0xd0] sm:$0xff] }
  0x66   : > { %8202 = vst [vmem:[#allocation41_spill] sm:$0xff] %v6136_v44  ;;  %399 = vst.msk [vmem:[#allocation2 + $0x189] sm:$0xff] %vm257_vm0, %v6136_v44  ;;  %v4466_v44 = vpack.c.bf16 %v1354_v48, %v1353_v38  ;;  %v1356_v34 = vld [vmem:[%s8087_s1 + $0xd8] sm:$0xff]  ;;  %v4959_v38 = vpack.i.bf16 %v6159_v18, %v6161_v37  ;;  %v6180_v48 = vld [vmem:[#allocation2 + $0x108] sm:$0xff] }
  0x67   : > { %4925 = vrot.lane.b32.xlu0 %v4924_v30, %s5516_s22  ;;  %v6125_v30 = vld [vmem:[#allocation2 + $0xc1] sm:$0xff]  ;;  %8203 = vst [vmem:[#allocation42_spill] sm:$0xff] %v6155_v36  ;;  %8204 = vst [vmem:[#allocation43_spill] sm:$0xff] %v6161_v37  ;;  %4464 = vmatpush1.bf16.msra.mxu0 %v4463_v23  ;;  %v6178_v23 = vld [vmem:[#allocation2 + $0xf1] sm:$0xff]  ;;  %v4469_v29 = vpack.c.bf16 %v1356_v34, %v1355_v35 }
  0x68   : > { %4465 = vmatprep.subr.bf16.mxu0 %v8198_v58  ;;  %8205 = vst [vmem:[#allocation44_spill] sm:$0xff] %v6180_v48  ;;  %v6184_v32 = vld [vmem:[#allocation2 + $0x110] sm:$0xff]  ;;  %v4964_v28 = vpack.i.bf16 %v6178_v23, %v6180_v48  ;;  %v1358_v27 = vld [vmem:[%s8087_s1 + $0xe8] sm:$0xff]  ;;  %v1360_v22 = vld [vmem:[%s8087_s1 + $0xf8] sm:$0xff] }
  0x69   : > { %4930 = vrot.lane.b32.xlu1 %v4929_v49, %s5516_s22  ;;  %v4944_v49 = vpack.i.bf16 %v6125_v30, %v6127_v31  ;;  %8206 = vst [vmem:[#allocation45_spill] sm:$0xff] %v6184_v32  ;;  %v6199_v35 = vld [vmem:[#allocation2 + $0x109] sm:$0xff]  ;;  %v6226_v21 = vld [vmem:[#allocation2 + $0x140] sm:$0xff] }
  0x6a   : > { %v6205_v26 = vld [vmem:[#allocation2 + $0x128] sm:$0xff]  ;;  %8210 = vst [vmem:[#allocation49_spill] sm:$0xff] %v6226_v21  ;;  %v6235_v15 = vld [vmem:[#allocation2 + $0x139] sm:$0xff]  ;;  %v6237_v14 = vld [vmem:[#allocation2 + $0x150] sm:$0xff] }
  0x6b   : > { %4935 = vrot.lane.b32.xlu0 %v4934_v59, %s5516_s22  ;;  %v6157_v59 = vld [vmem:[#allocation2 + $0x32] sm:$0xff]  ;;  %4467 = vmatpush1.bf16.msra.mxu0 %v4466_v44  ;;  %v6201_v44 = vld [vmem:[#allocation2 + $0x120] sm:$0xff]  ;;  %8208 = vst [vmem:[#allocation47_spill] sm:$0xff] %v6205_v26  ;;  %8211 = vst [vmem:[#allocation50_spill] sm:$0xff] %v6237_v14 }
  0x6c   : > { %4317 = vmatprep.mubr.msk.f32.mxu1 %vm257_vm0, %v6157_v59  ;;  %4468 = vmatprep.subr.bf16.mxu0 %v8198_v58  ;;  %8207 = vst [vmem:[#allocation46_spill] sm:$0xff] %v6201_v44  ;;  %v4974_v24 = vpack.i.bf16 %v6199_v35, %v6201_v44  ;;  %v6239_v13 = vld [vmem:[#allocation2 + $0x141] sm:$0xff]  ;;  %v6254_v12 = vld [vmem:[#allocation2 + $0x159] sm:$0xff]  ;;  %v6256_v11 = vld [vmem:[#allocation2 + $0x170] sm:$0xff] }
  0x6d   : > { %4940 = vrot.lane.b32.xlu1 %v4939_v19, %s5516_s22  ;;  %v4954_v19 = vpack.i.bf16 %v6153_v6, %v6155_v36  ;;  %8214 = vst [vmem:[#allocation53_spill] sm:$0xff] %v6256_v11  ;;  %v526_v10 = vld [vmem:[#allocation2 + $0x180] sm:$0xff]  ;;  %v6442_v48 = vld [vmem:[#allocation2 + $0x172] sm:$0xff]  ;;  %v654_v37 = vld [vmem:[#allocation2 + $0x189] sm:$0xff] }
  0x6e   : > { %v1363_v5 = vld [vmem:[%s8087_s1 + $0x110] sm:$0xff] }
  0x6f   : > { %4945 = vrot.lane.b32.xlu0 %v4944_v49, %s5516_s22  ;;  %v6182_v49 = vld [vmem:[#allocation2 + $0xf9] sm:$0xff]  ;;  %4470 = vmatpush1.bf16.msra.mxu0 %v4469_v29  ;;  %v6220_v29 = vld [vmem:[#allocation2 + $0x121] sm:$0xff] }
  0x70   : > { %v4969_v34 = vpack.i.bf16 %v6182_v49, %v6184_v32  ;;  %4471 = vmatprep.subr.bf16.mxu0 %v8198_v58  ;;  %v400_v32 = vld [vmem:[#allocation2] sm:$0xff] }
  0x71   : > { %4950 = vrot.lane.b32.xlu1 %v4949_v3, %s5516_s22  ;;  %v1357_v3 = vld [vmem:[%s8087_s1 + $0xe0] sm:$0xff] }
  0x72   : > { %v4472_v25 = vpack.c.bf16 %v1358_v27, %v1357_v3  ;;  %v6224_v3 = vld [vmem:[#allocation2 + $0x129] sm:$0xff] }
  0x73   : > { %4955 = vrot.lane.b32.xlu0 %v4954_v19, %s5516_s22  ;;  %v6203_v19 = vld [vmem:[#allocation2 + $0x111] sm:$0xff] }
  0x74   : > { %v4979_v27 = vpack.i.bf16 %v6203_v19, %v6205_v26  ;;  %4473 = vmatpush1.bf16.msra.mxu0 %v4472_v25  ;;  %v6241_v25 = vld [vmem:[#allocation2 + $0x158] sm:$0xff] }
  0x75   : > { %4960 = vrot.lane.b32.xlu1 %v4959_v38, %s5516_s22  ;;  %v1359_v38 = vld [vmem:[%s8087_s1 + $0xf0] sm:$0xff]  ;;  %4474 = vmatprep.subr.bf16.mxu0 %v8198_v58  ;;  %8212 = vst [vmem:[#allocation51_spill] sm:$0xff] %v6241_v25 }
  0x76   : > { %v4475_v20 = vpack.c.bf16 %v1360_v22, %v1359_v38  ;;  %v4994_v22 = vpack.i.bf16 %v6235_v15, %v6237_v14  ;;  %v6250_v38 = vld [vmem:[#allocation2 + $0x151] sm:$0xff]  ;;  %v527_v14 = vld [vmem:[#allocation2 + $0x188] sm:$0xff] }
  0x77   : > { %4965 = vrot.lane.b32.xlu0 %v4964_v28, %s5516_s22  ;;  %v6222_v28 = vld [vmem:[#allocation2 + $0x138] sm:$0xff] }
  0x78   : > { %8209 = vst [vmem:[#allocation48_spill] sm:$0xff] %v6222_v28  ;;  %v4984_v16 = vpack.i.bf16 %v6220_v29, %v6222_v28  ;;  %4476 = vmatpush1.bf16.msra.mxu0 %v4475_v20  ;;  %v5009_v20 = vpack.i.bf16 %v6254_v12, %v6256_v11  ;;  %v6282_v28 = vld [vmem:[#allocation2 + $0x3a] sm:$0xff] }
  0x79   : > { %4970 = vrot.lane.b32.xlu1 %v4969_v34, %s5516_s22  ;;  %v4989_v34 = vpack.i.bf16 %v6224_v3, %v6226_v21  ;;  %4477 = vmatprep.subr.bf16.mxu0 %v8198_v58 }
  0x7b   : > { %4975 = vrot.lane.b32.xlu0 %v4974_v24, %s5516_s22  ;;  %v4999_v24 = vpack.i.bf16 %v6239_v13, %v6241_v25  ;;  %v6266_v25 = vld [vmem:[#allocation2 + $0x171] sm:$0xff] }
  0x7d   : > { %4980 = vrot.lane.b32.xlu1 %v4979_v27, %s5516_s22  ;;  %v6252_v27 = vld [vmem:[#allocation2 + $0x168] sm:$0xff] }
  0x7e   : > { %8213 = vst [vmem:[#allocation52_spill] sm:$0xff] %v6252_v27 }
  0x7f   : > { %4985 = vrot.lane.b32.xlu0 %v4984_v16, %s5516_s22  ;;  %v5004_v16 = vpack.i.bf16 %v6250_v38, %v6252_v27  ;;  %v6272_v27 = vld [vmem:[#allocation2 + $0x1a] sm:$0xff] }
  0x80   : > { %v5024_v11 = vpack.i.bf16 %v6272_v27, %v5951_v52  ;;  %v6292_v52 = vld [vmem:[#allocation2 + $0x52] sm:$0xff] }
  0x81   : > { %4990 = vrot.lane.b32.xlu1 %v4989_v34, %s5516_s22  ;;  %v6264_v34 = vld [vmem:[#allocation2 + $0x169] sm:$0xff] }
  0x82   : > { %v5014_v21 = vpack.i.bf16 %v6264_v34, %v526_v10  ;;  %v5034_v10 = vpack.i.bf16 %v6157_v59, %v5972_v61  ;;  %v6300_v61 = vld [vmem:[#allocation2 + $0x62] sm:$0xff] }
  0x83   : > { %4995 = vrot.lane.b32.xlu0 %v4994_v22, %s5516_s22  ;;  %v5019_v22 = vpack.i.bf16 %v6266_v25, %v527_v14  ;;  %v5039_v14 = vpack.i.bf16 %v6282_v28, %v5976_v63  ;;  %v5054_v63 = vpack.i.bf16 %v6300_v61, %v6024_v41  ;;  %v6320_v41 = vld [vmem:[#allocation2 + $0x92] sm:$0xff] }
  0x85   : > { %5000 = vrot.lane.b32.xlu1 %v4999_v24, %s5516_s22  ;;  %v6274_v24 = vld [vmem:[#allocation2 + $0x22] sm:$0xff] }
  0x87   : > { %5005 = vrot.lane.b32.xlu0 %v5004_v16, %s5516_s22  ;;  %v5029_v16 = vpack.i.bf16 %v6274_v24, %v5955_v54 }
  0x89   : > { %5010 = vrot.lane.b32.xlu1 %v5009_v20, %s5516_s22  ;;  %v6302_v20 = vld [vmem:[#allocation2 + $0x6a] sm:$0xff] }
  0x8b   : > { %5015 = vrot.lane.b32.xlu0 %v5014_v21, %s5516_s22  ;;  %v6290_v21 = vld [vmem:[#allocation2 + $0x4a] sm:$0xff] }
  0x8c   : > { %v5044_v54 = vpack.i.bf16 %v6290_v21, %v5993_v7  ;;  %v6310_v7 = vld [vmem:[#allocation2 + $0x7a] sm:$0xff] }
  0x8d   : > { %5020 = vrot.lane.b32.xlu1 %v5019_v22, %s5516_s22  ;;  %v5059_v22 = vpack.i.bf16 %v6302_v20, %v6031_v46  ;;  %v5074_v46 = vpack.i.bf16 %v6320_v41, %v6099_v51  ;;  %v6340_v51 = vld [vmem:[#allocation2 + $0xc2] sm:$0xff] }
  0x8f   : > { %5025 = vrot.lane.b32.xlu0 %v5024_v11, %s5516_s22  ;;  %v5049_v11 = vpack.i.bf16 %v6292_v52, %v5997_v9  ;;  %v5064_v9 = vpack.i.bf16 %v6310_v7, %v6063_v60  ;;  %v6330_v60 = vld [vmem:[#allocation2 + $0xaa] sm:$0xff] }
  0x91   : > { %5030 = vrot.lane.b32.xlu1 %v5029_v16, %s5516_s22  ;;  %v6312_v16 = vld [vmem:[#allocation2 + $0x82] sm:$0xff] }
  0x93   : > { %5035 = vrot.lane.b32.xlu0 %v5034_v10, %s5516_s22  ;;  %v5069_v10 = vpack.i.bf16 %v6312_v16, %v6072_v4  ;;  %v5084_v4 = vpack.i.bf16 %v6330_v60, %v6125_v30  ;;  %v6350_v30 = vld [vmem:[#allocation2 + $0xda] sm:$0xff] }
  0x95   : > { %5040 = vrot.lane.b32.xlu1 %v5039_v14, %s5516_s22  ;;  %v6322_v14 = vld [vmem:[#allocation2 + $0x9a] sm:$0xff] }
  0x97   : > { %5045 = vrot.lane.b32.xlu0 %v5044_v54, %s5516_s22  ;;  %v5079_v54 = vpack.i.bf16 %v6322_v14, %v6105_v57  ;;  %v5094_v57 = vpack.i.bf16 %v6340_v51, %v6153_v6  ;;  %v6360_v6 = vld [vmem:[#allocation2 + $0xf2] sm:$0xff] }
  0x99   : > { %5050 = vrot.lane.b32.xlu1 %v5049_v11, %s5516_s22  ;;  %v6332_v11 = vld [vmem:[#allocation2 + $0xb2] sm:$0xff] }
  0x9b   : > { %5055 = vrot.lane.b32.xlu0 %v5054_v63, %s5516_s22  ;;  %v5089_v63 = vpack.i.bf16 %v6332_v11, %v6131_v33  ;;  %v5104_v33 = vpack.i.bf16 %v6350_v30, %v6178_v23  ;;  %v6370_v23 = vld [vmem:[#allocation2 + $0x10a] sm:$0xff] }
  0x9d   : > { %5060 = vrot.lane.b32.xlu1 %v5059_v22, %s5516_s22  ;;  %v6342_v22 = vld [vmem:[#allocation2 + $0xca] sm:$0xff] }
  0x9f   : > { %5065 = vrot.lane.b32.xlu0 %v5064_v9, %s5516_s22  ;;  %v5099_v9 = vpack.i.bf16 %v6342_v22, %v6159_v18  ;;  %v5114_v18 = vpack.i.bf16 %v6360_v6, %v6199_v35  ;;  %v1394_v35 = vld [vmem:[%s8087_s1 + $0x208] sm:$0xff] }
  0xa1   : > { %5070 = vrot.lane.b32.xlu1 %v5069_v10, %s5516_s22  ;;  %v6352_v10 = vld [vmem:[#allocation2 + $0xe2] sm:$0xff] }
  0xa3   : > { %5075 = vrot.lane.b32.xlu0 %v5074_v46, %s5516_s22  ;;  %v5109_v46 = vpack.i.bf16 %v6352_v10, %v6182_v49  ;;  %v5124_v49 = vpack.i.bf16 %v6370_v23, %v6220_v29 }
  0xa5   : > { %5080 = vrot.lane.b32.xlu1 %v5079_v54, %s5516_s22  ;;  %v6362_v54 = vld [vmem:[#allocation2 + $0xfa] sm:$0xff] }
  0xa7   : > { %5085 = vrot.lane.b32.xlu0 %v5084_v4, %s5516_s22  ;;  %v5119_v4 = vpack.i.bf16 %v6362_v54, %v6203_v19 }
  0xa9   : > { %5090 = vrot.lane.b32.xlu1 %v5089_v63, %s5516_s22  ;;  %v6372_v63 = vld [vmem:[#allocation2 + $0x112] sm:$0xff] }
  0xaa   : > { %v5129_v19 = vpack.i.bf16 %v6372_v63, %v6224_v3  ;;  %v1396_v3 = vld [vmem:[%s8087_s1 + $0x218] sm:$0xff] }
  0xab   : > { %5095 = vrot.lane.b32.xlu0 %v5094_v57, %s5516_s22  ;;  %v1393_v57 = vld [vmem:[%s8087_s1 + $0x200] sm:$0xff] }
  0xad   : > { %5100 = vrot.lane.b32.xlu1 %v5099_v9, %s5516_s22  ;;  %v6386_v9 = vld [vmem:[#allocation2 + $0x122] sm:$0xff] }
  0xae   : > { %v5134_v29 = vpack.i.bf16 %v6386_v9, %v6235_v15 }
  0xaf   : > { %5105 = vrot.lane.b32.xlu0 %v5104_v33, %s5516_s22  ;;  %v4525_v33 = vpack.c.bf16 %v1394_v35, %v1393_v57  ;;  %v6402_v57 = vld [vmem:[#allocation2 + $0x13a] sm:$0xff]  ;;  %v6404_v35 = vld [vmem:[#allocation2 + $0x142] sm:$0xff] }
  0xb0   : > { %v5144_v15 = vpack.i.bf16 %v6402_v57, %v6250_v38  ;;  %v464_v38 = vld [vmem:[#allocation2 + $0x2] sm:$0xff] }
  0xb1   : > { %5110 = vrot.lane.b32.xlu1 %v5109_v46, %s5516_s22  ;;  %v6388_v46 = vld [vmem:[#allocation2 + $0x12a] sm:$0xff]  ;;  %4526 = vmatprep.subr.bf16.mxu1 %v4525_v33 }
  0xb2   : > { %4528 = vmatpush3.bf16.msra.mxu1 %v4525_v33  ;;  %v1397_v33 = vld [vmem:[%s8087_s1 + $0x220] sm:$0xff] }
  0xb3   : > { %5115 = vrot.lane.b32.xlu0 %v5114_v18, %s5516_s22  ;;  %v1395_v18 = vld [vmem:[%s8087_s1 + $0x210] sm:$0xff] }
  0xb5   : > { %5120 = vrot.lane.b32.xlu1 %v5119_v4, %s5516_s22  ;;  %v5139_v4 = vpack.i.bf16 %v6388_v46, %v6239_v13  ;;  %v1398_v13 = vld [vmem:[%s8087_s1 + $0x228] sm:$0xff] }
  0xb7   : > { %5125 = vrot.lane.b32.xlu0 %v5124_v49, %s5516_s22  ;;  %v4529_v49 = vpack.c.bf16 %v1396_v3, %v1395_v18  ;;  %v6418_v18 = vld [vmem:[#allocation2 + $0x152] sm:$0xff]  ;;  %v6420_v3 = vld [vmem:[#allocation2 + $0x15a] sm:$0xff] }
  0xb8   : > { %v5154_v26 = vpack.i.bf16 %v6418_v18, %v6264_v34  ;;  %v653_v34 = vld [vmem:[#allocation2 + $0x181] sm:$0xff] }
  0xb9   : > { %5130 = vrot.lane.b32.xlu1 %v5129_v19, %s5516_s22  ;;  %4530 = vmatprep.subr.bf16.mxu1 %v4529_v49  ;;  %v5149_v19 = vpack.i.bf16 %v6404_v35, %v6254_v12  ;;  %v1399_v12 = vld [vmem:[%s8087_s1 + $0x230] sm:$0xff] }
  0xba   : > { %4532 = vmatpush3.bf16.msra.mxu1 %v4529_v49  ;;  %v1361_v49 = vld [vmem:[%s8087_s1 + $0x100] sm:$0xff] }
  0xbb   : > { %5135 = vrot.lane.b32.xlu0 %v5134_v29, %s5516_s22  ;;  %v4533_v29 = vpack.c.bf16 %v1398_v13, %v1397_v33  ;;  %v1362_v33 = vld [vmem:[%s8087_s1 + $0x108] sm:$0xff] }
  0xbc   : > { %v6440_v13 = vld [vmem:[#allocation2 + $0x16a] sm:$0xff]  ;;  %v4478_v1 = vpack.c.bf16 %v1362_v33, %v1361_v49 }
  0xbd   : > { %5140 = vrot.lane.b32.xlu1 %v5139_v4, %s5516_s22  ;;  %4534 = vmatprep.subr.bf16.mxu1 %v4533_v29  ;;  %v1400_v4 = vld [vmem:[%s8087_s1 + $0x238] sm:$0xff] }
  0xbe   : > { %4536 = vmatpush3.bf16.msra.mxu1 %v4533_v29  ;;  %v4537_v29 = vpack.c.bf16 %v1400_v4, %v1399_v12  ;;  %v465_v4 = vld [vmem:[#allocation2 + $0xa] sm:$0xff] }
  0xbf   : > { %5145 = vrot.lane.b32.xlu0 %v5144_v15, %s5516_s22  ;;  %v5159_v15 = vpack.i.bf16 %v6420_v3, %v6266_v25 }
  0xc0   : > { %4538 = vmatprep.subr.bf16.mxu1 %v4537_v29 }
  0xc1   : > { %5150 = vrot.lane.b32.xlu1 %v5149_v19, %s5516_s22  ;;  %v4866_v44 = vpop.permute.xlu0 %4865  ;;  %v5164_v19 = vpack.i.bf16 %v6440_v13, %v653_v34 }
  0xc2   : > { %v4868_v36 = vunpack.i.h.bf16 %v4866_v44  ;;  %v4867_v50 = vunpack.i.l.bf16 %v4866_v44  ;;  %4540 = vmatpush3.bf16.msra.mxu1 %v4537_v29  ;;  %v1364_v44 = vld [vmem:[%s8087_s1 + $0x118] sm:$0xff] }
  0xc3   : > { %v4876_v31 = vpop.permute.xlu1 %4875  ;;  %5155 = vrot.lane.b32.xlu0 %v5154_v26, %s5516_s22  ;;  %v5169_v26 = vpack.i.bf16 %v6442_v48, %v654_v37  ;;  %4541 = vmatprep.subr.bf16.mxu1 %v8198_v58 }
  0xc4   : > { %v4877_v56 = vunpack.i.l.bf16 %v4876_v31  ;;  %v1233_v25 = vsel %vm257_vm0, %v464_v38, %v4867_v50  ;;  %v1201_v12 = vsel %vm257_vm0, %v400_v32, %v4868_v36  ;;  %v401_v50 = vld [vmem:[#allocation2 + $0x8] sm:$0xff]  ;;  %v655_v32 = vld [vmem:[#allocation2 + $0x199] sm:$0xff]  ;;  %v4878_v29 = vunpack.i.h.bf16 %v4876_v31 }
  0xc5   : > { %5160 = vrot.lane.b32.xlu1 %v5159_v15, %s5516_s22  ;;  %v4871_v49 = vpop.permute.xlu0 %4870  ;;  %1568 = vmatprep.mubr.f32.mxu0 %v1233_v25  ;;  %v6457_v38 = vld [vmem:[#allocation2 + $0x182] sm:$0xff]  ;;  %v4481_v15 = vpack.c.bf16 %v1364_v44, %v1363_v5 }
  0xc6   : > { %v4873_v36 = vunpack.i.h.bf16 %v4871_v49  ;;  %v4872_v33 = vunpack.i.l.bf16 %v4871_v49  ;;  %1569 = vmatmul.mubr.f32.vlgmr.msra.gmra.mrb[0].mxu0 %v1201_v12  ;;  %4318 = vmatmul.mubr.msk.f32.vlgmr.msra.gmra.mrb[0].mxu1 %vm257_vm0, %v6282_v28  ;;  %v1235_v37 = vsel %vm257_vm0, %v6272_v27, %v4877_v56  ;;  %v1365_v25 = vld [vmem:[%s8087_s1 + $0x120] sm:$0xff]  ;;  %v5174_v5 = vpack.i.bf16 %v6457_v38, %v655_v32  ;;  %v6475_v56 = vld [vmem:[#allocation2 + $0x18a] sm:$0xff] }
  0xc7   : > { %v4881_v34 = vpop.permute.xlu1 %4880  ;;  %4479 = vmatpush1.bf16.msra.mxu0 %v4478_v1  ;;  %5165 = vrot.lane.b32.xlu0 %v5164_v19, %s5516_s22  ;;  %v1366_v1 = vld [vmem:[%s8087_s1 + $0x128] sm:$0xff]  ;;  %v1203_v44 = vsel %vm257_vm0, %v5926_v39, %v4878_v29  ;;  %v1367_v32 = vld [vmem:[%s8087_s1 + $0x130] sm:$0xff] }
  0xc8   : > { %v1234_v2 = vsel %vm257_vm0, %v465_v4, %v4872_v33  ;;  %v1202_v12 = vsel %vm257_vm0, %v401_v50, %v4873_v36  ;;  %4480 = vmatprep.subr.bf16.mxu0 %v8198_v58  ;;  %v4882_v49 = vunpack.i.l.bf16 %v4881_v34  ;;  %v656_v31 = vld [vmem:[#allocation2 + $0x1a1] sm:$0xff]  ;;  %4320 = vmatprep.mubr.msk.f32.mxu1 %vm257_vm0, %v6290_v21  ;;  %v4883_v4 = vunpack.i.h.bf16 %v4881_v34  ;;  %v1368_v36 = vld [vmem:[%s8087_s1 + $0x138] sm:$0xff] }
  0xc9   : > { %5170 = vrot.lane.b32.xlu1 %v5169_v26, %s5516_s22  ;;  %1573 = vmatprep.mubr.f32.mxu0 %v1234_v2  ;;  %v4886_v27 = vpop.permute.xlu0 %4885  ;;  %v5179_v19 = vpack.i.bf16 %v6475_v56, %v656_v31  ;;  %v4484_v26 = vpack.c.bf16 %v1366_v1, %v1365_v25  ;;  %v4487_v34 = vpack.c.bf16 %v1368_v36, %v1367_v32  ;;  %v1370_v25 = vld [vmem:[%s8087_s1 + $0x148] sm:$0xff]  ;;  %v1371_v31 = vld [vmem:[%s8087_s1 + $0x150] sm:$0xff] }
  0xca   : > { %1574 = vmatmul.mubr.f32.gmra.mrb[2].mxu0 %v1202_v12  ;;  %4321 = vmatmul.mubr.msk.f32.gmra.mrb[2].mxu1 %vm257_vm0, %v6292_v52  ;;  %v4887_v50 = vunpack.i.l.bf16 %v4886_v27  ;;  %v1236_v2 = vsel %vm257_vm0, %v6274_v24, %v4882_v49  ;;  %v4888_v39 = vunpack.i.h.bf16 %v4886_v27  ;;  %v1204_v24 = vsel %vm257_vm0, %v5928_v40, %v4883_v4  ;;  %v1372_v27 = vld [vmem:[%s8087_s1 + $0x158] sm:$0xff] }
  0xcb   : > { %1578 = vmatprep.mubr.f32.mxu0 %v1235_v37  ;;  %4482 = vmatpush1.bf16.msra.mxu0 %v4481_v15  ;;  %v4891_v33 = vpop.permute.xlu1 %4890  ;;  %v1369_v15 = vld [vmem:[%s8087_s1 + $0x140] sm:$0xff]  ;;  %v4493_v4 = vpack.c.bf16 %v1372_v27, %v1371_v31  ;;  %v1379_v31 = vld [vmem:[%s8087_s1 + $0x190] sm:$0xff]  ;;  %v1380_v27 = vld [vmem:[%s8087_s1 + $0x198] sm:$0xff] }
  0xcc   : > { %4483 = vmatprep.subr.bf16.mxu0 %v8198_v58  ;;  %5175 = vrot.lane.b32.xlu0 %v5174_v5, %s5516_s22  ;;  %v4892_v29 = vunpack.i.l.bf16 %v4891_v33  ;;  %v1237_v37 = vsel %vm257_vm0, %v6157_v59, %v4887_v50  ;;  %v4893_v12 = vunpack.i.h.bf16 %v4891_v33  ;;  %v1205_v59 = vsel %vm257_vm0, %v5935_v43, %v4888_v39  ;;  %v1373_v50 = vld [vmem:[%s8087_s1 + $0x160] sm:$0xff] }
  0xcd   : > { %5180 = vrot.lane.b32.xlu1 %v5179_v19, %s5516_s22  ;;  %4323 = vmatprep.mubr.msk.f32.mxu1 %vm257_vm0, %v6300_v61  ;;  %v4896_v40 = vpop.permute.xlu0 %4895  ;;  %v4490_v49 = vpack.c.bf16 %v1370_v25, %v1369_v15 }
  0xce   : > { %1579 = vmatmul.mubr.f32.gmra.mrb[4].mxu0 %v1203_v44  ;;  %4324 = vmatmul.mubr.msk.f32.gmra.mrb[4].mxu1 %vm257_vm0, %v6302_v20  ;;  %v4897_v1 = vunpack.i.l.bf16 %v4896_v40  ;;  %v1238_v5 = vsel %vm257_vm0, %v6282_v28, %v4892_v29  ;;  %v4898_v19 = vunpack.i.h.bf16 %v4896_v40  ;;  %v1206_v28 = vsel %vm257_vm0, %v5937_v45, %v4893_v12  ;;  %v1377_v40 = vld [vmem:[%s8087_s1 + $0x180] sm:$0xff]  ;;  %v1378_v12 = vld [vmem:[%s8087_s1 + $0x188] sm:$0xff] }
  0xcf   : > { %1583 = vmatprep.mubr.f32.mxu0 %v1236_v2  ;;  %4485 = vmatpush1.bf16.msra.mxu0 %v4484_v26  ;;  %v4901_v43 = vpop.permute.xlu1 %4900  ;;  %v1374_v2 = vld [vmem:[%s8087_s1 + $0x168] sm:$0xff] }
  0xd0   : > { %4486 = vmatprep.subr.bf16.mxu0 %v8198_v58  ;;  %4326 = vmatprep.mubr.msk.f32.mxu1 %vm257_vm0, %v6310_v7  ;;  %v4902_v44 = vunpack.i.l.bf16 %v4901_v43  ;;  %v1239_v26 = vsel %vm257_vm0, %v6290_v21, %v4897_v1  ;;  %v4903_v32 = vunpack.i.h.bf16 %v4901_v43  ;;  %v1207_v21 = vsel %vm257_vm0, %v5953_v53, %v4898_v19 }
  0xd1   : > { %v4906_v45 = vpop.permute.xlu0 %4905  ;;  %v4496_v36 = vpack.c.bf16 %v1374_v2, %v1373_v50  ;;  %v4505_v19 = vpack.c.bf16 %v1380_v27, %v1379_v31 }
  0xd2   : > { %1584 = vmatmul.mubr.f32.gmra.mrb[6].mxu0 %v1204_v24  ;;  %4327 = vmatmul.mubr.msk.f32.gmra.mrb[6].mxu1 %vm257_vm0, %v6312_v16  ;;  %v4907_v33 = vunpack.i.l.bf16 %v4906_v45  ;;  %v1240_v39 = vsel %vm257_vm0, %v6292_v52, %v4902_v44  ;;  %v1375_v24 = vld [vmem:[%s8087_s1 + $0x170] sm:$0xff]  ;;  %v4908_v29 = vunpack.i.h.bf16 %v4906_v45  ;;  %v1208_v52 = vsel %vm257_vm0, %v5957_v55, %v4903_v32  ;;  %v1381_v44 = vld [vmem:[%s8087_s1 + $0x1a0] sm:$0xff] }
  0xd3   : > { %1588 = vmatprep.mubr.f32.mxu0 %v1237_v37  ;;  %4488 = vmatpush1.bf16.msra.mxu0 %v4487_v34  ;;  %v1376_v34 = vld [vmem:[%s8087_s1 + $0x178] sm:$0xff]  ;;  %v4911_v53 = vpop.permute.xlu1 %4910 }
  0xd4   : > { %4489 = vmatprep.subr.bf16.mxu0 %v8198_v58  ;;  %4329 = vmatprep.mubr.msk.f32.mxu1 %vm257_vm0, %v6320_v41  ;;  %v4499_v37 = vpack.c.bf16 %v1376_v34, %v1375_v24  ;;  %v4912_v15 = vunpack.i.l.bf16 %v4911_v53  ;;  %v1241_v25 = vsel %vm257_vm0, %v6300_v61, %v4907_v33  ;;  %v1209_v61 = vsel %vm257_vm0, %v5974_v62, %v4908_v29  ;;  %v1386_v29 = vld [vmem:[%s8087_s1 + $0x1c8] sm:$0xff] }
  0xd5   : > { %v4916_v55 = vpop.permute.xlu0 %4915 }
  0xd6   : > { %1589 = vmatmul.mubr.f32.gmra.mrb[8].mxu0 %v1205_v59  ;;  %4330 = vmatmul.mubr.msk.f32.gmra.mrb[8].mxu1 %vm257_vm0, %v6322_v14  ;;  %v4913_v59 = vunpack.i.h.bf16 %v4911_v53  ;;  %v4917_v1 = vunpack.i.l.bf16 %v4916_v55  ;;  %v4918_v43 = vunpack.i.h.bf16 %v4916_v55  ;;  %v1385_v53 = vld [vmem:[%s8087_s1 + $0x1c0] sm:$0xff] }
  0xd7   : > { %1593 = vmatprep.mubr.f32.mxu0 %v1238_v5  ;;  %4491 = vmatpush1.bf16.msra.mxu0 %v4490_v49  ;;  %v4502_v49 = vpack.c.bf16 %v1378_v12, %v1377_v40  ;;  %v1242_v5 = vsel %vm257_vm0, %v6302_v20, %v4912_v15  ;;  %v4921_v62 = vpop.permute.xlu1 %4920  ;;  %v1387_v40 = vld [vmem:[%s8087_s1 + $0x1d0] sm:$0xff]  ;;  %v1388_v12 = vld [vmem:[%s8087_s1 + $0x1d8] sm:$0xff] }
  0xd8   : > { %4492 = vmatprep.subr.bf16.mxu0 %v8198_v58  ;;  %4332 = vmatprep.mubr.msk.f32.mxu1 %vm257_vm0, %v6330_v60  ;;  %v1210_v20 = vsel %vm257_vm0, %v5978_v0, %v4913_v59  ;;  %v4923_v50 = vunpack.i.h.bf16 %v4921_v62  ;;  %v4517_v59 = vpack.c.bf16 %v1388_v12, %v1387_v40 }
  0xd9   : > { %v4926_v0 = vpop.permute.xlu0 %4925 }
  0xda   : > { %1594 = vmatmul.mubr.f32.gmra.mrb[10].mxu0 %v1206_v28  ;;  %4333 = vmatmul.mubr.msk.f32.gmra.mrb[10].mxu1 %vm257_vm0, %v6332_v11  ;;  %v4922_v28 = vunpack.i.l.bf16 %v4921_v62  ;;  %v4927_v45 = vunpack.i.l.bf16 %v4926_v0  ;;  %v4928_v33 = vunpack.i.h.bf16 %v4926_v0 }
  0xdb   : > { %1598 = vmatprep.mubr.f32.mxu0 %v1239_v26  ;;  %4494 = vmatpush1.bf16.msra.mxu0 %v4493_v4  ;;  %v1243_v4 = vsel %vm257_vm0, %v6310_v7, %v4917_v1  ;;  %v1382_v26 = vld [vmem:[%s8087_s1 + $0x1a8] sm:$0xff]  ;;  %v1211_v7 = vsel %vm257_vm0, %v5995_v8, %v4918_v43  ;;  %v4931_v8 = vpop.permute.xlu1 %4930  ;;  %v1389_v1 = vld [vmem:[%s8087_s1 + $0x1e0] sm:$0xff] }
  0xdc   : > { %4495 = vmatprep.subr.bf16.mxu0 %v8198_v58  ;;  %4335 = vmatprep.mubr.msk.f32.mxu1 %vm257_vm0, %v6340_v51  ;;  %v4508_v2 = vpack.c.bf16 %v1382_v26, %v1381_v44  ;;  %v1244_v32 = vsel %vm257_vm0, %v6312_v16, %v4922_v28  ;;  %v1212_v16 = vsel %vm257_vm0, %v5999_v17, %v4923_v50  ;;  %v4932_v24 = vunpack.i.l.bf16 %v4931_v8  ;;  %v1392_v28 = vld [vmem:[%s8087_s1 + $0x1f8] sm:$0xff] }
  0xdd   : > { %v1245_v34 = vsel %vm257_vm0, %v6320_v41, %v4927_v45  ;;  %v4936_v17 = vpop.permute.xlu0 %4935  ;;  %v1213_v41 = vsel %vm257_vm0, %v6026_v42, %v4928_v33  ;;  %v8217_v45 = vld [vmem:[#allocation36_spill] sm:$0xff]  ;;  %v8218_v33 = vld [vmem:[#allocation37_spill] sm:$0xff] }
  0xde   : > { %1599 = vmatmul.mubr.f32.gmra.mrb[12].mxu0 %v1207_v21  ;;  %4336 = vmatmul.mubr.msk.f32.gmra.mrb[12].mxu1 %vm257_vm0, %v6342_v22  ;;  %v1383_v21 = vld [vmem:[%s8087_s1 + $0x1b0] sm:$0xff]  ;;  %v4937_v15 = vunpack.i.l.bf16 %v4936_v17  ;;  %v4938_v55 = vunpack.i.h.bf16 %v4936_v17 }
  0xdf   : > { %1603 = vmatprep.mubr.f32.mxu0 %v1240_v39  ;;  %4497 = vmatpush1.bf16.msra.mxu0 %v4496_v36  ;;  %v1384_v36 = vld [vmem:[%s8087_s1 + $0x1b8] sm:$0xff]  ;;  %v4941_v42 = vpop.permute.xlu1 %4940 }
  0xe0   : > { %4498 = vmatprep.subr.bf16.mxu0 %v8198_v58  ;;  %4338 = vmatprep.mubr.msk.f32.mxu1 %vm257_vm0, %v6350_v30  ;;  %v4511_v39 = vpack.c.bf16 %v1384_v36, %v1383_v21  ;;  %v4943_v31 = vunpack.i.h.bf16 %v4941_v42 }
  0xe2   : > { %1604 = vmatmul.mubr.f32.gmra.mrb[14].mxu0 %v1208_v52  ;;  %4339 = vmatmul.mubr.msk.f32.gmra.mrb[14].mxu1 %vm257_vm0, %v6352_v10  ;;  %v4933_v52 = vunpack.i.h.bf16 %v4931_v8 }
  0xe3   : > { %1608 = vmatprep.mubr.f32.mxu0 %v1241_v25  ;;  %4500 = vmatpush1.bf16.msra.mxu0 %v4499_v37  ;;  %v4514_v37 = vpack.c.bf16 %v1386_v29, %v1385_v53  ;;  %v1246_v25 = vsel %vm257_vm0, %v6322_v14, %v4932_v24  ;;  %v8219_v53 = vld [vmem:[#allocation39_spill] sm:$0xff] }
  0xe4   : > { %4501 = vmatprep.subr.bf16.mxu0 %v8198_v58  ;;  %4341 = vmatprep.mubr.msk.f32.mxu1 %vm257_vm0, %v6360_v6  ;;  %v1214_v14 = vsel %vm257_vm0, %v6033_v47, %v4933_v52  ;;  %v4946_v47 = vpop.permute.xlu0 %4945 }
  0xe5   : > { %v4947_v43 = vunpack.i.l.bf16 %v4946_v47  ;;  %v4948_v44 = vunpack.i.h.bf16 %v4946_v47 }
  0xe6   : > { %1609 = vmatmul.mubr.f32.gmra.mrb[16].mxu0 %v1209_v61  ;;  %4342 = vmatmul.mubr.msk.f32.gmra.mrb[16].mxu1 %vm257_vm0, %v6362_v54  ;;  %v4942_v61 = vunpack.i.l.bf16 %v4941_v42  ;;  %v8221_v42 = vld [vmem:[#allocation42_spill] sm:$0xff] }
  0xe7   : > { %1613 = vmatprep.mubr.f32.mxu0 %v1242_v5  ;;  %4503 = vmatpush1.bf16.msra.mxu0 %v4502_v49  ;;  %v1247_v49 = vsel %vm257_vm0, %v6330_v60, %v4937_v15  ;;  %v1390_v5 = vld [vmem:[%s8087_s1 + $0x1e8] sm:$0xff]  ;;  %v8215_v60 = vld [vmem:[#allocation31_spill] sm:$0xff] }
  0xe8   : > { %4504 = vmatprep.subr.bf16.mxu0 %v8198_v58  ;;  %4344 = vmatprep.mubr.msk.f32.mxu1 %vm257_vm0, %v6370_v23  ;;  %v1215_v27 = vsel %vm257_vm0, %v8215_v60, %v4938_v55  ;;  %v4520_v62 = vpack.c.bf16 %v1390_v5, %v1389_v1  ;;  %v8223_v60 = vld [vmem:[#allocation44_spill] sm:$0xff] }
  0xea   : > { %1614 = vmatmul.mubr.f32.gmra.mrb[18].mxu0 %v1210_v20  ;;  %4345 = vmatmul.mubr.msk.f32.gmra.mrb[18].mxu1 %vm257_vm0, %v6372_v63  ;;  %v1248_v20 = vsel %vm257_vm0, %v6332_v11, %v4942_v61  ;;  %v8216_v11 = vld [vmem:[#allocation33_spill] sm:$0xff] }
  0xeb   : > { %1618 = vmatprep.mubr.f32.mxu0 %v1243_v4  ;;  %4506 = vmatpush1.bf16.msra.mxu0 %v4505_v19  ;;  %v1391_v19 = vld [vmem:[%s8087_s1 + $0x1f0] sm:$0xff]  ;;  %v4951_v4 = vpop.permute.xlu1 %4950  ;;  %v1216_v26 = vsel %vm257_vm0, %v8216_v11, %v4943_v31 }
  0xec   : > { %4507 = vmatprep.subr.bf16.mxu0 %v8198_v58  ;;  %4347 = vmatprep.mubr.msk.f32.mxu1 %vm257_vm0, %v6386_v9  ;;  %v4523_v0 = vpack.c.bf16 %v1392_v28, %v1391_v19  ;;  %v4952_v50 = vunpack.i.l.bf16 %v4951_v4  ;;  %v8224_v19 = vld [vmem:[#allocation45_spill] sm:$0xff] }
  0xee   : > { %1619 = vmatmul.mubr.f32.gmra.mrb[20].mxu0 %v1211_v7  ;;  %4348 = vmatmul.mubr.msk.f32.gmra.mrb[20].mxu1 %vm257_vm0, %v6388_v46  ;;  %v1249_v7 = vsel %vm257_vm0, %v6340_v51, %v4947_v43  ;;  %v1250_v21 = vsel %vm257_vm0, %v6342_v22, %v4952_v50 }
  0xef   : > { %1623 = vmatprep.mubr.f32.mxu0 %v1244_v32  ;;  %4509 = vmatpush1.bf16.msra.mxu0 %v4508_v2  ;;  %v4956_v2 = vpop.permute.xlu0 %4955  ;;  %v4961_v36 = vpop.permute.xlu1 %4960 }
  0xf0   : > { %4510 = vmatprep.subr.bf16.mxu0 %v8198_v58  ;;  %4350 = vmatprep.mubr.msk.f32.mxu1 %vm257_vm0, %v6402_v57  ;;  %v4957_v32 = vunpack.i.l.bf16 %v4956_v2  ;;  %v4958_v8 = vunpack.i.h.bf16 %v4956_v2 }
  0xf2   : > { %1624 = vmatmul.mubr.f32.gmra.mrb[22].mxu0 %v1212_v16  ;;  %4351 = vmatmul.mubr.msk.f32.gmra.mrb[22].mxu1 %vm257_vm0, %v6404_v35  ;;  %v4962_v16 = vunpack.i.l.bf16 %v4961_v36  ;;  %v1219_v29 = vsel %vm257_vm0, %v8219_v53, %v4958_v8 }
  0xf3   : > { %1628 = vmatprep.mubr.f32.mxu0 %v1245_v34  ;;  %4512 = vmatpush1.bf16.msra.mxu0 %v4511_v39  ;;  %v1251_v39 = vsel %vm257_vm0, %v6350_v30, %v4957_v32  ;;  %v4966_v24 = vpop.permute.xlu0 %4965  ;;  %v4963_v34 = vunpack.i.h.bf16 %v4961_v36  ;;  %v4971_v52 = vpop.permute.xlu1 %4970  ;;  %v8227_v36 = vld [vmem:[#allocation48_spill] sm:$0xff] }
  0xf4   : > { %4513 = vmatprep.subr.bf16.mxu0 %v8198_v58  ;;  %4353 = vmatprep.mubr.msk.f32.mxu1 %vm257_vm0, %v6418_v18  ;;  %v4967_v17 = vunpack.i.l.bf16 %v4966_v24  ;;  %v1252_v22 = vsel %vm257_vm0, %v6352_v10, %v4962_v16  ;;  %v4973_v12 = vunpack.i.h.bf16 %v4971_v52 }
  0xf6   : > { %1629 = vmatmul.mubr.f32.gmra.mrb[24].mxu0 %v1213_v41  ;;  %4354 = vmatmul.mubr.msk.f32.gmra.mrb[24].mxu1 %vm257_vm0, %v6420_v3  ;;  %v4968_v41 = vunpack.i.h.bf16 %v4966_v24  ;;  %v1253_v30 = vsel %vm257_vm0, %v6360_v6, %v4967_v17  ;;  %v8229_v17 = vld [vmem:[#allocation50_spill] sm:$0xff] }
  0xf7   : > { %1633 = vmatprep.mubr.f32.mxu0 %v1246_v25  ;;  %4515 = vmatpush1.bf16.msra.mxu0 %v4514_v37  ;;  %v8220_v37 = vld [vmem:[#allocation40_spill] sm:$0xff]  ;;  %v4972_v25 = vunpack.i.l.bf16 %v4971_v52  ;;  %v4976_v40 = vpop.permute.xlu0 %4975 }
  0xf8   : > { %4516 = vmatprep.subr.bf16.mxu0 %v8198_v58  ;;  %4356 = vmatprep.mubr.msk.f32.mxu1 %vm257_vm0, %v6440_v13  ;;  %v1220_v15 = vsel %vm257_vm0, %v8220_v37, %v4963_v34  ;;  %v1221_v55 = vsel %vm257_vm0, %v8221_v42, %v4968_v41  ;;  %v4978_v61 = vunpack.i.h.bf16 %v4976_v40 }
  0xf9   : > { %v1254_v10 = vsel %vm257_vm0, %v6362_v54, %v4972_v25 }
  0xfa   : > { %1634 = vmatmul.mubr.f32.gmra.mrb[26].mxu0 %v1214_v14  ;;  %4357 = vmatmul.mubr.msk.f32.gmra.mrb[26].mxu1 %vm257_vm0, %v6442_v48  ;;  %v4977_v14 = vunpack.i.l.bf16 %v4976_v40 }
  0xfb   : > { %1638 = vmatprep.mubr.f32.mxu0 %v1247_v49  ;;  %4518 = vmatpush1.bf16.msra.mxu0 %v4517_v59  ;;  %v4981_v59 = vpop.permute.xlu1 %4980  ;;  %v8222_v49 = vld [vmem:[#allocation43_spill] sm:$0xff]  ;;  %v4986_v47 = vpop.permute.xlu0 %4985 }
  0xfc   : > { %4519 = vmatprep.subr.bf16.mxu0 %v8198_v58  ;;  %4359 = vmatprep.mubr.msk.f32.mxu1 %vm257_vm0, %v6457_v38  ;;  %v4953_v38 = vunpack.i.h.bf16 %v4951_v4  ;;  %v1222_v1 = vsel %vm257_vm0, %v8222_v49, %v4973_v12  ;;  %v4982_v5 = vunpack.i.l.bf16 %v4981_v59  ;;  %v1255_v6 = vsel %vm257_vm0, %v6370_v23, %v4977_v14  ;;  %v687_v12 = vld [vmem:[#allocation2 + $0x19a] sm:$0xff]  ;;  %v688_v49 = vld [vmem:[#allocation2 + $0x1a2] sm:$0xff] }
  0xfd   : > { %v4983_v31 = vunpack.i.h.bf16 %v4981_v59 }
  0xfe   : > { %1639 = vmatmul.mubr.f32.gmra.mrb[28].mxu0 %v1215_v27  ;;  %4360 = vmatmul.mubr.msk.f32.gmra.mrb[28].mxu1 %vm257_vm0, %v6475_v56  ;;  %v1217_v56 = vsel %vm257_vm0, %v8217_v45, %v4948_v44  ;;  %v1218_v51 = vsel %vm257_vm0, %v8218_v33, %v4953_v38  ;;  %v1223_v27 = vsel %vm257_vm0, %v8223_v60, %v4978_v61  ;;  %v8226_v38 = vld [vmem:[#allocation47_spill] sm:$0xff]  ;;  %v593_v61 = vld [vmem:[#allocation2 + $0x30] sm:$0xff] }
  0xff   : > { %1643 = vmatprep.mubr.f32.mxu0 %v1248_v20  ;;  %4521 = vmatpush1.bf16.msra.mxu0 %v4520_v62  ;;  %v4987_v62 = vunpack.i.l.bf16 %v4986_v47  ;;  %v1256_v54 = vsel %vm257_vm0, %v6372_v63, %v4982_v5  ;;  %v4991_v43 = vpop.permute.xlu1 %4990  ;;  %v4988_v20 = vunpack.i.h.bf16 %v4986_v47  ;;  %v1224_v28 = vsel %vm257_vm0, %v8224_v19, %v4983_v31  ;;  %v4996_v44 = vpop.permute.xlu0 %4995  ;;  %v528_v31 = vld [vmem:[#allocation2 + $0x19] sm:$0xff] }
 0x100   : > { %4522 = vmatprep.subr.bf16.mxu0 %v8198_v58  ;;  %v4992_v4 = vunpack.i.l.bf16 %v4991_v43  ;;  %v4993_v11 = vunpack.i.h.bf16 %v4991_v43  ;;  %v4997_v50 = vunpack.i.l.bf16 %v4996_v44  ;;  %v4998_v2 = vunpack.i.h.bf16 %v4996_v44  ;;  %4362 = vmatprep.mubr.msk.f32.mxu1 %vm257_vm0, %v687_v12  ;;  %v535_v12 = vld [vmem:[#allocation2 + $0x69] sm:$0xff] }
 0x101   : > { %v1257_v23 = vsel %vm257_vm0, %v6386_v9, %v4987_v62 }
 0x102   : > { %1644 = vmatmul.mubr.f32.gmra.mrb[30].mxu0 %v1216_v26  ;;  %v8225_v26 = vld [vmem:[#allocation46_spill] sm:$0xff]  ;;  %v1258_v63 = vsel %vm257_vm0, %v6388_v46, %v4992_v4  ;;  %v1226_v45 = vsel %vm257_vm0, %v8226_v38, %v4993_v11  ;;  %v1259_v9 = vsel %vm257_vm0, %v6402_v57, %v4997_v50  ;;  %v1227_v8 = vsel %vm257_vm0, %v8227_v36, %v4998_v2 }
 0x103   : > { %1648 = vmatprep.mubr.f32.mxu0 %v1249_v7  ;;  %4524 = vmatpush1.bf16.msra.mxu0 %v4523_v0  ;;  %v1225_v0 = vsel %vm257_vm0, %v8225_v26, %v4988_v20  ;;  %v5001_v7 = vpop.permute.xlu1 %5000  ;;  %v5006_v32 = vpop.permute.xlu0 %5005  ;;  %v529_v20 = vld [vmem:[#allocation2 + $0x21] sm:$0xff]  ;;  %v530_v26 = vld [vmem:[#allocation2 + $0x31] sm:$0xff] }
 0x104   : > { %v5007_v33 = vunpack.i.l.bf16 %v5006_v32  ;;  %v5008_v16 = vunpack.i.h.bf16 %v5006_v32  ;;  %4363 = vmatmul.mubr.msk.f32.gmra.mrb[30].mxu1 %vm257_vm0, %v688_v49  ;;  %v596_v50 = vld [vmem:[#allocation2 + $0x50] sm:$0xff] }
 0x106   : > { %1649 = vmatmul.mubr.f32.gmra.mrb[32].mxu0 %v1217_v56  ;;  %v5002_v56 = vunpack.i.l.bf16 %v5001_v7  ;;  %v1261_v57 = vsel %vm257_vm0, %v6418_v18, %v5007_v33  ;;  %v532_v33 = vld [vmem:[#allocation2 + $0x49] sm:$0xff] }
 0x107   : > { %1653 = vmatprep.mubr.f32.mxu0 %v1250_v21  ;;  %v5003_v21 = vunpack.i.h.bf16 %v5001_v7  ;;  %v5016_v53 = vpop.permute.xlu0 %5015 }
 0x108   : > { %v1260_v46 = vsel %vm257_vm0, %v6404_v35, %v5002_v56  ;;  %v5017_v52 = vunpack.i.l.bf16 %v5016_v53  ;;  %v5018_v37 = vunpack.i.h.bf16 %v5016_v53 }
 0x10a   : > { %1654 = vmatmul.mubr.f32.gmra.mrb[34].mxu0 %v1218_v51  ;;  %v5011_v51 = vpop.permute.xlu1 %5010  ;;  %v1263_v18 = vsel %vm257_vm0, %v6440_v13, %v5017_v52 }
 0x10b   : > { %1658 = vmatprep.mubr.f32.mxu0 %v1251_v39  ;;  %v8228_v39 = vld [vmem:[#allocation49_spill] sm:$0xff]  ;;  %v5012_v34 = vunpack.i.l.bf16 %v5011_v51  ;;  %v5026_v40 = vpop.permute.xlu0 %5025 }
 0x10c   : > { %v1228_v24 = vsel %vm257_vm0, %v8228_v39, %v5003_v21  ;;  %v5028_v13 = vunpack.i.h.bf16 %v5026_v40 }
 0x10d   : > { %v1262_v35 = vsel %vm257_vm0, %v6420_v3, %v5012_v34  ;;  %v5027_v3 = vunpack.i.l.bf16 %v5026_v40 }
 0x10e   : > { %1659 = vmatmul.mubr.f32.gmra.mrb[36].mxu0 %v1219_v29  ;;  %v5013_v29 = vunpack.i.h.bf16 %v5011_v51  ;;  %v5021_v41 = vpop.permute.xlu1 %5020  ;;  %v598_v51 = vld [vmem:[#allocation2 + $0x68] sm:$0xff] }
 0x10f   : > { %1663 = vmatprep.mubr.f32.mxu0 %v1252_v22  ;;  %v1229_v22 = vsel %vm257_vm0, %v8229_v17, %v5008_v16  ;;  %v5023_v42 = vunpack.i.h.bf16 %v5021_v41  ;;  %v1297_v47 = vsel %vm257_vm0, %v593_v61, %v5027_v3  ;;  %v5036_v60 = vpop.permute.xlu0 %5035  ;;  %v536_v61 = vld [vmem:[#allocation2 + $0x79] sm:$0xff] }
 0x110   : > { %v5038_v4 = vunpack.i.h.bf16 %v5036_v60 }
 0x112   : > { %1664 = vmatmul.mubr.f32.gmra.mrb[38].mxu0 %v1220_v15  ;;  %v8230_v15 = vld [vmem:[#allocation51_spill] sm:$0xff]  ;;  %v5031_v59 = vpop.permute.xlu1 %5030  ;;  %v1267_v7 = vsel %vm257_vm0, %v530_v26, %v5038_v4 }
 0x113   : > { %1668 = vmatprep.mubr.f32.mxu0 %v1253_v30  ;;  %v1230_v25 = vsel %vm257_vm0, %v8230_v15, %v5013_v29  ;;  %v5022_v30 = vunpack.i.l.bf16 %v5021_v41  ;;  %v5033_v62 = vunpack.i.h.bf16 %v5031_v59  ;;  %v599_v29 = vld [vmem:[#allocation2 + $0x78] sm:$0xff]  ;;  %v534_v41 = vld [vmem:[#allocation2 + $0x61] sm:$0xff] }
 0x114   : > { %v600_v15 = vld [vmem:[#allocation2 + $0x80] sm:$0xff] }
 0x115   : > { %v539_v26 = vld [vmem:[#allocation2 + $0x99] sm:$0xff] }
 0x116   : > { %1669 = vmatmul.mubr.f32.gmra.mrb[40].mxu0 %v1221_v55  ;;  %v8231_v55 = vld [vmem:[#allocation52_spill] sm:$0xff]  ;;  %v5041_v19 = vpop.permute.xlu1 %5040 }
 0x117   : > { %1673 = vmatprep.mubr.f32.mxu0 %v1254_v10  ;;  %v1231_v14 = vsel %vm257_vm0, %v8231_v55, %v5018_v37  ;;  %v1264_v10 = vsel %vm257_vm0, %v6442_v48, %v5022_v30  ;;  %v1265_v48 = vsel %vm257_vm0, %v528_v31, %v5028_v13  ;;  %v5042_v44 = vunpack.i.l.bf16 %v5041_v19  ;;  %v601_v55 = vld [vmem:[#allocation2 + $0x90] sm:$0xff]  ;;  %v602_v13 = vld [vmem:[#allocation2 + $0x98] sm:$0xff]  ;;  %v537_v31 = vld [vmem:[#allocation2 + $0x81] sm:$0xff] }
 0x119   : > { %v1300_v38 = vsel %vm257_vm0, %v596_v50, %v5042_v44  ;;  %v605_v50 = vld [vmem:[#allocation2 + $0xc0] sm:$0xff] }
 0x11a   : > { %1674 = vmatmul.mubr.f32.gmra.mrb[42].mxu0 %v1222_v1  ;;  %v8232_v1 = vld [vmem:[#allocation53_spill] sm:$0xff]  ;;  %v5051_v56 = vpop.permute.xlu1 %5050 }
 0x11b   : > { %1678 = vmatprep.mubr.f32.mxu0 %v1255_v6  ;;  %v1232_v5 = vsel %vm257_vm0, %v8232_v1, %v5023_v42  ;;  %v5032_v6 = vunpack.i.l.bf16 %v5031_v59  ;;  %v5052_v36 = vunpack.i.l.bf16 %v5051_v56  ;;  %v5053_v16 = vunpack.i.h.bf16 %v5051_v56 }
 0x11d   : > { %v1302_v34 = vsel %vm257_vm0, %v598_v51, %v5052_v36  ;;  %v607_v51 = vld [vmem:[#allocation2 + $0xd8] sm:$0xff] }
 0x11e   : > { %1679 = vmatmul.mubr.f32.gmra.mrb[44].mxu0 %v1223_v27  ;;  %v594_v27 = vld [vmem:[#allocation2 + $0x38] sm:$0xff]  ;;  %v5061_v53 = vpop.permute.xlu1 %5060 }
 0x11f   : > { %1683 = vmatprep.mubr.f32.mxu0 %v1256_v54  ;;  %v5037_v54 = vunpack.i.l.bf16 %v5036_v60  ;;  %v1298_v43 = vsel %vm257_vm0, %v594_v27, %v5032_v6  ;;  %v5062_v52 = vunpack.i.l.bf16 %v5061_v53  ;;  %v603_v27 = vld [vmem:[#allocation2 + $0xa8] sm:$0xff] }
 0x121   : > { %v1304_v40 = vsel %vm257_vm0, %v600_v15, %v5062_v52  ;;  %v609_v15 = vld [vmem:[#allocation2 + $0xf0] sm:$0xff] }
 0x122   : > { %1684 = vmatmul.mubr.f32.gmra.mrb[46].mxu0 %v1224_v28  ;;  %v595_v28 = vld [vmem:[#allocation2 + $0x48] sm:$0xff]  ;;  %v5071_v42 = vpop.permute.xlu1 %5070 }
 0x123   : > { %1688 = vmatprep.mubr.f32.mxu0 %v1257_v23  ;;  %v1266_v23 = vsel %vm257_vm0, %v529_v20, %v5033_v62  ;;  %v1299_v11 = vsel %vm257_vm0, %v595_v28, %v5037_v54  ;;  %v5073_v1 = vunpack.i.h.bf16 %v5071_v42  ;;  %v538_v20 = vld [vmem:[#allocation2 + $0x91] sm:$0xff] }
 0x124   : > { %v604_v28 = vld [vmem:[#allocation2 + $0xb0] sm:$0xff] }
 0x126   : > { %1689 = vmatmul.mubr.f32.gmra.mrb[48].mxu0 %v1225_v0  ;;  %v5046_v0 = vpop.permute.xlu0 %5045  ;;  %v5081_v60 = vpop.permute.xlu1 %5080 }
 0x127   : > { %1693 = vmatprep.mubr.f32.mxu0 %v1258_v63  ;;  %v5043_v63 = vunpack.i.h.bf16 %v5041_v19  ;;  %v5047_v2 = vunpack.i.l.bf16 %v5046_v0  ;;  %v5048_v32 = vunpack.i.h.bf16 %v5046_v0  ;;  %v5082_v54 = vunpack.i.l.bf16 %v5081_v60 }
 0x128   : > { %v5083_v4 = vunpack.i.h.bf16 %v5081_v60 }
 0x129   : > { %v1269_v39 = vsel %vm257_vm0, %v532_v33, %v5048_v32  ;;  %v541_v33 = vld [vmem:[#allocation2 + $0xb1] sm:$0xff] }
 0x12a   : > { %1694 = vmatmul.mubr.f32.gmra.mrb[50].mxu0 %v1226_v45  ;;  %v531_v45 = vld [vmem:[#allocation2 + $0x39] sm:$0xff]  ;;  %v5091_v0 = vpop.permute.xlu1 %5090 }
 0x12b   : > { %1698 = vmatprep.mubr.f32.mxu0 %v1259_v9  ;;  %v597_v9 = vld [vmem:[#allocation2 + $0x60] sm:$0xff]  ;;  %v1268_v21 = vsel %vm257_vm0, %v531_v45, %v5043_v63  ;;  %v540_v45 = vld [vmem:[#allocation2 + $0xa9] sm:$0xff]  ;;  %v5093_v32 = vunpack.i.h.bf16 %v5091_v0 }
 0x12e   : > { %1699 = vmatmul.mubr.f32.gmra.mrb[52].mxu0 %v1227_v8  ;;  %v1301_v8 = vsel %vm257_vm0, %v597_v9, %v5047_v2  ;;  %v5092_v2 = vunpack.i.l.bf16 %v5091_v0  ;;  %v606_v9 = vld [vmem:[#allocation2 + $0xc8] sm:$0xff] }
 0x12f   : > { %1703 = vmatprep.mubr.f32.mxu0 %v1260_v46  ;;  %v5056_v46 = vpop.permute.xlu0 %5055 }
 0x130   : > { %v5058_v17 = vunpack.i.h.bf16 %v5056_v46 }
 0x132   : > { %1704 = vmatmul.mubr.f32.gmra.mrb[54].mxu0 %v1228_v24  ;;  %v5057_v24 = vunpack.i.l.bf16 %v5056_v46  ;;  %v1271_v30 = vsel %vm257_vm0, %v534_v41, %v5058_v17  ;;  %v5101_v46 = vpop.permute.xlu1 %5100  ;;  %v543_v41 = vld [vmem:[#allocation2 + $0xc9] sm:$0xff] }
 0x133   : > { %1708 = vmatprep.mubr.f32.mxu0 %v1261_v57  ;;  %v533_v57 = vld [vmem:[#allocation2 + $0x51] sm:$0xff]  ;;  %v5066_v37 = vpop.permute.xlu0 %5065  ;;  %v5103_v17 = vunpack.i.h.bf16 %v5101_v46 }
 0x136   : > { %1709 = vmatmul.mubr.f32.gmra.mrb[56].mxu0 %v1229_v22  ;;  %v1270_v22 = vsel %vm257_vm0, %v533_v57, %v5053_v16  ;;  %v542_v57 = vld [vmem:[#allocation2 + $0xc1] sm:$0xff] }
 0x137   : > { %1713 = vmatprep.mubr.f32.mxu0 %v1262_v35  ;;  %v1303_v35 = vsel %vm257_vm0, %v599_v29, %v5057_v24  ;;  %v5076_v49 = vpop.permute.xlu0 %5075  ;;  %v5102_v24 = vunpack.i.l.bf16 %v5101_v46  ;;  %v608_v29 = vld [vmem:[#allocation2 + $0xe0] sm:$0xff] }
 0x138   : > { %v5077_v6 = vunpack.i.l.bf16 %v5076_v49  ;;  %v5078_v62 = vunpack.i.h.bf16 %v5076_v49 }
 0x13a   : > { %1714 = vmatmul.mubr.f32.gmra.mrb[58].mxu0 %v1230_v25  ;;  %v5063_v25 = vunpack.i.h.bf16 %v5061_v53 }
 0x13b   : > { %1718 = vmatprep.mubr.f32.mxu0 %v1263_v18  ;;  %v5067_v18 = vunpack.i.l.bf16 %v5066_v37  ;;  %v5086_v19 = vpop.permute.xlu0 %5085 }
 0x13c   : > { %v1272_v3 = vsel %vm257_vm0, %v535_v12, %v5063_v25  ;;  %v5087_v44 = vunpack.i.l.bf16 %v5086_v19  ;;  %v5088_v63 = vunpack.i.h.bf16 %v5086_v19  ;;  %v544_v12 = vld [vmem:[#allocation2 + $0xd9] sm:$0xff] }
 0x13d   : > { %v1305_v59 = vsel %vm257_vm0, %v601_v55, %v5067_v18  ;;  %v610_v55 = vld [vmem:[#allocation2 + $0xf8] sm:$0xff] }
 0x13e   : > { %1719 = vmatmul.mubr.f32.gmra.mrb[60].mxu0 %v1231_v14  ;;  %v5068_v14 = vunpack.i.h.bf16 %v5066_v37  ;;  %v5111_v37 = vpop.permute.xlu1 %5110 }
 0x13f   : > { %1723 = vmatprep.mubr.f32.mxu0 %v1264_v10  ;;  %v5072_v10 = vunpack.i.l.bf16 %v5071_v42  ;;  %v5096_v56 = vpop.permute.xlu0 %5095  ;;  %v5112_v18 = vunpack.i.l.bf16 %v5111_v37 }
 0x140   : > { %v5097_v36 = vunpack.i.l.bf16 %v5096_v56  ;;  %v5098_v16 = vunpack.i.h.bf16 %v5096_v56 }
 0x142   : > { %1724 = vmatmul.mubr.f32.gmra.mrb[62].mxu0 %v1232_v5  ;;  %v1273_v5 = vsel %vm257_vm0, %v536_v61, %v5068_v14  ;;  %v5113_v14 = vunpack.i.h.bf16 %v5111_v37  ;;  %v545_v61 = vld [vmem:[#allocation2 + $0xe1] sm:$0xff]  ;;  %v5121_v49 = vpop.permute.xlu1 %5120 }
 0x143   : > { %1793 = vmatprep.mubr.f32.mxu0 %v1297_v47  ;;  %v1306_v47 = vsel %vm257_vm0, %v602_v13, %v5072_v10  ;;  %v5106_v53 = vpop.permute.xlu0 %5105  ;;  %v611_v13 = vld [vmem:[#allocation2 + $0x108] sm:$0xff] }
 0x144   : > { %v5107_v52 = vunpack.i.l.bf16 %v5106_v53  ;;  %v5108_v25 = vunpack.i.h.bf16 %v5106_v53 }
 0x146   : > { %1794 = vmatmul.mubr.f32.vlgmr.msra.gmra.mrb[0].mxu0 %v1265_v48  ;;  %v1274_v48 = vsel %vm257_vm0, %v537_v31, %v5073_v1  ;;  %v546_v31 = vld [vmem:[#allocation2 + $0xf1] sm:$0xff]  ;;  %v5131_v19 = vpop.permute.xlu1 %5130 }
 0x147   : > { %1798 = vmatprep.mubr.f32.mxu0 %v1298_v43  ;;  %v1307_v43 = vsel %vm257_vm0, %v603_v27, %v5077_v6  ;;  %v5116_v42 = vpop.permute.xlu0 %5115  ;;  %v5122_v6 = vunpack.i.l.bf16 %v5121_v49  ;;  %v612_v27 = vld [vmem:[#allocation2 + $0x110] sm:$0xff] }
 0x148   : > { %v5117_v10 = vunpack.i.l.bf16 %v5116_v42  ;;  %v5118_v1 = vunpack.i.h.bf16 %v5116_v42  ;;  %v3238_v42 = vld [vmem:[%s8089_s3 + $0x208] sm:$0xff] }
 0x14a   : > { %1799 = vmatmul.mubr.f32.gmra.mrb[2].mxu0 %v1266_v23  ;;  %v1275_v23 = vsel %vm257_vm0, %v538_v20, %v5078_v62  ;;  %v5123_v62 = vunpack.i.h.bf16 %v5121_v49  ;;  %v547_v20 = vld [vmem:[#allocation2 + $0xf9] sm:$0xff]  ;;  %v5141_v56 = vpop.permute.xlu1 %5140 }
 0x14b   : > { %1803 = vmatprep.mubr.f32.mxu0 %v1299_v11  ;;  %v1308_v11 = vsel %vm257_vm0, %v604_v28, %v5082_v54  ;;  %v5126_v60 = vpop.permute.xlu0 %5125  ;;  %v613_v28 = vld [vmem:[#allocation2 + $0x120] sm:$0xff] }
 0x14c   : > { %v5127_v54 = vunpack.i.l.bf16 %v5126_v60 }
 0x14e   : > { %1804 = vmatmul.mubr.f32.gmra.mrb[4].mxu0 %v1267_v7  ;;  %v1276_v7 = vsel %vm257_vm0, %v539_v26, %v5083_v4  ;;  %v5128_v4 = vunpack.i.h.bf16 %v5126_v60  ;;  %v548_v26 = vld [vmem:[#allocation2 + $0x109] sm:$0xff] }
 0x14f   : > { %1808 = vmatprep.mubr.f32.mxu0 %v1300_v38  ;;  %v1309_v38 = vsel %vm257_vm0, %v605_v50, %v5087_v44  ;;  %v5132_v44 = vunpack.i.l.bf16 %v5131_v19  ;;  %v5136_v0 = vpop.permute.xlu0 %5135  ;;  %v614_v50 = vld [vmem:[#allocation2 + $0x128] sm:$0xff] }
 0x152   : > { %1809 = vmatmul.mubr.f32.gmra.mrb[6].mxu0 %v1268_v21  ;;  %v1277_v21 = vsel %vm257_vm0, %v540_v45, %v5088_v63  ;;  %v5133_v63 = vunpack.i.h.bf16 %v5131_v19  ;;  %v549_v45 = vld [vmem:[#allocation2 + $0x111] sm:$0xff]  ;;  %v3241_v19 = vld [vmem:[%s8089_s3 + $0x220] sm:$0xff] }
 0x153   : > { %1813 = vmatprep.mubr.f32.mxu0 %v1301_v8  ;;  %v1310_v8 = vsel %vm257_vm0, %v606_v9, %v5092_v2  ;;  %v5137_v2 = vunpack.i.l.bf16 %v5136_v0  ;;  %v615_v9 = vld [vmem:[#allocation2 + $0x138] sm:$0xff]  ;;  %v5146_v46 = vpop.permute.xlu0 %5145 }
 0x156   : > { %1814 = vmatmul.mubr.f32.gmra.mrb[8].mxu0 %v1269_v39  ;;  %v1278_v39 = vsel %vm257_vm0, %v541_v33, %v5093_v32  ;;  %v5138_v32 = vunpack.i.h.bf16 %v5136_v0  ;;  %v550_v33 = vld [vmem:[#allocation2 + $0x121] sm:$0xff]  ;;  %v555_v0 = vld [vmem:[#allocation2 + $0x159] sm:$0xff] }
 0x157   : > { %1818 = vmatprep.mubr.f32.mxu0 %v1302_v34  ;;  %v1311_v34 = vsel %vm257_vm0, %v607_v51, %v5097_v36  ;;  %v5142_v36 = vunpack.i.l.bf16 %v5141_v56  ;;  %v616_v51 = vld [vmem:[#allocation2 + $0x140] sm:$0xff] }
 0x159   : > { %v1320_v53 = vsel %vm257_vm0, %v616_v51, %v5142_v36 }
 0x15a   : > { %1819 = vmatmul.mubr.f32.gmra.mrb[10].mxu0 %v1270_v22  ;;  %v1279_v22 = vsel %vm257_vm0, %v542_v57, %v5098_v16  ;;  %v5147_v57 = vunpack.i.l.bf16 %v5146_v46 }
 0x15b   : > { %1823 = vmatprep.mubr.f32.mxu0 %v1303_v35  ;;  %v1312_v35 = vsel %vm257_vm0, %v608_v29, %v5102_v24  ;;  %v5143_v24 = vunpack.i.h.bf16 %v5141_v56  ;;  %v551_v29 = vld [vmem:[#allocation2 + $0x129] sm:$0xff] }
 0x15e   : > { %1824 = vmatmul.mubr.f32.gmra.mrb[12].mxu0 %v1271_v30  ;;  %v1280_v30 = vsel %vm257_vm0, %v543_v41, %v5103_v17  ;;  %v5151_v17 = vpop.permute.xlu1 %5150 }
 0x15f   : > { %1828 = vmatprep.mubr.f32.mxu0 %v1304_v40  ;;  %v1313_v40 = vsel %vm257_vm0, %v609_v15, %v5107_v52  ;;  %v5148_v52 = vunpack.i.h.bf16 %v5146_v46  ;;  %v5152_v41 = vunpack.i.l.bf16 %v5151_v17  ;;  %v552_v15 = vld [vmem:[#allocation2 + $0x139] sm:$0xff] }
 0x162   : > { %1829 = vmatmul.mubr.f32.gmra.mrb[14].mxu0 %v1272_v3  ;;  %v1281_v3 = vsel %vm257_vm0, %v544_v12, %v5108_v25  ;;  %v5156_v25 = vpop.permute.xlu0 %5155  ;;  %v3237_v12 = vld [vmem:[%s8089_s3 + $0x200] sm:$0xff]  ;;  %v5161_v49 = vpop.permute.xlu1 %5160 }
 0x163   : > { %1833 = vmatprep.mubr.f32.mxu0 %v1305_v59  ;;  %v1314_v59 = vsel %vm257_vm0, %v610_v55, %v5112_v18  ;;  %v5153_v55 = vunpack.i.h.bf16 %v5151_v17  ;;  %v5162_v60 = vunpack.i.l.bf16 %v5161_v49  ;;  %v623_v17 = vld [vmem:[#allocation2 + $0x198] sm:$0xff] }
 0x166   : > { %1834 = vmatmul.mubr.f32.gmra.mrb[16].mxu0 %v1273_v5  ;;  %v1282_v5 = vsel %vm257_vm0, %v545_v61, %v5113_v14  ;;  %v1289_v14 = vsel %vm257_vm0, %v552_v15, %v5148_v52  ;;  %v553_v61 = vld [vmem:[#allocation2 + $0x141] sm:$0xff] }
 0x167   : > { %1838 = vmatprep.mubr.f32.mxu0 %v1306_v47  ;;  %v1315_v47 = vsel %vm257_vm0, %v611_v13, %v5117_v10  ;;  %v5157_v10 = vunpack.i.l.bf16 %v5156_v25  ;;  %v619_v13 = vld [vmem:[#allocation2 + $0x168] sm:$0xff] }
 0x16a   : > { %1839 = vmatmul.mubr.f32.gmra.mrb[18].mxu0 %v1274_v48  ;;  %v1283_v48 = vsel %vm257_vm0, %v546_v31, %v5118_v1  ;;  %v3239_v1 = vld [vmem:[%s8089_s3 + $0x210] sm:$0xff] }
 0x16b   : > { %1843 = vmatprep.mubr.f32.mxu0 %v1307_v43  ;;  %v1316_v43 = vsel %vm257_vm0, %v612_v27, %v5122_v6  ;;  %v5158_v6 = vunpack.i.h.bf16 %v5156_v25  ;;  %v1323_v27 = vsel %vm257_vm0, %v619_v13, %v5157_v10 }
 0x16e   : > { %1844 = vmatmul.mubr.f32.gmra.mrb[20].mxu0 %v1275_v23  ;;  %v1284_v23 = vsel %vm257_vm0, %v547_v20, %v5123_v62  ;;  %v554_v62 = vld [vmem:[#allocation2 + $0x151] sm:$0xff] }
 0x16f   : > { %1848 = vmatprep.mubr.f32.mxu0 %v1308_v11  ;;  %v1317_v11 = vsel %vm257_vm0, %v613_v28, %v5127_v54  ;;  %v620_v54 = vld [vmem:[#allocation2 + $0x170] sm:$0xff]  ;;  %v3242_v28 = vld [vmem:[%s8089_s3 + $0x228] sm:$0xff] }
 0x172   : > { %1849 = vmatmul.mubr.f32.gmra.mrb[22].mxu0 %v1276_v7  ;;  %v1285_v7 = vsel %vm257_vm0, %v548_v26, %v5128_v4  ;;  %v5163_v4 = vunpack.i.h.bf16 %v5161_v49  ;;  %v1324_v26 = vsel %vm257_vm0, %v620_v54, %v5162_v60  ;;  %v3173_v60 = vld [vmem:[%s8089_s3] sm:$0xff] }
 0x173   : > { %1853 = vmatprep.mubr.f32.mxu0 %v1309_v38  ;;  %v1318_v38 = vsel %vm257_vm0, %v614_v50, %v5132_v44  ;;  %v6840_v44 = vpack.c.bf16 %v3242_v28, %v3241_v19  ;;  %v5171_v50 = vpop.permute.xlu1 %5170  ;;  %v3175_v19 = vld [vmem:[%s8089_s3 + $0x10] sm:$0xff]  ;;  %v3176_v28 = vld [vmem:[%s8089_s3 + $0x18] sm:$0xff] }
 0x174   : > { %v5173_v51 = vunpack.i.h.bf16 %v5171_v50 }
 0x175   : > { %8235 = vst [vmem:[#allocation36_spill] sm:$0xff] %v6840_v44 }
 0x176   : > { %1854 = vmatmul.mubr.f32.gmra.mrb[24].mxu0 %v1277_v21  ;;  %v1286_v21 = vsel %vm257_vm0, %v549_v45, %v5133_v63  ;;  %v621_v63 = vld [vmem:[#allocation2 + $0x180] sm:$0xff]  ;;  %v1292_v45 = vsel %vm257_vm0, %v555_v0, %v5163_v4  ;;  %v4545_v4 = vpack.c.bf16 %v3176_v28, %v3175_v19  ;;  %v3195_v28 = vld [vmem:[%s8089_s3 + $0xb0] sm:$0xff] }
 0x177   : > { %1858 = vmatprep.mubr.f32.mxu0 %v1310_v8  ;;  %v1319_v8 = vsel %vm257_vm0, %v615_v9, %v5137_v2  ;;  %v3244_v2 = vld [vmem:[%s8089_s3 + $0x238] sm:$0xff]  ;;  %v5172_v9 = vunpack.i.l.bf16 %v5171_v50 }
 0x17a   : > { %1859 = vmatmul.mubr.f32.gmra.mrb[26].mxu0 %v1278_v39 }
 0x17b   : > { %1863 = vmatprep.mubr.f32.mxu0 %v1311_v34  ;;  %v1287_v34 = vsel %vm257_vm0, %v550_v33, %v5138_v32 }
 0x17e   : > { %1864 = vmatmul.mubr.f32.gmra.mrb[28].mxu0 %v1279_v22  ;;  %v617_v22 = vld [vmem:[#allocation2 + $0x150] sm:$0xff] }
 0x17f   : > { %1868 = vmatprep.mubr.f32.mxu0 %v1312_v35  ;;  %v1288_v35 = vsel %vm257_vm0, %v551_v29, %v5143_v24  ;;  %v1321_v37 = vsel %vm257_vm0, %v617_v22, %v5147_v57  ;;  %v5181_v29 = vpop.permute.xlu1 %5180 }
 0x182   : > { %1869 = vmatmul.mubr.f32.gmra.mrb[30].mxu0 %v1280_v30  ;;  %v618_v30 = vld [vmem:[#allocation2 + $0x158] sm:$0xff] }
 0x183   : > { %1873 = vmatprep.mubr.f32.mxu0 %v1313_v40 }
 0x186   : > { %1874 = vmatmul.mubr.f32.gmra.mrb[32].mxu0 %v1281_v3  ;;  %v6812_v3 = vpack.c.bf16 %v3238_v42, %v3237_v12  ;;  %v5504_v12 = vld [vmem:[#allocation2 + $0x181] sm:$0xff] }
 0x187   : > { %1878 = vmatprep.mubr.f32.mxu0 %v1314_v59  ;;  %v1322_v59 = vsel %vm257_vm0, %v618_v30, %v5152_v41  ;;  %v5183_v30 = vunpack.i.h.bf16 %v5181_v29 }
 0x188   : > { %8233 = vst [vmem:[#allocation31_spill] sm:$0xff] %v6812_v3  ;;  %4638 = vmatprep.subr.bf16.mxu0 %v6812_v3 }
 0x189   : > { %4640 = vmatpush3.bf16.msra.mxu0 %v6812_v3 }
 0x18a   : > { %1879 = vmatmul.mubr.f32.gmra.mrb[34].mxu0 %v1282_v5  ;;  %v3240_v5 = vld [vmem:[%s8089_s3 + $0x218] sm:$0xff] }
 0x18b   : > { %1883 = vmatprep.mubr.f32.mxu0 %v1315_v47  ;;  %v1290_v47 = vsel %vm257_vm0, %v553_v61, %v5153_v55  ;;  %v6824_v31 = vpack.c.bf16 %v3240_v5, %v3239_v1 }
 0x18d   : > { %8234 = vst [vmem:[#allocation33_spill] sm:$0xff] %v6824_v31  ;;  %4642 = vmatprep.subr.bf16.mxu0 %v6824_v31 }
 0x18e   : > { %1884 = vmatmul.mubr.f32.gmra.mrb[36].mxu0 %v1283_v48  ;;  %v5166_v48 = vpop.permute.xlu0 %5165 }
 0x18f   : > { %1888 = vmatprep.mubr.f32.mxu0 %v1316_v43  ;;  %4644 = vmatpush3.bf16.msra.mxu0 %v6824_v31 }
 0x190   : > { %4646 = vmatprep.subr.bf16.mxu0 %v6840_v44 }
 0x192   : > { %1889 = vmatmul.mubr.f32.gmra.mrb[38].mxu0 %v1284_v23  ;;  %v1291_v23 = vsel %vm257_vm0, %v554_v62, %v5158_v6  ;;  %v5176_v36 = vpop.permute.xlu0 %5175 }
 0x193   : > { %1893 = vmatprep.mubr.f32.mxu0 %v1317_v11  ;;  %v5167_v11 = vunpack.i.l.bf16 %v5166_v48  ;;  %4648 = vmatpush3.bf16.msra.mxu0 %v6840_v44  ;;  %v5178_v22 = vunpack.i.h.bf16 %v5176_v36 }
 0x195   : > { %v1325_v32 = vsel %vm257_vm0, %v621_v63, %v5167_v11  ;;  %v1295_v42 = vsel %vm257_vm0, %v5504_v12, %v5178_v22  ;;  %v3178_v11 = vld [vmem:[%s8089_s3 + $0x28] sm:$0xff]  ;;  %v3179_v63 = vld [vmem:[%s8089_s3 + $0x30] sm:$0xff]  ;;  %v3188_v22 = vld [vmem:[%s8089_s3 + $0x78] sm:$0xff] }
 0x196   : > { %1894 = vmatmul.mubr.f32.gmra.mrb[40].mxu0 %v1285_v7  ;;  %v3243_v7 = vld [vmem:[%s8089_s3 + $0x230] sm:$0xff] }
 0x197   : > { %1898 = vmatprep.mubr.f32.mxu0 %v1318_v38  ;;  %v5168_v38 = vunpack.i.h.bf16 %v5166_v48  ;;  %v6852_v56 = vpack.c.bf16 %v3244_v2, %v3243_v7  ;;  %v3180_v7 = vld [vmem:[%s8089_s3 + $0x38] sm:$0xff] }
 0x198   : > { %v4551_v2 = vpack.c.bf16 %v3180_v7, %v3179_v63 }
 0x199   : > { %v6793_v16 = vpop.f32.mrb[0].mxu1  ;;  %8236 = vst [vmem:[#allocation37_spill] sm:$0xff] %v6852_v56  ;;  %4650 = vmatprep.subr.bf16.mxu0 %v6852_v56 }
 0x19a   : > { %1899 = vmatmul.mubr.f32.gmra.mrb[42].mxu0 %v1286_v21  ;;  %v6795_v39 = vpop.f32.mrb[1].mxu1  ;;  %v556_v21 = vld [vmem:[#allocation2 + $0x169] sm:$0xff] }
 0x19b   : > { %1903 = vmatprep.mubr.f32.mxu0 %v1319_v8  ;;  %v622_v8 = vld [vmem:[#allocation2 + $0x188] sm:$0xff]  ;;  %v1293_v24 = vsel %vm257_vm0, %v556_v21, %v5168_v38  ;;  %4652 = vmatpush3.bf16.msra.mxu0 %v6852_v56  ;;  %v3181_v38 = vld [vmem:[%s8089_s3 + $0x40] sm:$0xff] }
 0x19c   : > { %v1326_v57 = vsel %vm257_vm0, %v622_v8, %v5172_v9  ;;  %v3184_v8 = vld [vmem:[%s8089_s3 + $0x58] sm:$0xff] }
 0x19d   : > { %v6801_v18 = vpop.f32.mrb[2].mxu1 }
 0x19e   : > { %1904 = vmatmul.mubr.f32.gmra.mrb[44].mxu0 %v1287_v34  ;;  %v6803_v40 = vpop.f32.mrb[3].mxu1  ;;  %v5177_v34 = vunpack.i.l.bf16 %v5176_v36  ;;  %v3183_v36 = vld [vmem:[%s8089_s3 + $0x50] sm:$0xff] }
 0x19f   : > { %1908 = vmatprep.mubr.f32.mxu0 %v1320_v53  ;;  %v557_v53 = vld [vmem:[#allocation2 + $0x171] sm:$0xff] }
 0x1a0   : > { %v1294_v52 = vsel %vm257_vm0, %v557_v53, %v5173_v51  ;;  %v1327_v41 = vsel %vm257_vm0, %v623_v17, %v5177_v34  ;;  %v4557_v51 = vpack.c.bf16 %v3184_v8, %v3183_v36  ;;  %v3186_v34 = vld [vmem:[%s8089_s3 + $0x68] sm:$0xff]  ;;  %v3187_v17 = vld [vmem:[%s8089_s3 + $0x70] sm:$0xff]  ;;  %v7016_v36 = vld [vmem:[%s8088_s2] ss:$0 sm:$0xff] }
 0x1a1   : > { %v6827_v43 = vpop.f32.mrb[4].mxu1  ;;  %v3201_v8 = vld [vmem:[%s8089_s3 + $0xe0] sm:$0xff] }
 0x1a2   : > { %1909 = vmatmul.mubr.f32.gmra.mrb[46].mxu0 %v1288_v35  ;;  %v6830_v20 = vpop.f32.mrb[5].mxu1  ;;  %v5182_v35 = vunpack.i.l.bf16 %v5181_v29 }
 0x1a3   : > { %1913 = vmatprep.mubr.f32.mxu0 %v1321_v37  ;;  %v624_v37 = vld [vmem:[#allocation2 + $0x1a0] sm:$0xff] }
 0x1a4   : > { %v1328_v55 = vsel %vm257_vm0, %v624_v37, %v5182_v35  ;;  %v3189_v35 = vld [vmem:[%s8089_s3 + $0x80] sm:$0xff] }
 0x1a5   : > { %v6855_v33 = vpop.f32.mrb[6].mxu1 }
 0x1a6   : > { %1914 = vmatmul.mubr.f32.gmra.mrb[48].mxu0 %v1289_v14  ;;  %v6858_v46 = vpop.f32.mrb[7].mxu1  ;;  %v5505_v14 = vld [vmem:[#allocation2 + $0x189] sm:$0xff] }
 0x1a7   : > { %1918 = vmatprep.mubr.f32.mxu0 %v1322_v59  ;;  %v1296_v10 = vsel %vm257_vm0, %v5505_v14, %v5183_v30 }
 0x1a9   : > { %v6865_v15 = vpop.f32.mrb[8].mxu1 }
 0x1aa   : > { %1919 = vmatmul.mubr.f32.gmra.mrb[50].mxu0 %v1290_v47  ;;  %v6867_v25 = vpop.f32.mrb[9].mxu1 }
 0x1ab   : > { %1923 = vmatprep.mubr.f32.mxu0 %v1323_v27  ;;  %v3174_v27 = vld [vmem:[%s8089_s3 + $0x8] sm:$0xff] }
 0x1ac   : > { %v4542_v62 = vpack.c.bf16 %v3174_v27, %v3173_v60  ;;  %v3194_v60 = vld [vmem:[%s8089_s3 + $0xa8] sm:$0xff] }
 0x1ad   : > { %v6872_v59 = vpop.f32.mrb[10].mxu1 }
 0x1ae   : > { %1924 = vmatmul.mubr.f32.gmra.mrb[52].mxu0 %v1291_v23  ;;  %v6874_v61 = vpop.f32.mrb[11].mxu1  ;;  %4543 = vmatpush1.bf16.msra.mxu1 %v4542_v62  ;;  %v3177_v23 = vld [vmem:[%s8089_s3 + $0x20] sm:$0xff] }
 0x1af   : > { %1928 = vmatprep.mubr.f32.mxu0 %v1324_v26  ;;  %4544 = vmatprep.subr.bf16.mxu1 %v8198_v58  ;;  %v4548_v26 = vpack.c.bf16 %v3178_v11, %v3177_v23  ;;  %v3197_v11 = vld [vmem:[%s8089_s3 + $0xc0] sm:$0xff] }
 0x1b1   : > { %v6876_v49 = vpop.f32.mrb[12].mxu1 }
 0x1b2   : > { %1929 = vmatmul.mubr.f32.gmra.mrb[54].mxu0 %v1292_v45  ;;  %v6878_v13 = vpop.f32.mrb[13].mxu1  ;;  %4546 = vmatpush1.bf16.msra.mxu1 %v4545_v4  ;;  %v3182_v45 = vld [vmem:[%s8089_s3 + $0x48] sm:$0xff]  ;;  %v3196_v4 = vld [vmem:[%s8089_s3 + $0xb8] sm:$0xff] }
 0x1b3   : > { %1933 = vmatprep.mubr.f32.mxu0 %v1325_v32  ;;  %4547 = vmatprep.subr.bf16.mxu1 %v8198_v58  ;;  %v4554_v9 = vpack.c.bf16 %v3182_v45, %v3181_v38  ;;  %v4575_v23 = vpack.c.bf16 %v3196_v4, %v3195_v28  ;;  %v3199_v38 = vld [vmem:[%s8089_s3 + $0xd0] sm:$0xff]  ;;  %v3200_v45 = vld [vmem:[%s8089_s3 + $0xd8] sm:$0xff] }
 0x1b5   : > { %v6880_v1 = vpop.f32.mrb[14].mxu1 }
 0x1b6   : > { %1934 = vmatmul.mubr.f32.gmra.mrb[56].mxu0 %v1293_v24  ;;  %v6882_v5 = vpop.f32.mrb[15].mxu1  ;;  %4549 = vmatpush1.bf16.msra.mxu1 %v4548_v26  ;;  %v3185_v24 = vld [vmem:[%s8089_s3 + $0x60] sm:$0xff]  ;;  %v3198_v26 = vld [vmem:[%s8089_s3 + $0xc8] sm:$0xff] }
 0x1b7   : > { %1938 = vmatprep.mubr.f32.mxu0 %v1326_v57  ;;  %4550 = vmatprep.subr.bf16.mxu1 %v8198_v58  ;;  %v4560_v57 = vpack.c.bf16 %v3186_v34, %v3185_v24  ;;  %v4578_v63 = vpack.c.bf16 %v3198_v26, %v3197_v11  ;;  %v2276_v11 = vld [vmem:[#allocation3 + $0x1] sm:$0xff] }
 0x1b9   : > { %v6884_v6 = vpop.f32.mrb[16].mxu1 }
 0x1ba   : > { %1939 = vmatmul.mubr.f32.gmra.mrb[58].mxu0 %v1294_v52  ;;  %v6886_v47 = vpop.f32.mrb[17].mxu1  ;;  %4552 = vmatpush1.bf16.msra.mxu1 %v4551_v2  ;;  %v4563_v52 = vpack.c.bf16 %v3188_v22, %v3187_v17 }
 0x1bb   : > { %1943 = vmatprep.mubr.f32.mxu0 %v1327_v41  ;;  %4553 = vmatprep.subr.bf16.mxu1 %v8198_v58  ;;  %v3190_v41 = vld [vmem:[%s8089_s3 + $0x88] sm:$0xff] }
 0x1bc   : > { %v4566_v37 = vpack.c.bf16 %v3190_v41, %v3189_v35  ;;  %v3204_v35 = vld [vmem:[%s8089_s3 + $0xf8] sm:$0xff] }
 0x1bd   : > { %v6894_v48 = vpop.f32.mrb[18].mxu1 }
 0x1be   : > { %1944 = vmatmul.mubr.f32.gmra.mrb[60].mxu0 %v1295_v42  ;;  %v6896_v54 = vpop.f32.mrb[19].mxu1  ;;  %4555 = vmatpush1.bf16.msra.mxu1 %v4554_v9  ;;  %v3191_v42 = vld [vmem:[%s8089_s3 + $0x90] sm:$0xff]  ;;  %v4581_v9 = vpack.c.bf16 %v3200_v45, %v3199_v38 }
 0x1bf   : > { %1948 = vmatprep.mubr.f32.mxu0 %v1328_v55  ;;  %4556 = vmatprep.subr.bf16.mxu1 %v8198_v58  ;;  %v3192_v55 = vld [vmem:[%s8089_s3 + $0x98] sm:$0xff] }
 0x1c0   : > { %v4569_v14 = vpack.c.bf16 %v3192_v55, %v3191_v42 }
 0x1c1   : > { %v6912_v0 = vpop.f32.mrb[20].mxu1 }
 0x1c2   : > { %1949 = vmatmul.mubr.f32.gmra.mrb[62].mxu0 %v1296_v10  ;;  %v6914_v50 = vpop.f32.mrb[21].mxu1  ;;  %4558 = vmatpush1.bf16.msra.mxu1 %v4557_v51  ;;  %v3193_v10 = vld [vmem:[%s8089_s3 + $0xa0] sm:$0xff]  ;;  %v3202_v51 = vld [vmem:[%s8089_s3 + $0xe8] sm:$0xff] }
 0x1c3   : > { %4559 = vmatprep.subr.bf16.mxu1 %v8198_v58  ;;  %v4572_v27 = vpack.c.bf16 %v3194_v60, %v3193_v10  ;;  %v4584_v34 = vpack.c.bf16 %v3202_v51, %v3201_v8  ;;  %v2277_v51 = vld [vmem:[#allocation3 + $0x9] sm:$0xff] }
 0x1c5   : > { %v6930_v32 = vpop.f32.mrb[22].mxu1 }
 0x1c6   : > { %v6932_v21 = vpop.f32.mrb[23].mxu1  ;;  %4561 = vmatpush1.bf16.msra.mxu1 %v4560_v57 }
 0x1c7   : > { %4562 = vmatprep.subr.bf16.mxu1 %v8198_v58 }
 0x1c9   : > { %v6948_v53 = vpop.f32.mrb[24].mxu1 }
 0x1ca   : > { %v6950_v29 = vpop.f32.mrb[25].mxu1  ;;  %4564 = vmatpush1.bf16.msra.mxu1 %v4563_v52  ;;  %v3203_v52 = vld [vmem:[%s8089_s3 + $0xf0] sm:$0xff] }
 0x1cb   : > { %4565 = vmatprep.subr.bf16.mxu1 %v8198_v58 }
 0x1cd   : > { %v6966_v30 = vpop.f32.mrb[26].mxu1 }
 0x1ce   : > { %4567 = vmatpush1.bf16.msra.mxu1 %v4566_v37  ;;  %v6968_v12 = vpop.f32.mrb[27].mxu1  ;;  %v4587_v37 = vpack.c.bf16 %v3204_v35, %v3203_v52 }
 0x1cf   : > { %4568 = vmatprep.subr.bf16.mxu1 %v8198_v58 }
 0x1d1   : > { %v6984_v62 = vpop.f32.mrb[28].mxu1 }
 0x1d2   : > { %4570 = vmatpush1.bf16.msra.mxu1 %v4569_v14  ;;  %v6986_v19 = vpop.f32.mrb[29].mxu1 }
 0x1d3   : > { %4571 = vmatprep.subr.bf16.mxu1 %v8198_v58 }
 0x1d6   : > { %4573 = vmatpush1.bf16.msra.mxu1 %v4572_v27 }
 0x1d7   : > { %4574 = vmatprep.subr.bf16.mxu1 %v8198_v58  ;;  %v7002_v7 = vpop.f32.mrb[30].mxu1 }
 0x1d8   : > { %v7004_v2 = vpop.f32.mrb[31].mxu1 }
 0x1da   : > { %4576 = vmatpush1.bf16.msra.mxu1 %v4575_v23 }
 0x1db   : > { %4577 = vmatprep.subr.bf16.mxu1 %v8198_v58 }
 0x1de   : > { %4579 = vmatpush1.bf16.msra.mxu1 %v4578_v63 }
 0x1df   : > { %4580 = vmatprep.subr.bf16.mxu1 %v8198_v58 }
 0x1e2   : > { %4582 = vmatpush1.bf16.msra.mxu1 %v4581_v9 }
 0x1e3   : > { %4583 = vmatprep.subr.bf16.mxu1 %v8198_v58 }
 0x1e6   : > { %4585 = vmatpush1.bf16.msra.mxu1 %v4584_v34 }
 0x1e7   : > { %4586 = vmatprep.subr.bf16.mxu1 %v8198_v58 }
 0x1ea   : > { %4588 = vmatpush1.bf16.msra.mxu1 %v4587_v37 }
 0x1eb   : > { %4589 = vmatprep.subr.bf16.mxu1 %v8198_v58 }
 0x219   : > { %v1795_v24 = vpop.f32.mrb[0].mxu0 }
 0x21a   : > { %v4661_v57 = vadd.f32 %v7016_v36, %v1795_v24  ;;  %v1797_v17 = vpop.f32.mrb[1].mxu0 }
 0x21c   : > { %v2021_v22 = vadd.f32 %v4661_v57, %v6795_v39 }
 0x21d   : > { %v1800_v41 = vpop.f32.mrb[2].mxu0 }
 0x21e   : > { %v2179_v42 = vmax.f32 %v2021_v22, 0.0  ;;  %v4662_v55 = vadd.f32 %v7016_v36, %v1800_v41  ;;  %v1802_v14 = vpop.f32.mrb[3].mxu0 }
 0x220   : > { %2212 = vst.msk [vmem:[#allocation3 + $0x19] sm:$0xff] %vm257_vm0, %v2179_v42  ;;  %v2026_v39 = vadd.f32 %v4662_v55, %v6793_v16 }
 0x221   : > { %v1805_v10 = vpop.f32.mrb[4].mxu0 }
 0x222   : > { %v2180_v60 = vmax.f32 %v2026_v39, 0.0  ;;  %v4663_v27 = vadd.f32 %v7016_v36, %v1805_v10  ;;  %v1807_v28 = vpop.f32.mrb[5].mxu0 }
 0x224   : > { %2213 = vst.msk [vmem:[#allocation3 + $0x21] sm:$0xff] %vm257_vm0, %v2180_v60  ;;  %v2031_v4 = vadd.f32 %v4663_v27, %v6803_v40 }
 0x225   : > { %v1810_v23 = vpop.f32.mrb[6].mxu0 }
 0x226   : > { %v2181_v26 = vmax.f32 %v2031_v4, 0.0  ;;  %v4664_v63 = vadd.f32 %v7016_v36, %v1810_v23  ;;  %v1812_v38 = vpop.f32.mrb[7].mxu0 }
 0x227   : > { %v7042_v45 = vld [vmem:[#allocation3 + $0x18] sm:$0xff] }
 0x228   : > { %2214 = vst.msk [vmem:[#allocation3 + $0x31] sm:$0xff] %vm257_vm0, %v2181_v26  ;;  %v2036_v16 = vadd.f32 %v4664_v63, %v6801_v18  ;;  %v5184_v9 = vpack.i.bf16 %v2276_v11, %v7042_v45  ;;  %v2278_v37 = vld [vmem:[#allocation3 + $0x19] sm:$0xff] }
 0x229   : > { %v1815_v8 = vpop.f32.mrb[8].mxu0 }
 0x22a   : > { %v2182_v24 = vmax.f32 %v2036_v16, 0.0  ;;  %v4665_v34 = vadd.f32 %v7016_v36, %v1815_v8  ;;  %v1817_v40 = vpop.f32.mrb[9].mxu0  ;;  %5185 = vrot.lane.b32.xlu0 %v5184_v9, %s5516_s22 }
 0x22b   : > { %v7049_v57 = vld [vmem:[#allocation3 + $0x20] sm:$0xff] }
 0x22c   : > { %2215 = vst.msk [vmem:[#allocation3 + $0x39] sm:$0xff] %vm257_vm0, %v2182_v24  ;;  %v2041_v17 = vadd.f32 %v4665_v34, %v6830_v20  ;;  %v5189_v22 = vpack.i.bf16 %v2277_v51, %v7049_v57  ;;  %v2279_v27 = vld [vmem:[#allocation3 + $0x21] sm:$0xff] }
 0x22d   : > { %v1820_v52 = vpop.f32.mrb[10].mxu0 }
 0x22e   : > { %v2183_v18 = vmax.f32 %v2041_v17, 0.0  ;;  %v4666_v35 = vadd.f32 %v7016_v36, %v1820_v52  ;;  %v1822_v41 = vpop.f32.mrb[11].mxu0  ;;  %5190 = vrot.lane.b32.xlu1 %v5189_v22, %s5516_s22 }
 0x22f   : > { %v7056_v42 = vld [vmem:[#allocation3 + $0x30] sm:$0xff] }
 0x230   : > { %2216 = vst.msk [vmem:[#allocation3 + $0x49] sm:$0xff] %vm257_vm0, %v2183_v18  ;;  %v2046_v55 = vadd.f32 %v4666_v35, %v6827_v43  ;;  %v5194_v14 = vpack.i.bf16 %v2278_v37, %v7056_v42  ;;  %v7078_v9 = vld [vmem:[#allocation3 + $0x31] sm:$0xff] }
 0x231   : > { %v1825_v39 = vpop.f32.mrb[12].mxu0 }
 0x232   : > { %v2184_v20 = vmax.f32 %v2046_v55, 0.0  ;;  %v4667_v10 = vadd.f32 %v7016_v36, %v1825_v39  ;;  %v1827_v60 = vpop.f32.mrb[13].mxu0  ;;  %5195 = vrot.lane.b32.xlu0 %v5194_v14, %s5516_s22 }
 0x233   : > { %v7063_v28 = vld [vmem:[#allocation3 + $0x32] sm:$0xff]  ;;  %v7065_v4 = vld [vmem:[#allocation3 + $0x3a] sm:$0xff] }
 0x234   : > { %v7067_v23 = vld [vmem:[#allocation3 + $0x38] sm:$0xff]  ;;  %2217 = vst.msk [vmem:[#allocation3 + $0x51] sm:$0xff] %vm257_vm0, %v2184_v20  ;;  %v2051_v43 = vadd.f32 %v4667_v10, %v6858_v46  ;;  %4381 = vmatprep.mubr.msk.f32.mxu0 %vm257_vm0, %v7063_v28 }
 0x235   : > { %v5199_v11 = vpack.i.bf16 %v2279_v27, %v7067_v23  ;;  %v1830_v26 = vpop.f32.mrb[14].mxu0  ;;  %4382 = vmatmul.mubr.msk.f32.vlgmr.msra.gmra.mrb[64].mxu0 %vm257_vm0, %v7065_v4  ;;  %v7088_v22 = vld [vmem:[#allocation3 + $0x39] sm:$0xff] }
 0x236   : > { %v2185_v63 = vmax.f32 %v2051_v43, 0.0  ;;  %v4668_v38 = vadd.f32 %v7016_v36, %v1830_v26  ;;  %v1832_v16 = vpop.f32.mrb[15].mxu0 }
 0x237   : > { %5200 = vrot.lane.b32.xlu1 %v5199_v11, %s5516_s22  ;;  %v7080_v8 = vld [vmem:[#allocation3 + $0x48] sm:$0xff] }
 0x238   : > { %2218 = vst.msk [vmem:[#allocation3 + $0x61] sm:$0xff] %vm257_vm0, %v2185_v63  ;;  %v2056_v46 = vadd.f32 %v4668_v38, %v6855_v33  ;;  %v5204_v51 = vpack.i.bf16 %v7078_v9, %v7080_v8  ;;  %v7106_v20 = vld [vmem:[#allocation3 + $0x49] sm:$0xff] }
 0x239   : > { %v1835_v24 = vpop.f32.mrb[16].mxu0 }
 0x23a   : > { %v2186_v34 = vmax.f32 %v2056_v46, 0.0  ;;  %v4669_v40 = vadd.f32 %v7016_v36, %v1835_v24  ;;  %v1837_v17 = vpop.f32.mrb[17].mxu0  ;;  %5205 = vrot.lane.b32.xlu0 %v5204_v51, %s5516_s22 }
 0x23b   : > { %v7090_v52 = vld [vmem:[#allocation3 + $0x4a] sm:$0xff]  ;;  %v7092_v18 = vld [vmem:[#allocation3 + $0x52] sm:$0xff] }
 0x23c   : > { %v7094_v35 = vld [vmem:[#allocation3 + $0x50] sm:$0xff]  ;;  %2219 = vst.msk [vmem:[#allocation3 + $0x69] sm:$0xff] %vm257_vm0, %v2186_v34  ;;  %v2061_v33 = vadd.f32 %v4669_v40, %v6867_v25  ;;  %4384 = vmatprep.mubr.msk.f32.mxu0 %vm257_vm0, %v7090_v52 }
 0x23d   : > { %v5209_v41 = vpack.i.bf16 %v7088_v22, %v7094_v35  ;;  %v1840_v37 = vpop.f32.mrb[18].mxu0  ;;  %4385 = vmatmul.mubr.msk.f32.gmra.mrb[66].mxu0 %vm257_vm0, %v7092_v18  ;;  %v7113_v63 = vld [vmem:[#allocation3 + $0x51] sm:$0xff] }
 0x23e   : > { %v2187_v55 = vmax.f32 %v2061_v33, 0.0  ;;  %v4670_v14 = vadd.f32 %v7016_v36, %v1840_v37  ;;  %v1842_v39 = vpop.f32.mrb[19].mxu0 }
 0x23f   : > { %5210 = vrot.lane.b32.xlu1 %v5209_v41, %s5516_s22  ;;  %v2346_v10 = vld [vmem:[#allocation3 + $0x60] sm:$0xff] }
 0x240   : > { %2220 = vst.msk [vmem:[#allocation3 + $0x79] sm:$0xff] %vm257_vm0, %v2187_v55  ;;  %v2066_v25 = vadd.f32 %v4670_v14, %v6865_v15  ;;  %v5214_v60 = vpack.i.bf16 %v7106_v20, %v2346_v10  ;;  %v7128_v33 = vld [vmem:[#allocation3 + $0x61] sm:$0xff] }
 0x241   : > { %v1845_v27 = vpop.f32.mrb[20].mxu0 }
 0x242   : > { %v2188_v43 = vmax.f32 %v2066_v25, 0.0  ;;  %v4671_v11 = vadd.f32 %v7016_v36, %v1845_v27  ;;  %v1847_v26 = vpop.f32.mrb[21].mxu0  ;;  %5215 = vrot.lane.b32.xlu0 %v5214_v60, %s5516_s22 }
 0x243   : > { %v7115_v38 = vld [vmem:[#allocation3 + $0x62] sm:$0xff]  ;;  %v7117_v16 = vld [vmem:[#allocation3 + $0x6a] sm:$0xff] }
 0x244   : > { %v2347_v46 = vld [vmem:[#allocation3 + $0x68] sm:$0xff]  ;;  %2221 = vst.msk [vmem:[#allocation3 + $0x81] sm:$0xff] %vm257_vm0, %v2188_v43  ;;  %v2071_v15 = vadd.f32 %v4671_v11, %v6874_v61  ;;  %4387 = vmatprep.mubr.msk.f32.mxu0 %vm257_vm0, %v7115_v38 }
 0x245   : > { %v5219_v51 = vpack.i.bf16 %v7113_v63, %v2347_v46  ;;  %v1850_v24 = vpop.f32.mrb[22].mxu0  ;;  %4388 = vmatmul.mubr.msk.f32.gmra.mrb[68].mxu0 %vm257_vm0, %v7117_v16  ;;  %v7135_v25 = vld [vmem:[#allocation3 + $0x69] sm:$0xff] }
 0x246   : > { %v2189_v34 = vmax.f32 %v2071_v15, 0.0  ;;  %v4672_v40 = vadd.f32 %v7016_v36, %v1850_v24  ;;  %v1852_v17 = vpop.f32.mrb[23].mxu0 }
 0x247   : > { %5220 = vrot.lane.b32.xlu1 %v5219_v51, %s5516_s22  ;;  %v2348_v41 = vld [vmem:[#allocation3 + $0x78] sm:$0xff] }
 0x248   : > { %2222 = vst.msk [vmem:[#allocation3 + $0x91] sm:$0xff] %vm257_vm0, %v2189_v34  ;;  %v2076_v61 = vadd.f32 %v4672_v40, %v6872_v59  ;;  %v5224_v37 = vpack.i.bf16 %v7128_v33, %v2348_v41 }
 0x249   : > { %v1855_v55 = vpop.f32.mrb[24].mxu0 }
 0x24a   : > { %v2190_v14 = vmax.f32 %v2076_v61, 0.0  ;;  %v4673_v39 = vadd.f32 %v7016_v36, %v1855_v55  ;;  %v1857_v10 = vpop.f32.mrb[25].mxu0  ;;  %5225 = vrot.lane.b32.xlu0 %v5224_v37, %s5516_s22 }
 0x24b   : > { %v7137_v60 = vld [vmem:[#allocation3 + $0x7a] sm:$0xff]  ;;  %v7139_v27 = vld [vmem:[#allocation3 + $0x82] sm:$0xff] }
 0x24c   : > { %v2349_v43 = vld [vmem:[#allocation3 + $0x80] sm:$0xff]  ;;  %2223 = vst.msk [vmem:[#allocation3 + $0x99] sm:$0xff] %vm257_vm0, %v2190_v14  ;;  %v2081_v59 = vadd.f32 %v4673_v39, %v6878_v13  ;;  %4390 = vmatprep.mubr.msk.f32.mxu0 %vm257_vm0, %v7137_v60 }
 0x24d   : > { %v5229_v11 = vpack.i.bf16 %v7135_v25, %v2349_v43  ;;  %v7146_v26 = vld [vmem:[#allocation3 + $0x81] sm:$0xff]  ;;  %v1860_v46 = vpop.f32.mrb[26].mxu0  ;;  %4391 = vmatmul.mubr.msk.f32.gmra.mrb[70].mxu0 %vm257_vm0, %v7139_v27  ;;  %v7154_v13 = vld [vmem:[#allocation3 + $0x79] sm:$0xff] }
 0x24e   : > { %v2191_v51 = vmax.f32 %v2081_v59, 0.0  ;;  %v4674_v24 = vadd.f32 %v7016_v36, %v1860_v46  ;;  %v1862_v34 = vpop.f32.mrb[27].mxu0 }
 0x24f   : > { %5230 = vrot.lane.b32.xlu1 %v5229_v11, %s5516_s22  ;;  %v2350_v40 = vld [vmem:[#allocation3 + $0x90] sm:$0xff] }
 0x250   : > { %v7156_v17 = vld [vmem:[#allocation3 + $0x91] sm:$0xff]  ;;  %2224 = vst.msk [vmem:[#allocation3 + $0xa9] sm:$0xff] %vm257_vm0, %v2191_v51  ;;  %v2086_v41 = vadd.f32 %v4674_v24, %v6876_v49  ;;  %v5234_v61 = vpack.i.bf16 %v7154_v13, %v2350_v40 }
 0x251   : > { %v1865_v55 = vpop.f32.mrb[28].mxu0 }
 0x252   : > { %v2192_v14 = vmax.f32 %v2086_v41, 0.0  ;;  %v4675_v39 = vadd.f32 %v7016_v36, %v1865_v55  ;;  %v1867_v10 = vpop.f32.mrb[29].mxu0  ;;  %5235 = vrot.lane.b32.xlu0 %v5234_v61, %s5516_s22 }
 0x253   : > { %v7165_v43 = vld [vmem:[#allocation3 + $0x92] sm:$0xff]  ;;  %v7167_v59 = vld [vmem:[#allocation3 + $0x9a] sm:$0xff] }
 0x254   : > { %v2351_v11 = vld [vmem:[#allocation3 + $0x98] sm:$0xff]  ;;  %2225 = vst.msk [vmem:[#allocation3 + $0xb1] sm:$0xff] %vm257_vm0, %v2192_v14  ;;  %v2091_v49 = vadd.f32 %v4675_v39, %v6882_v5  ;;  %4393 = vmatprep.mubr.msk.f32.mxu0 %vm257_vm0, %v7165_v43 }
 0x255   : > { %v5239_v46 = vpack.i.bf16 %v7146_v26, %v2351_v11  ;;  %v7174_v51 = vld [vmem:[#allocation3 + $0x99] sm:$0xff]  ;;  %v1870_v24 = vpop.f32.mrb[30].mxu0  ;;  %4394 = vmatmul.mubr.msk.f32.gmra.mrb[72].mxu0 %vm257_vm0, %v7167_v59 }
 0x256   : > { %v2193_v40 = vmax.f32 %v2091_v49, 0.0  ;;  %v4676_v41 = vadd.f32 %v7016_v36, %v1870_v24  ;;  %v1872_v61 = vpop.f32.mrb[31].mxu0 }
 0x257   : > { %5240 = vrot.lane.b32.xlu1 %v5239_v46, %s5516_s22  ;;  %v2352_v5 = vld [vmem:[#allocation3 + $0xa8] sm:$0xff] }
 0x258   : > { %v7182_v55 = vld [vmem:[#allocation3 + $0xa9] sm:$0xff]  ;;  %2226 = vst.msk [vmem:[#allocation3 + $0xc1] sm:$0xff] %vm257_vm0, %v2193_v40  ;;  %v2096_v14 = vadd.f32 %v4676_v41, %v6880_v1  ;;  %v5244_v39 = vpack.i.bf16 %v7156_v17, %v2352_v5 }
 0x259   : > { %v1875_v11 = vpop.f32.mrb[32].mxu0 }
 0x25a   : > { %v2194_v34 = vmax.f32 %v2096_v14, 0.0  ;;  %v4677_v49 = vadd.f32 %v7016_v36, %v1875_v11  ;;  %v1877_v24 = vpop.f32.mrb[33].mxu0  ;;  %5245 = vrot.lane.b32.xlu0 %v5244_v39, %s5516_s22 }
 0x25b   : > { %v7191_v46 = vld [vmem:[#allocation3 + $0xaa] sm:$0xff]  ;;  %v7193_v61 = vld [vmem:[#allocation3 + $0xb2] sm:$0xff] }
 0x25c   : > { %v2353_v37 = vld [vmem:[#allocation3 + $0xb0] sm:$0xff]  ;;  %2227 = vst.msk [vmem:[#allocation3 + $0xc9] sm:$0xff] %vm257_vm0, %v2194_v34  ;;  %v2101_v1 = vadd.f32 %v4677_v49, %v6886_v47  ;;  %4396 = vmatprep.mubr.msk.f32.mxu0 %vm257_vm0, %v7191_v46 }
 0x25d   : > { %v5249_v40 = vpack.i.bf16 %v7174_v51, %v2353_v37  ;;  %v7200_v41 = vld [vmem:[#allocation3 + $0xb1] sm:$0xff]  ;;  %v1880_v5 = vpop.f32.mrb[34].mxu0  ;;  %4397 = vmatmul.mubr.msk.f32.gmra.mrb[74].mxu0 %vm257_vm0, %v7193_v61 }
 0x25e   : > { %v2195_v39 = vmax.f32 %v2101_v1, 0.0  ;;  %v4678_v11 = vadd.f32 %v7016_v36, %v1880_v5  ;;  %v1882_v34 = vpop.f32.mrb[35].mxu0 }
 0x25f   : > { %5250 = vrot.lane.b32.xlu1 %v5249_v40, %s5516_s22  ;;  %v2354_v47 = vld [vmem:[#allocation3 + $0xc0] sm:$0xff] }
 0x260   : > { %v7208_v49 = vld [vmem:[#allocation3 + $0xc1] sm:$0xff]  ;;  %2228 = vst.msk [vmem:[#allocation3 + $0xd9] sm:$0xff] %vm257_vm0, %v2195_v39  ;;  %v2106_v37 = vadd.f32 %v4678_v11, %v6884_v6  ;;  %v5254_v24 = vpack.i.bf16 %v7182_v55, %v2354_v47 }
 0x261   : > { %v1885_v15 = vpop.f32.mrb[36].mxu0 }
 0x262   : > { %v2196_v14 = vmax.f32 %v2106_v37, 0.0  ;;  %v4679_v1 = vadd.f32 %v7016_v36, %v1885_v15  ;;  %v1887_v5 = vpop.f32.mrb[37].mxu0  ;;  %5255 = vrot.lane.b32.xlu0 %v5254_v24, %s5516_s22 }
 0x263   : > { %v7217_v40 = vld [vmem:[#allocation3 + $0xc2] sm:$0xff]  ;;  %v7219_v34 = vld [vmem:[#allocation3 + $0xca] sm:$0xff] }
 0x264   : > { %8237 = vst [vmem:[#allocation39_spill] sm:$0xff] %v7219_v34  ;;  %v2355_v56 = vld [vmem:[#allocation3 + $0xc8] sm:$0xff]  ;;  %2229 = vst.msk [vmem:[#allocation3 + $0xe1] sm:$0xff] %vm257_vm0, %v2196_v14  ;;  %v2111_v6 = vadd.f32 %v4679_v1, %v6896_v54  ;;  %4399 = vmatprep.mubr.msk.f32.mxu0 %vm257_vm0, %v7217_v40 }
 0x265   : > { %v5259_v39 = vpack.i.bf16 %v7200_v41, %v2355_v56  ;;  %v7226_v11 = vld [vmem:[#allocation3 + $0xc9] sm:$0xff]  ;;  %v1890_v15 = vpop.f32.mrb[38].mxu0  ;;  %4400 = vmatmul.mubr.msk.f32.gmra.mrb[76].mxu0 %vm257_vm0, %v7219_v34 }
 0x266   : > { %v2197_v37 = vmax.f32 %v2111_v6, 0.0  ;;  %v4680_v24 = vadd.f32 %v7016_v36, %v1890_v15  ;;  %v1892_v14 = vpop.f32.mrb[39].mxu0 }
 0x267   : > { %5260 = vrot.lane.b32.xlu1 %v5259_v39, %s5516_s22  ;;  %v2356_v54 = vld [vmem:[#allocation3 + $0xd8] sm:$0xff] }
 0x268   : > { %v7234_v1 = vld [vmem:[#allocation3 + $0xd9] sm:$0xff]  ;;  %2230 = vst.msk [vmem:[#allocation3 + $0xf1] sm:$0xff] %vm257_vm0, %v2197_v37  ;;  %v2116_v56 = vadd.f32 %v4680_v24, %v6894_v48  ;;  %v5264_v5 = vpack.i.bf16 %v7208_v49, %v2356_v54 }
 0x269   : > { %v1895_v44 = vpop.f32.mrb[40].mxu0 }
 0x26a   : > { %v2198_v47 = vmax.f32 %v2116_v56, 0.0  ;;  %v4681_v6 = vadd.f32 %v7016_v36, %v1895_v44  ;;  %v1897_v15 = vpop.f32.mrb[41].mxu0  ;;  %5265 = vrot.lane.b32.xlu0 %v5264_v5, %s5516_s22 }
 0x26b   : > { %v7243_v39 = vld [vmem:[#allocation3 + $0xda] sm:$0xff]  ;;  %v7245_v14 = vld [vmem:[#allocation3 + $0xe2] sm:$0xff] }
 0x26c   : > { %8238 = vst [vmem:[#allocation40_spill] sm:$0xff] %v7243_v39  ;;  %8239 = vst [vmem:[#allocation42_spill] sm:$0xff] %v7245_v14  ;;  %v2357_v31 = vld [vmem:[#allocation3 + $0xe0] sm:$0xff]  ;;  %v2121_v48 = vadd.f32 %v4681_v6, %v6914_v50  ;;  %4402 = vmatprep.mubr.msk.f32.mxu0 %vm257_vm0, %v7243_v39 }
 0x26d   : > { %2231 = vst.msk [vmem:[#allocation3 + $0xf9] sm:$0xff] %vm257_vm0, %v2198_v47  ;;  %v5269_v37 = vpack.i.bf16 %v7226_v11, %v2357_v31  ;;  %v7252_v24 = vld [vmem:[#allocation3 + $0xe1] sm:$0xff]  ;;  %v1900_v44 = vpop.f32.mrb[42].mxu0  ;;  %4403 = vmatmul.mubr.msk.f32.gmra.mrb[78].mxu0 %vm257_vm0, %v7245_v14 }
 0x26e   : > { %v2199_v56 = vmax.f32 %v2121_v48, 0.0  ;;  %v4682_v5 = vadd.f32 %v7016_v36, %v1900_v44  ;;  %v1902_v47 = vpop.f32.mrb[43].mxu0 }
 0x26f   : > { %5270 = vrot.lane.b32.xlu1 %v5269_v37, %s5516_s22  ;;  %v2358_v50 = vld [vmem:[#allocation3 + $0xf0] sm:$0xff] }
 0x270   : > { %v7260_v6 = vld [vmem:[#allocation3 + $0xf1] sm:$0xff]  ;;  %2232 = vst.msk [vmem:[#allocation3 + $0x109] sm:$0xff] %vm257_vm0, %v2199_v56  ;;  %v2126_v31 = vadd.f32 %v4682_v5, %v6912_v0  ;;  %v5274_v15 = vpack.i.bf16 %v7234_v1, %v2358_v50 }
 0x271   : > { %v1905_v3 = vpop.f32.mrb[44].mxu0 }
 0x272   : > { %v2200_v54 = vmax.f32 %v2126_v31, 0.0  ;;  %v4683_v48 = vadd.f32 %v7016_v36, %v1905_v3  ;;  %v1907_v44 = vpop.f32.mrb[45].mxu0  ;;  %5275 = vrot.lane.b32.xlu0 %v5274_v15, %s5516_s22 }
 0x274   : > { %v7269_v37 = vld [vmem:[#allocation3 + $0xf2] sm:$0xff]  ;;  %v7271_v47 = vld [vmem:[#allocation3 + $0xfa] sm:$0xff]  ;;  %2233 = vst.msk [vmem:[#allocation3 + $0x111] sm:$0xff] %vm257_vm0, %v2200_v54  ;;  %v2131_v0 = vadd.f32 %v4683_v48, %v6932_v21 }
 0x275   : > { %8240 = vst [vmem:[#allocation43_spill] sm:$0xff] %v7269_v37  ;;  %v2359_v34 = vld [vmem:[#allocation3 + $0xf8] sm:$0xff]  ;;  %4405 = vmatprep.mubr.msk.f32.mxu0 %vm257_vm0, %v7269_v37  ;;  %v1910_v3 = vpop.f32.mrb[46].mxu0 }
 0x276   : > { %v5279_v56 = vpack.i.bf16 %v7252_v24, %v2359_v34  ;;  %v7278_v5 = vld [vmem:[#allocation3 + $0xf9] sm:$0xff]  ;;  %4406 = vmatmul.mubr.msk.f32.gmra.mrb[80].mxu0 %vm257_vm0, %v7271_v47  ;;  %v2201_v31 = vmax.f32 %v2131_v0, 0.0  ;;  %v4684_v15 = vadd.f32 %v7016_v36, %v1910_v3  ;;  %v1912_v54 = vpop.f32.mrb[47].mxu0 }
 0x277   : > { %v2360_v21 = vld [vmem:[#allocation3 + $0x108] sm:$0xff] }
 0x278   : > { %5280 = vrot.lane.b32.xlu1 %v5279_v56, %s5516_s22  ;;  %v7286_v48 = vld [vmem:[#allocation3 + $0x109] sm:$0xff]  ;;  %2234 = vst.msk [vmem:[#allocation3 + $0x121] sm:$0xff] %vm257_vm0, %v2201_v31  ;;  %v2136_v34 = vadd.f32 %v4684_v15, %v6930_v32  ;;  %v5284_v44 = vpack.i.bf16 %v7260_v6, %v2360_v21 }
 0x279   : > { %v1915_v39 = vpop.f32.mrb[48].mxu0 }
 0x27a   : > { %v2202_v50 = vmax.f32 %v2136_v34, 0.0  ;;  %v4685_v0 = vadd.f32 %v7016_v36, %v1915_v39  ;;  %v1917_v3 = vpop.f32.mrb[49].mxu0  ;;  %5285 = vrot.lane.b32.xlu0 %v5284_v44, %s5516_s22 }
 0x27b   : > { %v7295_v56 = vld [vmem:[#allocation3 + $0x10a] sm:$0xff]  ;;  %v7297_v54 = vld [vmem:[#allocation3 + $0x112] sm:$0xff] }
 0x27c   : > { %8241 = vst [vmem:[#allocation44_spill] sm:$0xff] %v7295_v56  ;;  %v2361_v14 = vld [vmem:[#allocation3 + $0x110] sm:$0xff]  ;;  %2235 = vst.msk [vmem:[#allocation3 + $0x129] sm:$0xff] %vm257_vm0, %v2202_v50  ;;  %v2141_v32 = vadd.f32 %v4685_v0, %v6950_v29  ;;  %4408 = vmatprep.mubr.msk.f32.mxu0 %vm257_vm0, %v7295_v56 }
 0x27d   : > { %v5289_v31 = vpack.i.bf16 %v7278_v5, %v2361_v14  ;;  %v7304_v15 = vld [vmem:[#allocation3 + $0x111] sm:$0xff]  ;;  %v1920_v39 = vpop.f32.mrb[50].mxu0  ;;  %4409 = vmatmul.mubr.msk.f32.gmra.mrb[82].mxu0 %vm257_vm0, %v7297_v54 }
 0x27e   : > { %v2203_v34 = vmax.f32 %v2141_v32, 0.0  ;;  %v4686_v44 = vadd.f32 %v7016_v36, %v1920_v39  ;;  %v1922_v50 = vpop.f32.mrb[51].mxu0 }
 0x27f   : > { %5290 = vrot.lane.b32.xlu1 %v5289_v31, %s5516_s22  ;;  %v2362_v29 = vld [vmem:[#allocation3 + $0x120] sm:$0xff] }
 0x280   : > { %v7312_v0 = vld [vmem:[#allocation3 + $0x121] sm:$0xff]  ;;  %2236 = vst.msk [vmem:[#allocation3 + $0x139] sm:$0xff] %vm257_vm0, %v2203_v34  ;;  %v2146_v14 = vadd.f32 %v4686_v44, %v6948_v53  ;;  %v5294_v3 = vpack.i.bf16 %v7286_v48, %v2362_v29 }
 0x281   : > { %v1925_v37 = vpop.f32.mrb[52].mxu0 }
 0x282   : > { %v2204_v21 = vmax.f32 %v2146_v14, 0.0  ;;  %v4687_v32 = vadd.f32 %v7016_v36, %v1925_v37  ;;  %v1927_v39 = vpop.f32.mrb[53].mxu0  ;;  %5295 = vrot.lane.b32.xlu0 %v5294_v3, %s5516_s22 }
 0x283   : > { %v2363_v31 = vld [vmem:[#allocation3 + $0x128] sm:$0xff] }
 0x284   : > { %v7321_v50 = vld [vmem:[#allocation3 + $0x129] sm:$0xff]  ;;  %2237 = vst.msk [vmem:[#allocation3 + $0x141] sm:$0xff] %vm257_vm0, %v2204_v21  ;;  %v2151_v34 = vadd.f32 %v4687_v32, %v6968_v12  ;;  %v5299_v53 = vpack.i.bf16 %v7304_v15, %v2363_v31 }
 0x285   : > { %v1930_v29 = vpop.f32.mrb[54].mxu0 }
 0x286   : > { %v2205_v10 = vmax.f32 %v2151_v34, 0.0  ;;  %v4688_v14 = vadd.f32 %v7016_v36, %v1930_v29  ;;  %v1932_v37 = vpop.f32.mrb[55].mxu0  ;;  %5300 = vrot.lane.b32.xlu1 %v5299_v53, %s5516_s22 }
 0x287   : > { %v2364_v3 = vld [vmem:[#allocation3 + $0x138] sm:$0xff] }
 0x288   : > { %2238 = vst.msk [vmem:[#allocation3 + $0x151] sm:$0xff] %vm257_vm0, %v2205_v10  ;;  %v2156_v39 = vadd.f32 %v4688_v14, %v6966_v30  ;;  %v5304_v21 = vpack.i.bf16 %v7312_v0, %v2364_v3  ;;  %v7340_v3 = vld [vmem:[#allocation3 + $0x139] sm:$0xff] }
 0x289   : > { %v1935_v12 = vpop.f32.mrb[56].mxu0 }
 0x28a   : > { %v2206_v32 = vmax.f32 %v2156_v39, 0.0  ;;  %v4689_v31 = vadd.f32 %v7016_v36, %v1935_v12  ;;  %v1937_v56 = vpop.f32.mrb[57].mxu0  ;;  %5305 = vrot.lane.b32.xlu0 %v5304_v21, %s5516_s22 }
 0x28b   : > { %v2365_v34 = vld [vmem:[#allocation3 + $0x140] sm:$0xff] }
 0x28c   : > { %2239 = vst.msk [vmem:[#allocation3 + $0x159] sm:$0xff] %vm257_vm0, %v2206_v32  ;;  %v2161_v29 = vadd.f32 %v4689_v31, %v6986_v19  ;;  %v5309_v53 = vpack.i.bf16 %v7321_v50, %v2365_v34  ;;  %v7350_v34 = vld [vmem:[#allocation3 + $0x141] sm:$0xff] }
 0x28d   : > { %v1940_v37 = vpop.f32.mrb[58].mxu0 }
 0x28e   : > { %v2207_v10 = vmax.f32 %v2161_v29, 0.0  ;;  %v4690_v30 = vadd.f32 %v7016_v36, %v1940_v37  ;;  %v1942_v14 = vpop.f32.mrb[59].mxu0  ;;  %5310 = vrot.lane.b32.xlu1 %v5309_v53, %s5516_s22 }
 0x28f   : > { %v7342_v39 = vld [vmem:[#allocation3 + $0x150] sm:$0xff] }
 0x290   : > { %8242 = vst [vmem:[#allocation45_spill] sm:$0xff] %v7342_v39  ;;  %2240 = vst.msk [vmem:[#allocation3 + $0x169] sm:$0xff] %vm257_vm0, %v2207_v10  ;;  %v2166_v56 = vadd.f32 %v4690_v30, %v6984_v62  ;;  %v5314_v19 = vpack.i.bf16 %v7340_v3, %v7342_v39  ;;  %v2309_v39 = vld [vmem:[#allocation3 + $0xa] sm:$0xff] }
 0x291   : > { %v1945_v21 = vpop.f32.mrb[60].mxu0 }
 0x292   : > { %v2208_v12 = vmax.f32 %v2166_v56, 0.0  ;;  %v4691_v32 = vadd.f32 %v7016_v36, %v1945_v21  ;;  %v1947_v31 = vpop.f32.mrb[61].mxu0  ;;  %5315 = vrot.lane.b32.xlu0 %v5314_v19, %s5516_s22  ;;  %v7360_v56 = vld [vmem:[#allocation3 + $0x151] sm:$0xff] }
 0x293   : > { %v7352_v29 = vld [vmem:[#allocation3 + $0x158] sm:$0xff]  ;;  %8244 = vst [vmem:[#allocation47_spill] sm:$0xff] %v7360_v56 }
 0x294   : > { %8243 = vst [vmem:[#allocation46_spill] sm:$0xff] %v7352_v29  ;;  %2241 = vst.msk [vmem:[#allocation3 + $0x171] sm:$0xff] %vm257_vm0, %v2208_v12  ;;  %v2171_v53 = vadd.f32 %v4691_v32, %v7004_v2  ;;  %v5319_v62 = vpack.i.bf16 %v7350_v34, %v7352_v29  ;;  %v7372_v32 = vld [vmem:[#allocation3 + $0x159] sm:$0xff] }
 0x295   : > { %v1950_v37 = vpop.f32.mrb[62].mxu0  ;;  %8246 = vst [vmem:[#allocation49_spill] sm:$0xff] %v7372_v32 }
 0x296   : > { %v2209_v10 = vmax.f32 %v2171_v53, 0.0  ;;  %v4692_v30 = vadd.f32 %v7016_v36, %v1950_v37  ;;  %v1952_v14 = vpop.f32.mrb[63].mxu0  ;;  %5320 = vrot.lane.b32.xlu1 %v5319_v62, %s5516_s22  ;;  %v3205_v36 = vld [vmem:[%s8089_s3 + $0x100] sm:$0xff]  ;;  %v3206_v53 = vld [vmem:[%s8089_s3 + $0x108] sm:$0xff]  ;;  %v2308_v37 = vld [vmem:[#allocation3 + $0x2] sm:$0xff] }
 0x297   : > { %v7362_v19 = vld [vmem:[#allocation3 + $0x168] sm:$0xff] }
 0x298   : > { %8245 = vst [vmem:[#allocation48_spill] sm:$0xff] %v7362_v19  ;;  %2242 = vst.msk [vmem:[#allocation3 + $0x181] sm:$0xff] %vm257_vm0, %v2209_v10  ;;  %v2176_v21 = vadd.f32 %v4692_v30, %v7002_v7  ;;  %v5324_v2 = vpack.i.bf16 %v7360_v56, %v7362_v19  ;;  %v2244_v10 = vld [vmem:[#allocation3] sm:$0xff]  ;;  %v7382_v19 = vld [vmem:[#allocation3 + $0x169] sm:$0xff] }
 0x299   : > { %8247 = vst [vmem:[#allocation50_spill] sm:$0xff] %v7382_v19 }
 0x29a   : > { %v2210_v12 = vmax.f32 %v2176_v21, 0.0  ;;  %5325 = vrot.lane.b32.xlu0 %v5324_v2, %s5516_s22  ;;  %v4590_v21 = vpack.c.bf16 %v3206_v53, %v3205_v36  ;;  %v3208_v36 = vld [vmem:[%s8089_s3 + $0x118] sm:$0xff] }
 0x29b   : > { %v2369_v31 = vld [vmem:[#allocation3 + $0x170] sm:$0xff] }
 0x29c   : > { %2243 = vst.msk [vmem:[#allocation3 + $0x189] sm:$0xff] %vm257_vm0, %v2210_v12  ;;  %v5186_v7 = vpop.permute.xlu0 %5185  ;;  %v5329_v62 = vpack.i.bf16 %v7372_v32, %v2369_v31  ;;  %v2245_v31 = vld [vmem:[#allocation3 + $0x8] sm:$0xff] }
 0x29d   : > { %v5188_v30 = vunpack.i.h.bf16 %v5186_v7  ;;  %v5187_v14 = vunpack.i.l.bf16 %v5186_v7  ;;  %v3207_v7 = vld [vmem:[%s8089_s3 + $0x110] sm:$0xff] }
 0x29e   : > { %5330 = vrot.lane.b32.xlu1 %v5329_v62, %s5516_s22 }
 0x29f   : > { %v3077_v2 = vsel %vm257_vm0, %v2308_v37, %v5187_v14  ;;  %v3045_v44 = vsel %vm257_vm0, %v2244_v10, %v5188_v30  ;;  %v2370_v29 = vld [vmem:[#allocation3 + $0x180] sm:$0xff] }
 0x2a0   : > { %v5191_v56 = vpop.permute.xlu1 %5190  ;;  %3412 = vmatprep.mubr.f32.mxu1 %v3077_v2  ;;  %v5334_v12 = vpack.i.bf16 %v7382_v19, %v2370_v29  ;;  %v7394_v29 = vld [vmem:[#allocation3 + $0x171] sm:$0xff]  ;;  %v2404_v14 = vld [vmem:[#allocation3 + $0x1a] sm:$0xff]  ;;  %v4593_v2 = vpack.c.bf16 %v3208_v36, %v3207_v7  ;;  %v2405_v7 = vld [vmem:[#allocation3 + $0x22] sm:$0xff] }
 0x2a1   : > { %v5193_v53 = vunpack.i.h.bf16 %v5191_v56  ;;  %v5192_v62 = vunpack.i.l.bf16 %v5191_v56  ;;  %3413 = vmatmul.mubr.f32.vlgmr.msra.gmra.mrb[32].mxu1 %v3045_v44  ;;  %v5344_v44 = vpack.i.bf16 %v2404_v14, %v7078_v9  ;;  %v3209_v56 = vld [vmem:[%s8089_s3 + $0x120] sm:$0xff] }
 0x2a2   : > { %4591 = vmatpush1.bf16.msra.mxu1 %v4590_v21  ;;  %5335 = vrot.lane.b32.xlu0 %v5334_v12, %s5516_s22 }
 0x2a3   : > { %v3078_v37 = vsel %vm257_vm0, %v2309_v39, %v5192_v62  ;;  %v3046_v10 = vsel %vm257_vm0, %v2245_v31, %v5193_v53  ;;  %v2371_v30 = vld [vmem:[#allocation3 + $0x188] sm:$0xff]  ;;  %4592 = vmatprep.subr.bf16.mxu1 %v8198_v58  ;;  %v3210_v39 = vld [vmem:[%s8089_s3 + $0x128] sm:$0xff]  ;;  %v5349_v62 = vpack.i.bf16 %v2405_v7, %v7088_v22 }
 0x2a4   : > { %3417 = vmatprep.mubr.f32.mxu1 %v3078_v37  ;;  %v5196_v19 = vpop.permute.xlu0 %5195  ;;  %v5339_v32 = vpack.i.bf16 %v7394_v29, %v2371_v30  ;;  %v4596_v36 = vpack.c.bf16 %v3210_v39, %v3209_v56  ;;  %v3213_v56 = vld [vmem:[%s8089_s3 + $0x140] sm:$0xff] }
 0x2a5   : > { %v5198_v21 = vunpack.i.h.bf16 %v5196_v19  ;;  %v5197_v12 = vunpack.i.l.bf16 %v5196_v19  ;;  %3418 = vmatmul.mubr.f32.gmra.mrb[34].mxu1 %v3046_v10  ;;  %v5354_v19 = vpack.i.bf16 %v7063_v28, %v7106_v20 }
 0x2a6   : > { %5340 = vrot.lane.b32.xlu1 %v5339_v32, %s5516_s22  ;;  %5345 = vrot.lane.b32.xlu0 %v5344_v44, %s5516_s22  ;;  %v3211_v32 = vld [vmem:[%s8089_s3 + $0x130] sm:$0xff]  ;;  %v5364_v44 = vpack.i.bf16 %v7090_v52, %v7128_v33 }
 0x2a7   : > { %v3079_v31 = vsel %vm257_vm0, %v2404_v14, %v5197_v12  ;;  %v3047_v9 = vsel %vm257_vm0, %v7042_v45, %v5198_v21  ;;  %4594 = vmatpush1.bf16.msra.mxu1 %v4593_v2  ;;  %v3212_v45 = vld [vmem:[%s8089_s3 + $0x138] sm:$0xff]  ;;  %v5359_v2 = vpack.i.bf16 %v7065_v4, %v7113_v63 }
 0x2a8   : > { %3422 = vmatprep.mubr.f32.mxu1 %v3079_v31  ;;  %4595 = vmatprep.subr.bf16.mxu1 %v8198_v58  ;;  %v4599_v30 = vpack.c.bf16 %v3212_v45, %v3211_v32  ;;  %v3217_v32 = vld [vmem:[%s8089_s3 + $0x160] sm:$0xff]  ;;  %v3218_v45 = vld [vmem:[%s8089_s3 + $0x168] sm:$0xff] }
 0x2a9   : > { %v5201_v53 = vpop.permute.xlu1 %5200  ;;  %3423 = vmatmul.mubr.f32.gmra.mrb[36].mxu1 %v3047_v9  ;;  %v5369_v9 = vpack.i.bf16 %v7092_v18, %v7135_v25 }
 0x2aa   : > { %v5203_v37 = vunpack.i.h.bf16 %v5201_v53  ;;  %v5202_v10 = vunpack.i.l.bf16 %v5201_v53  ;;  %5350 = vrot.lane.b32.xlu1 %v5349_v62, %s5516_s22  ;;  %5355 = vrot.lane.b32.xlu0 %v5354_v19, %s5516_s22 }
 0x2ab   : > { %4597 = vmatpush1.bf16.msra.mxu1 %v4596_v36  ;;  %v3215_v36 = vld [vmem:[%s8089_s3 + $0x150] sm:$0xff] }
 0x2ac   : > { %v3080_v22 = vsel %vm257_vm0, %v2405_v7, %v5202_v10  ;;  %v3048_v20 = vsel %vm257_vm0, %v7049_v57, %v5203_v37  ;;  %v5206_v14 = vpop.permute.xlu0 %5205  ;;  %4598 = vmatprep.subr.bf16.mxu1 %v8198_v58  ;;  %v3214_v57 = vld [vmem:[%s8089_s3 + $0x148] sm:$0xff]  ;;  %v5374_v7 = vpack.i.bf16 %v7115_v38, %v7154_v13 }
 0x2ad   : > { %3427 = vmatprep.mubr.f32.mxu1 %v3080_v22  ;;  %v5208_v39 = vunpack.i.h.bf16 %v5206_v14  ;;  %v5207_v21 = vunpack.i.l.bf16 %v5206_v14  ;;  %v4602_v12 = vpack.c.bf16 %v3214_v57, %v3213_v56 }
 0x2ae   : > { %3428 = vmatmul.mubr.f32.gmra.mrb[38].mxu1 %v3048_v20  ;;  %5360 = vrot.lane.b32.xlu1 %v5359_v2, %s5516_s22 }
 0x2af   : > { %5365 = vrot.lane.b32.xlu0 %v5364_v44, %s5516_s22  ;;  %v3081_v63 = vsel %vm257_vm0, %v7063_v28, %v5207_v21  ;;  %v3049_v33 = vsel %vm257_vm0, %v7056_v42, %v5208_v39  ;;  %4600 = vmatpush1.bf16.msra.mxu1 %v4599_v30  ;;  %v3216_v42 = vld [vmem:[%s8089_s3 + $0x158] sm:$0xff]  ;;  %v4608_v30 = vpack.c.bf16 %v3218_v45, %v3217_v32  ;;  %v7512_v39 = vld [vmem:[#allocation3 + $0x60] sm:$0xff]  ;;  %v7553_v45 = vld [vmem:[#allocation3 + $0x78] sm:$0xff] }
 0x2b0   : > { %3432 = vmatprep.mubr.f32.mxu1 %v3081_v63  ;;  %4601 = vmatprep.subr.bf16.mxu1 %v8198_v58  ;;  %v4605_v62 = vpack.c.bf16 %v3216_v42, %v3215_v36  ;;  %v2318_v32 = vld [vmem:[#allocation3 + $0x7a] sm:$0xff] }
 0x2b1   : > { %v5211_v31 = vpop.permute.xlu1 %5210 }
 0x2b2   : > { %v5213_v28 = vunpack.i.h.bf16 %v5211_v31  ;;  %v5212_v53 = vunpack.i.l.bf16 %v5211_v31  ;;  %3433 = vmatmul.mubr.f32.gmra.mrb[40].mxu1 %v3049_v33  ;;  %5370 = vrot.lane.b32.xlu1 %v5369_v9, %s5516_s22  ;;  %v8255_v31 = vpack.i.bf16 %v7217_v40, %v7234_v1  ;;  %v2317_v9 = vld [vmem:[#allocation3 + $0x6a] sm:$0xff]  ;;  %v3226_v40 = vld [vmem:[%s8089_s3 + $0x1a8] sm:$0xff] }
 0x2b3   : > { %5375 = vrot.lane.b32.xlu0 %v5374_v7, %s5516_s22  ;;  %4603 = vmatpush1.bf16.msra.mxu1 %v4602_v12  ;;  %v7533_v7 = vld [vmem:[#allocation3 + $0x68] sm:$0xff] }
 0x2b4   : > { %v3082_v25 = vsel %vm257_vm0, %v7065_v4, %v5212_v53  ;;  %v3050_v13 = vsel %vm257_vm0, %v7067_v23, %v5213_v28  ;;  %v5216_v19 = vpop.permute.xlu0 %5215  ;;  %4604 = vmatprep.subr.bf16.mxu1 %v8198_v58  ;;  %v8248_v4 = vpack.i.bf16 %v7117_v16, %v7146_v26  ;;  %v8249_v23 = vpack.i.bf16 %v7137_v60, %v7156_v17  ;;  %v3219_v16 = vld [vmem:[%s8089_s3 + $0x170] sm:$0xff]  ;;  %v3220_v60 = vld [vmem:[%s8089_s3 + $0x178] sm:$0xff] }
 0x2b5   : > { %3437 = vmatprep.mubr.f32.mxu1 %v3082_v25  ;;  %v5218_v37 = vunpack.i.h.bf16 %v5216_v19  ;;  %v5217_v10 = vunpack.i.l.bf16 %v5216_v19  ;;  %v4611_v56 = vpack.c.bf16 %v3220_v60, %v3219_v16  ;;  %v8256_v25 = vld [vmem:[#allocation39_spill] sm:$0xff] }
 0x2b6   : > { %3438 = vmatmul.mubr.f32.gmra.mrb[42].mxu1 %v3050_v13  ;;  %5380 = vrot.lane.b32.xlu1 %v8248_v4, %s5516_s22  ;;  %v8257_v13 = vpack.i.bf16 %v8256_v25, %v7252_v24  ;;  %v3227_v24 = vld [vmem:[%s8089_s3 + $0x1b0] sm:$0xff]  ;;  %v8262_v16 = vld [vmem:[#allocation43_spill] sm:$0xff] }
 0x2b7   : > { %5385 = vrot.lane.b32.xlu0 %v8249_v23, %s5516_s22  ;;  %v3083_v22 = vsel %vm257_vm0, %v7090_v52, %v5217_v10  ;;  %v3051_v20 = vsel %vm257_vm0, %v7080_v8, %v5218_v37  ;;  %4606 = vmatpush1.bf16.msra.mxu1 %v4605_v62  ;;  %v8250_v8 = vpack.i.bf16 %v7139_v27, %v7174_v51  ;;  %v3221_v27 = vld [vmem:[%s8089_s3 + $0x180] sm:$0xff]  ;;  %v7636_v25 = vld [vmem:[#allocation3 + $0xa8] sm:$0xff] }
 0x2b8   : > { %3442 = vmatprep.mubr.f32.mxu1 %v3083_v22  ;;  %4607 = vmatprep.subr.bf16.mxu1 %v8198_v58  ;;  %v8251_v52 = vpack.i.bf16 %v7165_v43, %v7182_v55  ;;  %v3222_v43 = vld [vmem:[%s8089_s3 + $0x188] sm:$0xff]  ;;  %v8258_v62 = vld [vmem:[#allocation40_spill] sm:$0xff]  ;;  %v8263_v60 = vpack.i.bf16 %v8262_v16, %v7286_v48  ;;  %v7656_v16 = vld [vmem:[#allocation3 + $0x181] sm:$0xff] }
 0x2b9   : > { %v5221_v14 = vpop.permute.xlu1 %5220  ;;  %v4614_v33 = vpack.c.bf16 %v3222_v43, %v3221_v27  ;;  %v8259_v19 = vpack.i.bf16 %v8258_v62, %v7260_v6  ;;  %v3228_v6 = vld [vmem:[%s8089_s3 + $0x1b8] sm:$0xff]  ;;  %v3230_v48 = vld [vmem:[%s8089_s3 + $0x1c8] sm:$0xff]  ;;  %v8264_v27 = vpack.i.bf16 %v7271_v47, %v7304_v15  ;;  %v8265_v43 = vld [vmem:[#allocation44_spill] sm:$0xff] }
 0x2ba   : > { %v5223_v26 = vunpack.i.h.bf16 %v5221_v14  ;;  %v5222_v17 = vunpack.i.l.bf16 %v5221_v14  ;;  %3443 = vmatmul.mubr.f32.gmra.mrb[44].mxu1 %v3051_v20  ;;  %5390 = vrot.lane.b32.xlu1 %v8250_v8, %s5516_s22  ;;  %v3231_v15 = vld [vmem:[%s8089_s3 + $0x1d0] sm:$0xff] }
 0x2bb   : > { %5395 = vrot.lane.b32.xlu0 %v8251_v52, %s5516_s22  ;;  %4609 = vmatpush1.bf16.msra.mxu1 %v4608_v30  ;;  %v8260_v30 = vld [vmem:[#allocation42_spill] sm:$0xff] }
 0x2bc   : > { %v3084_v2 = vsel %vm257_vm0, %v7092_v18, %v5222_v17  ;;  %v3052_v44 = vsel %vm257_vm0, %v7094_v35, %v5223_v26  ;;  %v5226_v57 = vpop.permute.xlu0 %5225  ;;  %4610 = vmatprep.subr.bf16.mxu1 %v8198_v58  ;;  %v8252_v18 = vpack.i.bf16 %v7167_v59, %v7200_v41  ;;  %v8253_v35 = vpack.i.bf16 %v7191_v46, %v7208_v49  ;;  %v3223_v59 = vld [vmem:[%s8089_s3 + $0x190] sm:$0xff]  ;;  %v3224_v46 = vld [vmem:[%s8089_s3 + $0x198] sm:$0xff] }
 0x2bd   : > { %3447 = vmatprep.mubr.f32.mxu1 %v3084_v2  ;;  %v5228_v51 = vunpack.i.h.bf16 %v5226_v57  ;;  %v5227_v55 = vunpack.i.l.bf16 %v5226_v57  ;;  %v4617_v28 = vpack.c.bf16 %v3224_v46, %v3223_v59  ;;  %v8261_v14 = vpack.i.bf16 %v8260_v30, %v7278_v5  ;;  %v2319_v26 = vld [vmem:[#allocation3 + $0x82] sm:$0xff]  ;;  %v3229_v5 = vld [vmem:[%s8089_s3 + $0x1c0] sm:$0xff] }
 0x2be   : > { %3448 = vmatmul.mubr.f32.gmra.mrb[46].mxu1 %v3052_v44  ;;  %5400 = vrot.lane.b32.xlu1 %v8252_v18, %s5516_s22  ;;  %v7573_v17 = vld [vmem:[#allocation3 + $0x80] sm:$0xff]  ;;  %v4623_v2 = vpack.c.bf16 %v3228_v6, %v3227_v24  ;;  %v7593_v18 = vld [vmem:[#allocation3 + $0x90] sm:$0xff] }
 0x2bf   : > { %5405 = vrot.lane.b32.xlu0 %v8253_v35, %s5516_s22  ;;  %v3085_v21 = vsel %vm257_vm0, %v7115_v38, %v5227_v55  ;;  %v3053_v63 = vsel %vm257_vm0, %v7512_v39, %v5228_v51  ;;  %4612 = vmatpush1.bf16.msra.mxu1 %v4611_v56  ;;  %v8254_v38 = vpack.i.bf16 %v7193_v61, %v7226_v11  ;;  %v3225_v61 = vld [vmem:[%s8089_s3 + $0x1a0] sm:$0xff]  ;;  %v8270_v24 = vld [vmem:[#allocation50_spill] sm:$0xff] }
 0x2c0   : > { %3452 = vmatprep.mubr.f32.mxu1 %v3085_v21  ;;  %4613 = vmatprep.subr.bf16.mxu1 %v8198_v58  ;;  %v4620_v4 = vpack.c.bf16 %v3226_v40, %v3225_v61  ;;  %v8266_v51 = vpack.i.bf16 %v8265_v43, %v7312_v0  ;;  %v2320_v55 = vld [vmem:[#allocation3 + $0x92] sm:$0xff]  ;;  %v3232_v0 = vld [vmem:[%s8089_s3 + $0x1d8] sm:$0xff] }
 0x2c1   : > { %v5231_v12 = vpop.permute.xlu1 %5230  ;;  %v3233_v61 = vld [vmem:[%s8089_s3 + $0x1e0] sm:$0xff]  ;;  %v3234_v40 = vld [vmem:[%s8089_s3 + $0x1e8] sm:$0xff] }
 0x2c2   : > { %v5233_v41 = vunpack.i.h.bf16 %v5231_v12  ;;  %v5232_v49 = vunpack.i.l.bf16 %v5231_v12  ;;  %3453 = vmatmul.mubr.f32.gmra.mrb[48].mxu1 %v3053_v63  ;;  %5410 = vrot.lane.b32.xlu1 %v8254_v38, %s5516_s22  ;;  %v7598_v63 = vld [vmem:[#allocation3 + $0x122] sm:$0xff] }
 0x2c3   : > { %5415 = vrot.lane.b32.xlu0 %v8255_v31, %s5516_s22  ;;  %4615 = vmatpush1.bf16.msra.mxu1 %v4614_v33  ;;  %v4626_v33 = vpack.c.bf16 %v3230_v48, %v3229_v5  ;;  %v5454_v47 = vpack.i.bf16 %v7598_v63, %v7340_v3  ;;  %v2321_v3 = vld [vmem:[#allocation3 + $0x9a] sm:$0xff] }
 0x2c4   : > { %v3086_v36 = vsel %vm257_vm0, %v2317_v9, %v5232_v49  ;;  %v3054_v42 = vsel %vm257_vm0, %v7533_v7, %v5233_v41  ;;  %v5236_v53 = vpop.permute.xlu0 %5235  ;;  %4616 = vmatprep.subr.bf16.mxu1 %v8198_v58  ;;  %v8267_v41 = vpack.i.bf16 %v7297_v54, %v7321_v50  ;;  %v7614_v49 = vld [vmem:[#allocation3 + $0x98] sm:$0xff]  ;;  %v7619_v9 = vld [vmem:[#allocation3 + $0x12a] sm:$0xff] }
 0x2c5   : > { %3457 = vmatprep.mubr.f32.mxu1 %v3086_v36  ;;  %v5238_v11 = vunpack.i.h.bf16 %v5236_v53  ;;  %v5237_v1 = vunpack.i.l.bf16 %v5236_v53  ;;  %v7621_v36 = vld [vmem:[#allocation3 + $0x13a] sm:$0xff]  ;;  %v5459_v54 = vpack.i.bf16 %v7619_v9, %v7350_v34  ;;  %v8268_v50 = vld [vmem:[#allocation47_spill] sm:$0xff] }
 0x2c6   : > { %3458 = vmatmul.mubr.f32.gmra.mrb[50].mxu1 %v3054_v42  ;;  %5420 = vrot.lane.b32.xlu1 %v8257_v13, %s5516_s22  ;;  %v4629_v42 = vpack.c.bf16 %v3232_v0, %v3231_v15  ;;  %v5464_v53 = vpack.i.bf16 %v7621_v36, %v8268_v50  ;;  %v2322_v34 = vld [vmem:[#allocation3 + $0xaa] sm:$0xff] }
 0x2c7   : > { %5425 = vrot.lane.b32.xlu0 %v8259_v19, %s5516_s22  ;;  %v3087_v37 = vsel %vm257_vm0, %v2318_v32, %v5237_v1  ;;  %v3055_v10 = vsel %vm257_vm0, %v7553_v45, %v5238_v11  ;;  %4618 = vmatpush1.bf16.msra.mxu1 %v4617_v28  ;;  %v7641_v19 = vld [vmem:[#allocation3 + $0x142] sm:$0xff]  ;;  %v7643_v32 = vld [vmem:[#allocation3 + $0x152] sm:$0xff] }
 0x2c8   : > { %3462 = vmatprep.mubr.f32.mxu1 %v3087_v37  ;;  %4619 = vmatprep.subr.bf16.mxu1 %v8198_v58  ;;  %v4632_v37 = vpack.c.bf16 %v3234_v40, %v3233_v61  ;;  %v5474_v6 = vpack.i.bf16 %v7643_v32, %v8270_v24 }
 0x2c9   : > { %v5241_v23 = vpop.permute.xlu1 %5240 }
 0x2ca   : > { %v5243_v22 = vunpack.i.h.bf16 %v5241_v23  ;;  %v5242_v20 = vunpack.i.l.bf16 %v5241_v23  ;;  %3463 = vmatmul.mubr.f32.gmra.mrb[52].mxu1 %v3055_v10  ;;  %5430 = vrot.lane.b32.xlu1 %v8261_v14, %s5516_s22 }
 0x2cb   : > { %5435 = vrot.lane.b32.xlu0 %v8263_v60, %s5516_s22  ;;  %4621 = vmatpush1.bf16.msra.mxu1 %v4620_v4  ;;  %v8269_v4 = vld [vmem:[#allocation49_spill] sm:$0xff] }
 0x2cc   : > { %v3088_v8 = vsel %vm257_vm0, %v2319_v26, %v5242_v20  ;;  %v3056_v52 = vsel %vm257_vm0, %v7573_v17, %v5243_v22  ;;  %v5246_v44 = vpop.permute.xlu0 %5245  ;;  %4622 = vmatprep.subr.bf16.mxu1 %v8198_v58  ;;  %v5469_v23 = vpack.i.bf16 %v7641_v19, %v8269_v4  ;;  %v3235_v22 = vld [vmem:[%s8089_s3 + $0x1f0] sm:$0xff]  ;;  %v3236_v20 = vld [vmem:[%s8089_s3 + $0x1f8] sm:$0xff]  ;;  %v2323_v60 = vld [vmem:[#allocation3 + $0xb2] sm:$0xff] }
 0x2cd   : > { %3467 = vmatprep.mubr.f32.mxu1 %v3088_v8  ;;  %v5248_v56 = vunpack.i.h.bf16 %v5246_v44  ;;  %v5247_v57 = vunpack.i.l.bf16 %v5246_v44  ;;  %v7660_v26 = vld [vmem:[#allocation3 + $0xb0] sm:$0xff]  ;;  %v4635_v5 = vpack.c.bf16 %v3236_v20, %v3235_v22  ;;  %v2327_v4 = vld [vmem:[#allocation3 + $0xe2] sm:$0xff] }
 0x2ce   : > { %3468 = vmatmul.mubr.f32.gmra.mrb[54].mxu1 %v3056_v52  ;;  %5440 = vrot.lane.b32.xlu1 %v8264_v27, %s5516_s22  ;;  %v7667_v44 = vld [vmem:[#allocation3 + $0x16a] sm:$0xff] }
 0x2cf   : > { %5445 = vrot.lane.b32.xlu0 %v8266_v51, %s5516_s22  ;;  %v3089_v35 = vsel %vm257_vm0, %v2320_v55, %v5247_v57  ;;  %v3057_v21 = vsel %vm257_vm0, %v7593_v18, %v5248_v56  ;;  %4624 = vmatpush1.bf16.msra.mxu1 %v4623_v2  ;;  %v7665_v2 = vld [vmem:[#allocation3 + $0x15a] sm:$0xff]  ;;  %v5484_v57 = vpack.i.bf16 %v7667_v44, %v7656_v16  ;;  %v7674_v51 = vld [vmem:[#allocation3 + $0x189] sm:$0xff] }
 0x2d0   : > { %3472 = vmatprep.mubr.f32.mxu1 %v3089_v35  ;;  %4625 = vmatprep.subr.bf16.mxu1 %v8198_v58  ;;  %v5479_v56 = vpack.i.bf16 %v7665_v2, %v7394_v29  ;;  %v7676_v55 = vld [vmem:[#allocation3 + $0x182] sm:$0xff]  ;;  %v2499_v35 = vld [vmem:[#allocation3 + $0x199] sm:$0xff] }
 0x2d1   : > { %v5251_v12 = vpop.permute.xlu1 %5250  ;;  %v5494_v0 = vpack.i.bf16 %v7676_v55, %v2499_v35 }
 0x2d2   : > { %v5253_v59 = vunpack.i.h.bf16 %v5251_v12  ;;  %v5252_v46 = vunpack.i.l.bf16 %v5251_v12  ;;  %3473 = vmatmul.mubr.f32.gmra.mrb[56].mxu1 %v3057_v21  ;;  %5450 = vrot.lane.b32.xlu1 %v8267_v41, %s5516_s22  ;;  %v2324_v21 = vld [vmem:[#allocation3 + $0xc2] sm:$0xff]  ;;  %v7685_v12 = vld [vmem:[#allocation3 + $0x172] sm:$0xff] }
 0x2d3   : > { %5455 = vrot.lane.b32.xlu0 %v5454_v47, %s5516_s22  ;;  %4627 = vmatpush1.bf16.msra.mxu1 %v4626_v33  ;;  %v7680_v33 = vld [vmem:[#allocation3 + $0xc0] sm:$0xff]  ;;  %v5489_v15 = vpack.i.bf16 %v7685_v12, %v7674_v51 }
 0x2d4   : > { %v3090_v38 = vsel %vm257_vm0, %v2321_v3, %v5252_v46  ;;  %v3058_v31 = vsel %vm257_vm0, %v7614_v49, %v5253_v59  ;;  %v5256_v28 = vpop.permute.xlu0 %5255  ;;  %4628 = vmatprep.subr.bf16.mxu1 %v8198_v58  ;;  %v8271_v59 = vld [vmem:[#allocation31_spill] sm:$0xff] }
 0x2d5   : > { %3477 = vmatprep.mubr.f32.mxu1 %v3090_v38  ;;  %v5258_v11 = vunpack.i.h.bf16 %v5256_v28  ;;  %v5257_v1 = vunpack.i.l.bf16 %v5256_v28  ;;  %v7691_v3 = vld [vmem:[#allocation3 + $0x18a] sm:$0xff]  ;;  %v2500_v38 = vld [vmem:[#allocation3 + $0x1a1] sm:$0xff] }
 0x2d6   : > { %3478 = vmatmul.mubr.f32.gmra.mrb[58].mxu1 %v3058_v31  ;;  %5460 = vrot.lane.b32.xlu1 %v5459_v54, %s5516_s22  ;;  %v2325_v31 = vld [vmem:[#allocation3 + $0xca] sm:$0xff] }
 0x2d7   : > { %5465 = vrot.lane.b32.xlu0 %v5464_v53, %s5516_s22  ;;  %v3091_v13 = vsel %vm257_vm0, %v2322_v34, %v5257_v1  ;;  %v3059_v62 = vsel %vm257_vm0, %v7636_v25, %v5258_v11  ;;  %4630 = vmatpush1.bf16.msra.mxu1 %v4629_v42  ;;  %v7695_v42 = vld [vmem:[#allocation3 + $0xc8] sm:$0xff]  ;;  %v5499_v53 = vpack.i.bf16 %v7691_v3, %v2500_v38  ;;  %v2326_v11 = vld [vmem:[#allocation3 + $0xda] sm:$0xff] }
 0x2d8   : > { %3482 = vmatprep.mubr.f32.mxu1 %v3091_v13  ;;  %4631 = vmatprep.subr.bf16.mxu1 %v8198_v58  ;;  %v7702_v1 = vld [vmem:[#allocation3 + $0xd8] sm:$0xff] }
 0x2d9   : > { %v5261_v10 = vpop.permute.xlu1 %5260 }
 0x2da   : > { %v5263_v30 = vunpack.i.h.bf16 %v5261_v10  ;;  %v5262_v14 = vunpack.i.l.bf16 %v5261_v10  ;;  %3483 = vmatmul.mubr.f32.gmra.mrb[60].mxu1 %v3059_v62  ;;  %5470 = vrot.lane.b32.xlu1 %v5469_v23, %s5516_s22  ;;  %v7707_v23 = vld [vmem:[#allocation3 + $0xe0] sm:$0xff] }
 0x2db   : > { %5475 = vrot.lane.b32.xlu0 %v5474_v6, %s5516_s22  ;;  %4633 = vmatpush1.bf16.msra.mxu1 %v4632_v37 }
 0x2dc   : > { %v3092_v8 = vsel %vm257_vm0, %v2323_v60, %v5262_v14  ;;  %v3060_v52 = vsel %vm257_vm0, %v7660_v26, %v5263_v30  ;;  %v5266_v48 = vpop.permute.xlu0 %5265  ;;  %4634 = vmatprep.subr.bf16.mxu1 %v8198_v58  ;;  %v2328_v14 = vld [vmem:[#allocation3 + $0xf2] sm:$0xff] }
 0x2dd   : > { %3487 = vmatprep.mubr.f32.mxu1 %v3092_v8  ;;  %v5268_v27 = vunpack.i.h.bf16 %v5266_v48  ;;  %v5267_v43 = vunpack.i.l.bf16 %v5266_v48  ;;  %v7712_v60 = vld [vmem:[#allocation3 + $0xf0] sm:$0xff] }
 0x2de   : > { %3488 = vmatmul.mubr.f32.gmra.mrb[62].mxu1 %v3060_v52  ;;  %5480 = vrot.lane.b32.xlu1 %v5479_v56, %s5516_s22 }
 0x2df   : > { %5485 = vrot.lane.b32.xlu0 %v5484_v57, %s5516_s22  ;;  %v3093_v29 = vsel %vm257_vm0, %v2324_v21, %v5267_v43  ;;  %v3061_v58 = vsel %vm257_vm0, %v7680_v33, %v5268_v27  ;;  %4636 = vmatpush1.bf16.msra.mxu1 %v4635_v5  ;;  %v2329_v57 = vld [vmem:[#allocation3 + $0xfa] sm:$0xff] }
 0x2e0   : > { %3492 = vmatprep.mubr.f32.mxu1 %v3093_v29  ;;  %4653 = vmatprep.subr.bf16.mxu1 %v8271_v59  ;;  %v7717_v27 = vld [vmem:[#allocation3 + $0xf8] sm:$0xff] }
 0x2e1   : > { %v5271_v47 = vpop.permute.xlu1 %5270 }
 0x2e2   : > { %v5273_v46 = vunpack.i.h.bf16 %v5271_v47  ;;  %v5272_v41 = vunpack.i.l.bf16 %v5271_v47  ;;  %3493 = vmatmul.mubr.f32.gmra.mrb[64].mxu1 %v3061_v58  ;;  %5490 = vrot.lane.b32.xlu1 %v5489_v15, %s5516_s22  ;;  %v2330_v47 = vld [vmem:[#allocation3 + $0x10a] sm:$0xff] }
 0x2e3   : > { %5495 = vrot.lane.b32.xlu0 %v5494_v0, %s5516_s22  ;;  %v7722_v15 = vld [vmem:[#allocation3 + $0x108] sm:$0xff] }
 0x2e4   : > { %v3094_v28 = vsel %vm257_vm0, %v2325_v31, %v5272_v41  ;;  %v3062_v54 = vsel %vm257_vm0, %v7695_v42, %v5273_v46  ;;  %v5276_v50 = vpop.permute.xlu0 %5275 }
 0x2e5   : > { %3497 = vmatprep.mubr.f32.mxu1 %v3094_v28  ;;  %v5278_v61 = vunpack.i.h.bf16 %v5276_v50  ;;  %v5277_v40 = vunpack.i.l.bf16 %v5276_v50  ;;  %v2331_v28 = vld [vmem:[#allocation3 + $0x112] sm:$0xff] }
 0x2e6   : > { %3498 = vmatmul.mubr.f32.gmra.mrb[66].mxu1 %v3062_v54  ;;  %5500 = vrot.lane.b32.xlu1 %v5499_v53, %s5516_s22  ;;  %v7727_v54 = vld [vmem:[#allocation3 + $0x110] sm:$0xff] }
 0x2e7   : > { %v3095_v34 = vsel %vm257_vm0, %v2326_v11, %v5277_v40  ;;  %v3063_v13 = vsel %vm257_vm0, %v7702_v1, %v5278_v61 }
 0x2e8   : > { %3502 = vmatprep.mubr.f32.mxu1 %v3095_v34  ;;  %v7732_v34 = vld [vmem:[#allocation3 + $0x120] sm:$0xff] }
 0x2ea   : > { %v5281_v62 = vpop.permute.xlu1 %5280  ;;  %3503 = vmatmul.mubr.f32.gmra.mrb[68].mxu1 %v3063_v13 }
 0x2eb   : > { %v5283_v37 = vunpack.i.h.bf16 %v5281_v62  ;;  %v5282_v10 = vunpack.i.l.bf16 %v5281_v62 }
 0x2ec   : > { %v5286_v22 = vpop.permute.xlu0 %5285 }
 0x2ed   : > { %v3096_v24 = vsel %vm257_vm0, %v2327_v4, %v5282_v10  ;;  %v3064_v6 = vsel %vm257_vm0, %v7707_v23, %v5283_v37  ;;  %v5288_v20 = vunpack.i.h.bf16 %v5286_v22  ;;  %v5287_v30 = vunpack.i.l.bf16 %v5286_v22 }
 0x2ee   : > { %3507 = vmatprep.mubr.f32.mxu1 %v3096_v24  ;;  %v7738_v24 = vld [vmem:[#allocation3 + $0x128] sm:$0xff] }
 0x2ef   : > { %3508 = vmatmul.mubr.f32.gmra.mrb[70].mxu1 %v3064_v6  ;;  %v3097_v8 = vsel %vm257_vm0, %v2328_v14, %v5287_v30  ;;  %v3065_v52 = vsel %vm257_vm0, %v7712_v60, %v5288_v20  ;;  %v7744_v14 = vld [vmem:[#allocation3 + $0x138] sm:$0xff] }
 0x2f0   : > { %3512 = vmatprep.mubr.f32.mxu1 %v3097_v8 }
 0x2f1   : > { %v5291_v5 = vpop.permute.xlu1 %5290 }
 0x2f2   : > { %v5293_v48 = vunpack.i.h.bf16 %v5291_v5  ;;  %v5292_v56 = vunpack.i.l.bf16 %v5291_v5 }
 0x2f3   : > { %3513 = vmatmul.mubr.f32.gmra.mrb[72].mxu1 %v3065_v52 }
 0x2f4   : > { %v3098_v43 = vsel %vm257_vm0, %v2329_v57, %v5292_v56  ;;  %v3066_v35 = vsel %vm257_vm0, %v7717_v27, %v5293_v48  ;;  %v5296_v21 = vpop.permute.xlu0 %5295 }
 0x2f5   : > { %3517 = vmatprep.mubr.f32.mxu1 %v3098_v43  ;;  %v5298_v29 = vunpack.i.h.bf16 %v5296_v21  ;;  %v5297_v58 = vunpack.i.l.bf16 %v5296_v21  ;;  %v7754_v43 = vld [vmem:[#allocation3 + $0x140] sm:$0xff] }
 0x2f7   : > { %3518 = vmatmul.mubr.f32.gmra.mrb[74].mxu1 %v3066_v35  ;;  %v3099_v0 = vsel %vm257_vm0, %v2330_v47, %v5297_v58  ;;  %v3067_v46 = vsel %vm257_vm0, %v7722_v15, %v5298_v29 }
 0x2f8   : > { %v5301_v41 = vpop.permute.xlu1 %5300  ;;  %3522 = vmatprep.mubr.f32.mxu1 %v3099_v0  ;;  %v8272_v0 = vld [vmem:[#allocation45_spill] sm:$0xff] }
 0x2f9   : > { %v5303_v38 = vunpack.i.h.bf16 %v5301_v41  ;;  %v5302_v31 = vunpack.i.l.bf16 %v5301_v41 }
 0x2fb   : > { %3523 = vmatmul.mubr.f32.gmra.mrb[76].mxu1 %v3067_v46  ;;  %v3100_v50 = vsel %vm257_vm0, %v2331_v28, %v5302_v31  ;;  %v3068_v53 = vsel %vm257_vm0, %v7727_v54, %v5303_v38 }
 0x2fc   : > { %v5306_v61 = vpop.permute.xlu0 %5305  ;;  %3527 = vmatprep.mubr.f32.mxu1 %v3100_v50 }
 0x2fd   : > { %v5308_v40 = vunpack.i.h.bf16 %v5306_v61  ;;  %v5307_v11 = vunpack.i.l.bf16 %v5306_v61 }
 0x2ff   : > { %3528 = vmatmul.mubr.f32.gmra.mrb[78].mxu1 %v3068_v53  ;;  %v3101_v13 = vsel %vm257_vm0, %v7598_v63, %v5307_v11  ;;  %v3069_v62 = vsel %vm257_vm0, %v7732_v34, %v5308_v40  ;;  %v8273_v53 = vld [vmem:[#allocation46_spill] sm:$0xff] }
 0x300   : > { %v5311_v37 = vpop.permute.xlu1 %5310  ;;  %3532 = vmatprep.mubr.f32.mxu1 %v3101_v13 }
 0x301   : > { %v5313_v10 = vunpack.i.h.bf16 %v5311_v37  ;;  %v5312_v4 = vunpack.i.l.bf16 %v5311_v37 }
 0x303   : > { %3533 = vmatmul.mubr.f32.gmra.mrb[80].mxu1 %v3069_v62  ;;  %v3102_v6 = vsel %vm257_vm0, %v7619_v9, %v5312_v4  ;;  %v3070_v22 = vsel %vm257_vm0, %v7738_v24, %v5313_v10  ;;  %v8274_v62 = vld [vmem:[#allocation48_spill] sm:$0xff] }
 0x304   : > { %v5316_v20 = vpop.permute.xlu0 %5315  ;;  %3537 = vmatprep.mubr.f32.mxu1 %v3102_v6 }
 0x305   : > { %v5318_v30 = vunpack.i.h.bf16 %v5316_v20  ;;  %v5317_v63 = vunpack.i.l.bf16 %v5316_v20 }
 0x307   : > { %3538 = vmatmul.mubr.f32.gmra.mrb[82].mxu1 %v3070_v22  ;;  %v3103_v8 = vsel %vm257_vm0, %v7621_v36, %v5317_v63  ;;  %v3071_v52 = vsel %vm257_vm0, %v7744_v14, %v5318_v30  ;;  %v7780_v63 = vld [vmem:[#allocation3 + $0x170] sm:$0xff] }
 0x308   : > { %v7750_v5 = vpop.f32.mrb[64].mxu0  ;;  %v5321_v48 = vpop.permute.xlu1 %5320  ;;  %3542 = vmatprep.mubr.f32.mxu1 %v3103_v8 }
 0x309   : > { %v5323_v9 = vunpack.i.h.bf16 %v5321_v48  ;;  %v5322_v56 = vunpack.i.l.bf16 %v5321_v48  ;;  %v7752_v57 = vpop.f32.mrb[65].mxu0 }
 0x30b   : > { %3543 = vmatmul.mubr.f32.gmra.mrb[84].mxu1 %v3071_v52  ;;  %v3104_v35 = vsel %vm257_vm0, %v7641_v19, %v5322_v56  ;;  %v3072_v36 = vsel %vm257_vm0, %v7754_v43, %v5323_v9  ;;  %v2437_v9 = vld [vmem:[#allocation3 + $0x30] sm:$0xff] }
 0x30c   : > { %v5326_v21 = vpop.permute.xlu0 %5325  ;;  %3547 = vmatprep.mubr.f32.mxu1 %v3104_v35 }
 0x30d   : > { %v5328_v29 = vunpack.i.h.bf16 %v5326_v21  ;;  %v5327_v58 = vunpack.i.l.bf16 %v5326_v21  ;;  %v2372_v21 = vld [vmem:[#allocation3 + $0x19] sm:$0xff] }
 0x30f   : > { %3548 = vmatmul.mubr.f32.gmra.mrb[86].mxu1 %v3072_v36  ;;  %v3105_v47 = vsel %vm257_vm0, %v7643_v32, %v5327_v58  ;;  %v3073_v46 = vsel %vm257_vm0, %v8272_v0, %v5328_v29  ;;  %v2438_v0 = vld [vmem:[#allocation3 + $0x38] sm:$0xff] }
 0x310   : > { %v7764_v41 = vpop.f32.mrb[66].mxu0  ;;  %v5331_v38 = vpop.permute.xlu1 %5330  ;;  %3552 = vmatprep.mubr.f32.mxu1 %v3105_v47 }
 0x311   : > { %v5333_v31 = vunpack.i.h.bf16 %v5331_v38  ;;  %v5332_v19 = vunpack.i.l.bf16 %v5331_v38  ;;  %v7766_v28 = vpop.f32.mrb[67].mxu0 }
 0x313   : > { %3553 = vmatmul.mubr.f32.gmra.mrb[88].mxu1 %v3073_v46  ;;  %v3106_v50 = vsel %vm257_vm0, %v7665_v2, %v5332_v19  ;;  %v3074_v61 = vsel %vm257_vm0, %v8273_v53, %v5333_v31  ;;  %v8275_v53 = vld [vmem:[#allocation33_spill] sm:$0xff] }
 0x314   : > { %v5336_v40 = vpop.permute.xlu0 %5335  ;;  %3557 = vmatprep.mubr.f32.mxu1 %v3106_v50  ;;  %v2373_v50 = vld [vmem:[#allocation3 + $0x21] sm:$0xff] }
 0x315   : > { %v5338_v32 = vunpack.i.h.bf16 %v5336_v40  ;;  %v5337_v11 = vunpack.i.l.bf16 %v5336_v40 }
 0x317   : > { %3558 = vmatmul.mubr.f32.gmra.mrb[90].mxu1 %v3074_v61  ;;  %v3107_v13 = vsel %vm257_vm0, %v7667_v44, %v5337_v11  ;;  %v3075_v37 = vsel %vm257_vm0, %v8274_v62, %v5338_v32  ;;  %v2439_v32 = vld [vmem:[#allocation3 + $0x48] sm:$0xff] }
 0x318   : > { %v7776_v10 = vpop.f32.mrb[68].mxu0  ;;  %v5341_v4 = vpop.permute.xlu1 %5340  ;;  %3562 = vmatprep.mubr.f32.mxu1 %v3107_v13 }
 0x319   : > { %v5343_v6 = vunpack.i.h.bf16 %v5341_v4  ;;  %v5342_v2 = vunpack.i.l.bf16 %v5341_v4  ;;  %v5346_v22 = vpop.permute.xlu0 %5345  ;;  %v7778_v20 = vpop.f32.mrb[69].mxu0  ;;  %v8276_v4 = vld [vmem:[#allocation36_spill] sm:$0xff] }
 0x31a   : > { %v5347_v30 = vunpack.i.l.bf16 %v5346_v22  ;;  %v5348_v52 = vunpack.i.h.bf16 %v5346_v22  ;;  %v2440_v22 = vld [vmem:[#allocation3 + $0x50] sm:$0xff] }
 0x31b   : > { %3563 = vmatmul.mubr.f32.gmra.mrb[92].mxu1 %v3075_v37  ;;  %v3108_v8 = vsel %vm257_vm0, %v7685_v12, %v5342_v2  ;;  %v3076_v44 = vsel %vm257_vm0, %v7780_v63, %v5343_v6  ;;  %v2374_v37 = vld [vmem:[#allocation3 + $0x31] sm:$0xff] }
 0x31c   : > { %v5351_v48 = vpop.permute.xlu1 %5350  ;;  %3567 = vmatprep.mubr.f32.mxu1 %v3108_v8  ;;  %v3141_v35 = vsel %vm257_vm0, %v2437_v9, %v5347_v30  ;;  %v3109_v47 = vsel %vm257_vm0, %v2372_v21, %v5348_v52  ;;  %v8277_v9 = vld [vmem:[#allocation37_spill] sm:$0xff] }
 0x31d   : > { %v5352_v56 = vunpack.i.l.bf16 %v5351_v48  ;;  %v5356_v36 = vpop.permute.xlu0 %5355  ;;  %v5353_v29 = vunpack.i.h.bf16 %v5351_v48  ;;  %v2375_v48 = vld [vmem:[#allocation3 + $0x39] sm:$0xff] }
 0x31e   : > { %v5357_v46 = vunpack.i.l.bf16 %v5356_v36  ;;  %v5358_v61 = vunpack.i.h.bf16 %v5356_v36 }
 0x31f   : > { %3568 = vmatmul.mubr.f32.gmra.mrb[94].mxu1 %v3076_v44  ;;  %v3142_v31 = vsel %vm257_vm0, %v2438_v0, %v5352_v56  ;;  %v3110_v40 = vsel %vm257_vm0, %v2373_v50, %v5353_v29 }
 0x320   : > { %3637 = vmatprep.mubr.f32.mxu1 %v3141_v35  ;;  %v7787_v58 = vpop.f32.mrb[70].mxu0  ;;  %v5361_v19 = vpop.permute.xlu1 %5360  ;;  %v3143_v13 = vsel %vm257_vm0, %v2439_v32, %v5357_v46  ;;  %v3111_v2 = vsel %vm257_vm0, %v2374_v37, %v5358_v61  ;;  %v2378_v37 = vld [vmem:[#allocation3 + $0x61] sm:$0xff] }
 0x321   : > { %v7790_v38 = vpop.f32.mrb[71].mxu0  ;;  %v5362_v11 = vunpack.i.l.bf16 %v5361_v19  ;;  %v5366_v62 = vpop.permute.xlu0 %5365 }
 0x322   : > { %v5367_v30 = vunpack.i.l.bf16 %v5366_v62  ;;  %v5368_v56 = vunpack.i.h.bf16 %v5366_v62 }
 0x323   : > { %3638 = vmatmul.mubr.f32.vlgmr.msra.gmra.mrb[32].mxu1 %v3109_v47  ;;  %v3144_v44 = vsel %vm257_vm0, %v2440_v22, %v5362_v11  ;;  %v2376_v47 = vld [vmem:[#allocation3 + $0x49] sm:$0xff] }
 0x324   : > { %4657 = vmatpush3.bf16.msra.mxu1 %v8271_v59  ;;  %3642 = vmatprep.mubr.f32.mxu1 %v3142_v31  ;;  %v5363_v59 = vunpack.i.h.bf16 %v5361_v19  ;;  %v5371_v52 = vpop.permute.xlu1 %5370  ;;  %v3145_v21 = vsel %vm257_vm0, %v7512_v39, %v5367_v30  ;;  %v3113_v31 = vsel %vm257_vm0, %v2376_v47, %v5368_v56  ;;  %v2377_v39 = vld [vmem:[#allocation3 + $0x51] sm:$0xff] }
 0x325   : > { %4654 = vmatprep.subr.bf16.mxu1 %v8275_v53  ;;  %v5372_v36 = vunpack.i.l.bf16 %v5371_v52  ;;  %v5376_v29 = vpop.permute.xlu0 %5375  ;;  %v5373_v0 = vunpack.i.h.bf16 %v5371_v52  ;;  %v2379_v52 = vld [vmem:[#allocation3 + $0x69] sm:$0xff] }
 0x326   : > { %v3112_v35 = vsel %vm257_vm0, %v2375_v48, %v5363_v59  ;;  %v5377_v19 = vunpack.i.l.bf16 %v5376_v29 }
 0x327   : > { %3643 = vmatmul.mubr.f32.gmra.mrb[34].mxu1 %v3110_v40  ;;  %v5378_v40 = vunpack.i.h.bf16 %v5376_v29  ;;  %v3114_v32 = vsel %vm257_vm0, %v2377_v39, %v5373_v0 }
 0x328   : > { %3647 = vmatprep.mubr.f32.mxu1 %v3143_v13  ;;  %4658 = vmatpush3.bf16.msra.mxu1 %v8275_v53  ;;  %v7799_v6 = vpop.f32.mrb[72].mxu0  ;;  %v3146_v53 = vsel %vm257_vm0, %v7533_v7, %v5372_v36  ;;  %v5381_v61 = vpop.permute.xlu1 %5380  ;;  %v3147_v13 = vsel %vm257_vm0, %v7553_v45, %v5377_v19  ;;  %v2380_v36 = vld [vmem:[#allocation3 + $0x79] sm:$0xff] }
 0x329   : > { %4655 = vmatprep.subr.bf16.mxu1 %v8276_v4  ;;  %v7802_v8 = vpop.f32.mrb[73].mxu0  ;;  %v5382_v11 = vunpack.i.l.bf16 %v5381_v61  ;;  %v5386_v62 = vpop.permute.xlu0 %5385 }
 0x32a   : > { %v5387_v7 = vunpack.i.l.bf16 %v5386_v62  ;;  %v5388_v48 = vunpack.i.h.bf16 %v5386_v62 }
 0x32b   : > { %3648 = vmatmul.mubr.f32.gmra.mrb[36].mxu1 %v3111_v2  ;;  %v3115_v2 = vsel %vm257_vm0, %v2378_v37, %v5378_v40  ;;  %v3148_v30 = vsel %vm257_vm0, %v7573_v17, %v5382_v11  ;;  %v2382_v11 = vld [vmem:[#allocation3 + $0x91] sm:$0xff] }
 0x32c   : > { %3652 = vmatprep.mubr.f32.mxu1 %v3144_v44  ;;  %4659 = vmatpush3.bf16.msra.mxu1 %v8276_v4  ;;  %v5383_v4 = vunpack.i.h.bf16 %v5381_v61  ;;  %v5391_v44 = vpop.permute.xlu1 %5390  ;;  %v3149_v56 = vsel %vm257_vm0, %v7593_v18, %v5387_v7  ;;  %v3117_v47 = vsel %vm257_vm0, %v2380_v36, %v5388_v48 }
 0x32d   : > { %4656 = vmatprep.subr.bf16.mxu1 %v8277_v9 }
 0x32e   : > { %v3116_v45 = vsel %vm257_vm0, %v2379_v52, %v5383_v4 }
 0x32f   : > { %3653 = vmatmul.mubr.f32.gmra.mrb[38].mxu1 %v3112_v35  ;;  %v5396_v35 = vpop.permute.xlu0 %5395 }
 0x330   : > { %3657 = vmatprep.mubr.f32.mxu1 %v3145_v21  ;;  %4660 = vmatpush3.bf16.msra.mxu1 %v8277_v9  ;;  %v7811_v46 = vpop.f32.mrb[74].mxu0  ;;  %v5392_v9 = vunpack.i.l.bf16 %v5391_v44  ;;  %v5393_v21 = vunpack.i.h.bf16 %v5391_v44  ;;  %v5397_v17 = vunpack.i.l.bf16 %v5396_v35  ;;  %v5401_v19 = vpop.permute.xlu1 %5400  ;;  %v5398_v61 = vunpack.i.h.bf16 %v5396_v35 }
 0x331   : > { %v7814_v50 = vpop.f32.mrb[75].mxu0  ;;  %v5402_v39 = vunpack.i.l.bf16 %v5401_v19 }
 0x332   : > { %v3151_v40 = vsel %vm257_vm0, %v7636_v25, %v5397_v17  ;;  %v3119_v37 = vsel %vm257_vm0, %v2382_v11, %v5398_v61 }
 0x333   : > { %3658 = vmatmul.mubr.f32.gmra.mrb[40].mxu1 %v3113_v31  ;;  %v3150_v31 = vsel %vm257_vm0, %v7614_v49, %v5392_v9  ;;  %v2384_v9 = vld [vmem:[#allocation3 + $0xa9] sm:$0xff] }
 0x334   : > { %3662 = vmatprep.mubr.f32.mxu1 %v3146_v53  ;;  %v2381_v53 = vld [vmem:[#allocation3 + $0x81] sm:$0xff]  ;;  %v5411_v7 = vpop.permute.xlu1 %5410 }
 0x335   : > { %v3118_v18 = vsel %vm257_vm0, %v2381_v53, %v5393_v21  ;;  %v5412_v52 = vunpack.i.l.bf16 %v5411_v7 }
 0x337   : > { %3663 = vmatmul.mubr.f32.gmra.mrb[42].mxu1 %v3114_v32  ;;  %v5406_v32 = vpop.permute.xlu0 %5405 }
 0x338   : > { %3667 = vmatprep.mubr.f32.mxu1 %v3147_v13  ;;  %v7821_v59 = vpop.f32.mrb[76].mxu0  ;;  %v5403_v13 = vunpack.i.h.bf16 %v5401_v19  ;;  %v5407_v49 = vunpack.i.l.bf16 %v5406_v32  ;;  %v5408_v44 = vunpack.i.h.bf16 %v5406_v32  ;;  %v5421_v17 = vpop.permute.xlu1 %5420 }
 0x339   : > { %v7824_v22 = vpop.f32.mrb[77].mxu0  ;;  %v5422_v53 = vunpack.i.l.bf16 %v5421_v17 }
 0x33a   : > { %v3153_v48 = vsel %vm257_vm0, %v7680_v33, %v5407_v49  ;;  %v3121_v36 = vsel %vm257_vm0, %v2384_v9, %v5408_v44  ;;  %v2388_v44 = vld [vmem:[#allocation3 + $0xd9] sm:$0xff]  ;;  %v2389_v9 = vld [vmem:[#allocation3 + $0xe1] sm:$0xff] }
 0x33b   : > { %3668 = vmatmul.mubr.f32.gmra.mrb[44].mxu1 %v3115_v2  ;;  %v3152_v2 = vsel %vm257_vm0, %v7660_v26, %v5402_v39  ;;  %v2386_v39 = vld [vmem:[#allocation3 + $0xc1] sm:$0xff] }
 0x33c   : > { %3672 = vmatprep.mubr.f32.mxu1 %v3148_v30  ;;  %v2383_v30 = vld [vmem:[#allocation3 + $0x99] sm:$0xff] }
 0x33d   : > { %v3120_v25 = vsel %vm257_vm0, %v2383_v30, %v5403_v13  ;;  %v5431_v13 = vpop.permute.xlu1 %5430 }
 0x33f   : > { %3673 = vmatmul.mubr.f32.gmra.mrb[46].mxu1 %v3116_v45  ;;  %v5416_v45 = vpop.permute.xlu0 %5415 }
 0x340   : > { %3677 = vmatprep.mubr.f32.mxu1 %v3149_v56  ;;  %v7831_v29 = vpop.f32.mrb[78].mxu0  ;;  %v5413_v56 = vunpack.i.h.bf16 %v5411_v7  ;;  %v5417_v26 = vunpack.i.l.bf16 %v5416_v45  ;;  %v5418_v19 = vunpack.i.h.bf16 %v5416_v45  ;;  %v5432_v7 = vunpack.i.l.bf16 %v5431_v13 }
 0x341   : > { %v7834_v0 = vpop.f32.mrb[79].mxu0  ;;  %v5441_v45 = vpop.permute.xlu1 %5440 }
 0x342   : > { %v3155_v61 = vsel %vm257_vm0, %v7702_v1, %v5417_v26  ;;  %v3123_v32 = vsel %vm257_vm0, %v2386_v39, %v5418_v19  ;;  %v5442_v26 = vunpack.i.l.bf16 %v5441_v45 }
 0x343   : > { %3678 = vmatmul.mubr.f32.gmra.mrb[48].mxu1 %v3117_v47  ;;  %v3154_v47 = vsel %vm257_vm0, %v7695_v42, %v5412_v52  ;;  %v3156_v42 = vsel %vm257_vm0, %v7707_v23, %v5422_v53  ;;  %v3158_v23 = vsel %vm257_vm0, %v7717_v27, %v5432_v7 }
 0x344   : > { %3682 = vmatprep.mubr.f32.mxu1 %v3150_v31  ;;  %v2385_v31 = vld [vmem:[#allocation3 + $0xb1] sm:$0xff]  ;;  %v3160_v27 = vsel %vm257_vm0, %v7727_v54, %v5442_v26 }
 0x345   : > { %v3122_v33 = vsel %vm257_vm0, %v2385_v31, %v5413_v56  ;;  %v5443_v31 = vunpack.i.h.bf16 %v5441_v45  ;;  %v5451_v53 = vpop.permute.xlu1 %5450  ;;  %v2461_v26 = vld [vmem:[#allocation3 + $0x150] sm:$0xff] }
 0x347   : > { %3683 = vmatmul.mubr.f32.gmra.mrb[50].mxu1 %v3118_v18  ;;  %v5426_v18 = vpop.permute.xlu0 %5425 }
 0x348   : > { %3687 = vmatprep.mubr.f32.mxu1 %v3151_v40  ;;  %v5423_v40 = vunpack.i.h.bf16 %v5421_v17  ;;  %v5427_v11 = vunpack.i.l.bf16 %v5426_v18  ;;  %v5428_v49 = vunpack.i.h.bf16 %v5426_v18  ;;  %v2390_v17 = vld [vmem:[#allocation3 + $0xf1] sm:$0xff] }
 0x349   : > { %v7841_v62 = vpop.f32.mrb[80].mxu0 }
 0x34a   : > { %v7844_v4 = vpop.f32.mrb[81].mxu0  ;;  %v3157_v1 = vsel %vm257_vm0, %v7712_v60, %v5427_v11  ;;  %v3125_v52 = vsel %vm257_vm0, %v2388_v44, %v5428_v49  ;;  %v2392_v11 = vld [vmem:[#allocation3 + $0x109] sm:$0xff]  ;;  %v5461_v49 = vpop.permute.xlu1 %5460 }
 0x34b   : > { %3688 = vmatmul.mubr.f32.gmra.mrb[52].mxu1 %v3119_v37  ;;  %v2387_v37 = vld [vmem:[#allocation3 + $0xc9] sm:$0xff]  ;;  %v5436_v30 = vpop.permute.xlu0 %5435 }
 0x34c   : > { %3692 = vmatprep.mubr.f32.mxu1 %v3152_v2  ;;  %v3124_v2 = vsel %vm257_vm0, %v2387_v37, %v5423_v40  ;;  %v5438_v56 = vunpack.i.h.bf16 %v5436_v30  ;;  %v5452_v40 = vunpack.i.l.bf16 %v5451_v53 }
 0x34e   : > { %v3127_v19 = vsel %vm257_vm0, %v2390_v17, %v5438_v56  ;;  %v3162_v54 = vsel %vm257_vm0, %v7738_v24, %v5452_v40  ;;  %v5471_v45 = vpop.permute.xlu1 %5470  ;;  %v2396_v17 = vld [vmem:[#allocation3 + $0x139] sm:$0xff]  ;;  %v2463_v40 = vld [vmem:[#allocation3 + $0x168] sm:$0xff] }
 0x34f   : > { %3693 = vmatmul.mubr.f32.gmra.mrb[54].mxu1 %v3120_v25  ;;  %v5433_v25 = vunpack.i.h.bf16 %v5431_v13 }
 0x350   : > { %3697 = vmatprep.mubr.f32.mxu1 %v3153_v48  ;;  %v7851_v35 = vpop.f32.mrb[82].mxu0  ;;  %v5437_v48 = vunpack.i.l.bf16 %v5436_v30  ;;  %v5462_v30 = vunpack.i.l.bf16 %v5461_v49 }
 0x351   : > { %v7854_v21 = vpop.f32.mrb[83].mxu0 }
 0x352   : > { %v3159_v60 = vsel %vm257_vm0, %v7722_v15, %v5437_v48  ;;  %v3164_v24 = vsel %vm257_vm0, %v7754_v43, %v5462_v30 }
 0x353   : > { %3698 = vmatmul.mubr.f32.gmra.mrb[56].mxu1 %v3121_v36  ;;  %v3126_v36 = vsel %vm257_vm0, %v2389_v9, %v5433_v25  ;;  %v2394_v25 = vld [vmem:[#allocation3 + $0x121] sm:$0xff]  ;;  %v2395_v9 = vld [vmem:[#allocation3 + $0x129] sm:$0xff] }
 0x354   : > { %3702 = vmatprep.mubr.f32.mxu1 %v3154_v47  ;;  %v5446_v47 = vpop.permute.xlu0 %5445 }
 0x355   : > { %v5448_v18 = vunpack.i.h.bf16 %v5446_v47 }
 0x357   : > { %3703 = vmatmul.mubr.f32.gmra.mrb[58].mxu1 %v3122_v33  ;;  %v5447_v33 = vunpack.i.l.bf16 %v5446_v47  ;;  %v3129_v13 = vsel %vm257_vm0, %v2392_v11, %v5448_v18 }
 0x358   : > { %3707 = vmatprep.mubr.f32.mxu1 %v3155_v61  ;;  %v2391_v61 = vld [vmem:[#allocation3 + $0xf9] sm:$0xff] }
 0x359   : > { %v3128_v39 = vsel %vm257_vm0, %v2391_v61, %v5443_v31  ;;  %v3161_v15 = vsel %vm257_vm0, %v7732_v34, %v5447_v33  ;;  %v5473_v31 = vunpack.i.h.bf16 %v5471_v45  ;;  %v2462_v33 = vld [vmem:[#allocation3 + $0x158] sm:$0xff]  ;;  %v2397_v61 = vld [vmem:[#allocation3 + $0x141] sm:$0xff] }
 0x35b   : > { %3708 = vmatmul.mubr.f32.gmra.mrb[60].mxu1 %v3123_v32  ;;  %v5456_v32 = vpop.permute.xlu0 %5455 }
 0x35c   : > { %3712 = vmatprep.mubr.f32.mxu1 %v3156_v42  ;;  %v5453_v42 = vunpack.i.h.bf16 %v5451_v53  ;;  %v5457_v37 = vunpack.i.l.bf16 %v5456_v32  ;;  %v5458_v7 = vunpack.i.h.bf16 %v5456_v32  ;;  %v5481_v53 = vpop.permute.xlu1 %5480 }
 0x35e   : > { %v3163_v34 = vsel %vm257_vm0, %v7744_v14, %v5457_v37  ;;  %v3131_v48 = vsel %vm257_vm0, %v2394_v25, %v5458_v7  ;;  %v2399_v7 = vld [vmem:[#allocation3 + $0x159] sm:$0xff] }
 0x35f   : > { %3713 = vmatmul.mubr.f32.gmra.mrb[62].mxu1 %v3124_v2  ;;  %v2393_v2 = vld [vmem:[#allocation3 + $0x111] sm:$0xff]  ;;  %v5466_v44 = vpop.permute.xlu0 %5465 }
 0x360   : > { %3717 = vmatprep.mubr.f32.mxu1 %v3157_v1  ;;  %v3130_v1 = vsel %vm257_vm0, %v2393_v2, %v5453_v42  ;;  %v5468_v56 = vunpack.i.h.bf16 %v5466_v44  ;;  %v2398_v42 = vld [vmem:[#allocation3 + $0x151] sm:$0xff]  ;;  %v5491_v2 = vpop.permute.xlu1 %5490 }
 0x363   : > { %3718 = vmatmul.mubr.f32.gmra.mrb[64].mxu1 %v3125_v52  ;;  %v5463_v52 = vunpack.i.h.bf16 %v5461_v49  ;;  %v5476_v47 = vpop.permute.xlu0 %5475 }
 0x364   : > { %3722 = vmatprep.mubr.f32.mxu1 %v3158_v23  ;;  %v5467_v23 = vunpack.i.l.bf16 %v5466_v44  ;;  %v5478_v18 = vunpack.i.h.bf16 %v5476_v47  ;;  %v5492_v44 = vunpack.i.l.bf16 %v5491_v2 }
 0x366   : > { %v3165_v14 = vsel %vm257_vm0, %v2461_v26, %v5467_v23  ;;  %v3135_v37 = vsel %vm257_vm0, %v2398_v42, %v5478_v18  ;;  %v5493_v23 = vunpack.i.h.bf16 %v5491_v2  ;;  %v2401_v26 = vld [vmem:[#allocation3 + $0x171] sm:$0xff]  ;;  %v2523_v18 = vld [vmem:[#allocation3 + $0x13a] sm:$0xff] }
 0x367   : > { %3723 = vmatmul.mubr.f32.gmra.mrb[66].mxu1 %v3126_v36  ;;  %v3132_v36 = vsel %vm257_vm0, %v2395_v9, %v5463_v52  ;;  %v5486_v11 = vpop.permute.xlu0 %5485 }
 0x368   : > { %3727 = vmatprep.mubr.f32.mxu1 %v3159_v60  ;;  %v5472_v60 = vunpack.i.l.bf16 %v5471_v45  ;;  %v2466_v45 = vld [vmem:[#allocation3 + $0x188] sm:$0xff] }
 0x36a   : > { %v3166_v43 = vsel %vm257_vm0, %v2462_v33, %v5472_v60 }
 0x36b   : > { %3728 = vmatmul.mubr.f32.gmra.mrb[68].mxu1 %v3127_v19  ;;  %v3133_v19 = vsel %vm257_vm0, %v2396_v17, %v5468_v56  ;;  %v5496_v52 = vpop.permute.xlu0 %5495  ;;  %v5501_v56 = vpop.permute.xlu1 %5500 }
 0x36c   : > { %3732 = vmatprep.mubr.f32.mxu1 %v3160_v27  ;;  %v5477_v27 = vunpack.i.l.bf16 %v5476_v47  ;;  %v5497_v9 = vunpack.i.l.bf16 %v5496_v52  ;;  %v5498_v60 = vunpack.i.h.bf16 %v5496_v52  ;;  %v5502_v47 = vunpack.i.l.bf16 %v5501_v56 }
 0x36e   : > { %v3167_v32 = vsel %vm257_vm0, %v2463_v40, %v5477_v27  ;;  %v3139_v33 = vsel %vm257_vm0, %v7656_v16, %v5498_v60  ;;  %v2525_v16 = vld [vmem:[#allocation3 + $0x152] sm:$0xff]  ;;  %v2526_v40 = vld [vmem:[#allocation3 + $0x15a] sm:$0xff] }
 0x36f   : > { %3733 = vmatmul.mubr.f32.gmra.mrb[70].mxu1 %v3128_v39  ;;  %v3134_v39 = vsel %vm257_vm0, %v2397_v61, %v5473_v31  ;;  %v2468_v31 = vld [vmem:[#allocation3 + $0x1a0] sm:$0xff]  ;;  %v2522_v61 = vld [vmem:[#allocation3 + $0x12a] sm:$0xff] }
 0x370   : > { %3737 = vmatprep.mubr.f32.mxu1 %v3161_v15  ;;  %v5482_v15 = vunpack.i.l.bf16 %v5481_v53  ;;  %v3172_v27 = vsel %vm257_vm0, %v2468_v31, %v5502_v47 }
 0x372   : > { %v3168_v49 = vsel %vm257_vm0, %v7780_v63, %v5482_v15  ;;  %v3170_v63 = vsel %vm257_vm0, %v2466_v45, %v5492_v44  ;;  %v2531_v15 = vld [vmem:[#allocation3 + $0x19a] sm:$0xff] }
 0x373   : > { %3738 = vmatmul.mubr.f32.gmra.mrb[72].mxu1 %v3129_v13  ;;  %v5483_v13 = vunpack.i.h.bf16 %v5481_v53  ;;  %v2521_v53 = vld [vmem:[#allocation3 + $0x122] sm:$0xff] }
 0x374   : > { %3742 = vmatprep.mubr.f32.mxu1 %v3162_v54  ;;  %v5487_v54 = vunpack.i.l.bf16 %v5486_v11 }
 0x375   : > { %v3136_v30 = vsel %vm257_vm0, %v2399_v7, %v5483_v13 }
 0x377   : > { %3743 = vmatmul.mubr.f32.gmra.mrb[74].mxu1 %v3130_v1  ;;  %v5488_v1 = vunpack.i.h.bf16 %v5486_v11  ;;  %v7926_v11 = vld [vmem:[%s8090_s4] ss:$0 sm:$0xff] }
 0x378   : > { %3747 = vmatprep.mubr.f32.mxu1 %v3163_v34  ;;  %v2465_v34 = vld [vmem:[#allocation3 + $0x180] sm:$0xff] }
 0x379   : > { %v3169_v25 = vsel %vm257_vm0, %v2465_v34, %v5487_v54 }
 0x37b   : > { %3748 = vmatmul.mubr.f32.gmra.mrb[76].mxu1 %v3131_v48  ;;  %v2400_v48 = vld [vmem:[#allocation3 + $0x169] sm:$0xff] }
 0x37c   : > { %3752 = vmatprep.mubr.f32.mxu1 %v3164_v24  ;;  %v3137_v24 = vsel %vm257_vm0, %v2400_v48, %v5488_v1  ;;  %v8279_v1 = vld [vmem:[#allocation5_spill] sm:$0xff]  ;;  %v8280_v48 = vld [vmem:[#allocation6_spill] sm:$0xff] }
 0x37f   : > { %3753 = vmatmul.mubr.f32.gmra.mrb[78].mxu1 %v3132_v36  ;;  %v2467_v36 = vld [vmem:[#allocation3 + $0x198] sm:$0xff] }
 0x380   : > { %3757 = vmatprep.mubr.f32.mxu1 %v3165_v14  ;;  %v3138_v14 = vsel %vm257_vm0, %v2401_v26, %v5493_v23  ;;  %v3171_v17 = vsel %vm257_vm0, %v2467_v36, %v5497_v9 }
 0x383   : > { %3758 = vmatmul.mubr.f32.gmra.mrb[80].mxu1 %v3133_v19  ;;  %v5503_v19 = vunpack.i.h.bf16 %v5501_v56 }
 0x384   : > { %3762 = vmatprep.mubr.f32.mxu1 %v3166_v43 }
 0x385   : > { %v3140_v43 = vsel %vm257_vm0, %v7674_v51, %v5503_v19  ;;  %v2527_v51 = vld [vmem:[#allocation3 + $0x16a] sm:$0xff] }
 0x387   : > { %3763 = vmatmul.mubr.f32.gmra.mrb[82].mxu1 %v3134_v39  ;;  %v2524_v39 = vld [vmem:[#allocation3 + $0x142] sm:$0xff] }
 0x388   : > { %3767 = vmatprep.mubr.f32.mxu1 %v3167_v32  ;;  %v2532_v32 = vld [vmem:[#allocation3 + $0x1a2] sm:$0xff] }
 0x38b   : > { %3768 = vmatmul.mubr.f32.gmra.mrb[84].mxu1 %v3135_v37  ;;  %v8278_v37 = vld [vmem:[#allocation4_spill] sm:$0xff] }
 0x38c   : > { %3772 = vmatprep.mubr.f32.mxu1 %v3168_v49 }
 0x38f   : > { %3773 = vmatmul.mubr.f32.gmra.mrb[86].mxu1 %v3136_v30 }
 0x390   : > { %3777 = vmatprep.mubr.f32.mxu1 %v3169_v25 }
 0x393   : > { %3778 = vmatmul.mubr.f32.gmra.mrb[88].mxu1 %v3137_v24 }
 0x394   : > { %3782 = vmatprep.mubr.f32.mxu1 %v3170_v63  ;;  %v8281_v63 = vld [vmem:[#allocation7_spill] sm:$0xff] }
 0x397   : > { %3783 = vmatmul.mubr.f32.gmra.mrb[90].mxu1 %v3138_v14  ;;  %v8282_v14 = vld [vmem:[#allocation8_spill] sm:$0xff] }
 0x398   : > { %3787 = vmatprep.mubr.f32.mxu1 %v3171_v17 }
 0x39b   : > { %3788 = vmatmul.mubr.f32.gmra.mrb[92].mxu1 %v3139_v33  ;;  %v8283_v33 = vld [vmem:[#allocation9_spill] sm:$0xff] }
 0x39c   : > { %3792 = vmatprep.mubr.f32.mxu1 %v3172_v27 }
 0x39f   : > { %3793 = vmatmul.mubr.f32.gmra.mrb[94].mxu1 %v3140_v43 }
 0x3a0   : > { %4411 = vmatprep.mubr.msk.f32.mxu1 %vm257_vm0, %v2521_v53 }
 0x3a3   : > { %4412 = vmatmul.mubr.msk.f32.vlgmr.msra.gmra.mrb[96].mxu1 %vm257_vm0, %v2522_v61 }
 0x3a4   : > { %4414 = vmatprep.mubr.msk.f32.mxu1 %vm257_vm0, %v2523_v18  ;;  %v8284_v18 = vld [vmem:[#allocation10_spill] sm:$0xff] }
 0x3a7   : > { %4415 = vmatmul.mubr.msk.f32.gmra.mrb[98].mxu1 %vm257_vm0, %v2524_v39 }
 0x3a8   : > { %4417 = vmatprep.mubr.msk.f32.mxu1 %vm257_vm0, %v2525_v16 }
 0x3ab   : > { %4418 = vmatmul.mubr.msk.f32.gmra.mrb[100].mxu1 %vm257_vm0, %v2526_v40 }
 0x3ac   : > { %4420 = vmatprep.mubr.msk.f32.mxu1 %vm257_vm0, %v2527_v51 }
 0x3af   : > { %4421 = vmatmul.mubr.msk.f32.gmra.mrb[102].mxu1 %vm257_vm0, %v7685_v12 }
 0x3b0   : > { %4423 = vmatprep.mubr.msk.f32.mxu1 %vm257_vm0, %v7676_v55 }
 0x3b3   : > { %4424 = vmatmul.mubr.msk.f32.gmra.mrb[104].mxu1 %vm257_vm0, %v7691_v3 }
 0x3b4   : > { %4426 = vmatprep.mubr.msk.f32.mxu1 %vm257_vm0, %v2531_v15  ;;  %v8285_v15 = vld [vmem:[#allocation11_spill] sm:$0xff] }
 0x3b7   : > { %4427 = vmatmul.mubr.msk.f32.gmra.mrb[106].mxu1 %vm257_vm0, %v2532_v32 }
 0x3f6   : > { %v3639_v42 = vpop.f32.mrb[32].mxu1 }
 0x3f7   : > { %v4693_v12 = vadd.f32 %v7926_v11, %v3639_v42  ;;  %v3641_v13 = vpop.f32.mrb[33].mxu1 }
 0x3f9   : > { %v3865_v55 = vadd.f32 %v4693_v12, %v7752_v57 }
 0x3fa   : > { %v3644_v3 = vpop.f32.mrb[34].mxu1 }
 0x3fb   : > { %v4023_v54 = vadd.f32 %v3865_v55, %v8278_v37  ;;  %v4694_v49 = vadd.f32 %v7926_v11, %v3644_v3  ;;  %v3646_v2 = vpop.f32.mrb[35].mxu1  ;;  %v8286_v55 = vld [vmem:[#allocation12_spill] sm:$0xff] }
 0x3fc   : > { %v8287_v2 = vld [vmem:[#allocation13_spill] sm:$0xff] }
 0x3fd   : > { %4055 = vst.msk [vmem:[%s7935_s24] sm:$0xff] %vm257_vm0, %v4023_v54  ;;  %v3870_v7 = vadd.f32 %v4694_v49, %v7750_v5 }
 0x3fe   : > { %v3649_v57 = vpop.f32.mrb[36].mxu1 }
 0x3ff   : > { %v4024_v30 = vadd.f32 %v3870_v7, %v8279_v1  ;;  %v4695_v34 = vadd.f32 %v7926_v11, %v3649_v57  ;;  %v3651_v44 = vpop.f32.mrb[37].mxu1 }
 0x401   : > { %4056 = vst.msk [vmem:[%s7935_s24 + $0x8] sm:$0xff] %vm257_vm0, %v4024_v30  ;;  %v3875_v25 = vadd.f32 %v4695_v34, %v7766_v28  ;;  %v8288_v34 = vld [vmem:[#allocation14_spill] sm:$0xff] }
 0x402   : > { %v3654_v52 = vpop.f32.mrb[38].mxu1 }
 0x403   : > { %v4025_v23 = vadd.f32 %v3875_v25, %v8280_v48  ;;  %v4696_v24 = vadd.f32 %v7926_v11, %v3654_v52  ;;  %v3656_v45 = vpop.f32.mrb[39].mxu1 }
 0x405   : > { %4057 = vst.msk [vmem:[%s7935_s24 + $0x10] sm:$0xff] %vm257_vm0, %v4025_v23  ;;  %v3880_v5 = vadd.f32 %v4696_v24, %v7764_v41  ;;  %v8289_v23 = vld [vmem:[#allocation15_spill] sm:$0xff] }
 0x406   : > { %v3659_v9 = vpop.f32.mrb[40].mxu1 }
 0x407   : > { %v4026_v56 = vadd.f32 %v3880_v5, %v8281_v63  ;;  %v4697_v36 = vadd.f32 %v7926_v11, %v3659_v9  ;;  %v3661_v26 = vpop.f32.mrb[41].mxu1  ;;  %v8290_v63 = vld [vmem:[#allocation16_spill] sm:$0xff] }
 0x409   : > { %4058 = vst.msk [vmem:[%s7935_s24 + $0x18] sm:$0xff] %vm257_vm0, %v4026_v56  ;;  %v3885_v28 = vadd.f32 %v4697_v36, %v7778_v20 }
 0x40a   : > { %v3664_v60 = vpop.f32.mrb[42].mxu1 }
 0x40b   : > { %v4027_v47 = vadd.f32 %v3885_v28, %v8282_v14  ;;  %v4698_v17 = vadd.f32 %v7926_v11, %v3664_v60  ;;  %v3666_v31 = vpop.f32.mrb[43].mxu1  ;;  %v8291_v60 = vld [vmem:[#allocation17_spill] sm:$0xff] }
 0x40d   : > { %4059 = vst.msk [vmem:[%s7935_s24 + $0x20] sm:$0xff] %vm257_vm0, %v4027_v47  ;;  %v3890_v41 = vadd.f32 %v4698_v17, %v7776_v10 }
 0x40e   : > { %v3669_v19 = vpop.f32.mrb[44].mxu1 }
 0x40f   : > { %v4028_v27 = vadd.f32 %v3890_v41, %v8283_v33  ;;  %v4699_v43 = vadd.f32 %v7926_v11, %v3669_v19  ;;  %v3671_v53 = vpop.f32.mrb[45].mxu1  ;;  %v8292_v41 = vld [vmem:[#allocation18_spill] sm:$0xff] }
 0x410   : > { %v8293_v53 = vld [vmem:[#allocation19_spill] sm:$0xff] }
 0x411   : > { %4060 = vst.msk [vmem:[%s7935_s24 + $0x28] sm:$0xff] %vm257_vm0, %v4028_v27  ;;  %v3895_v20 = vadd.f32 %v4699_v43, %v7790_v38 }
 0x412   : > { %v3674_v61 = vpop.f32.mrb[46].mxu1 }
 0x413   : > { %v4029_v39 = vadd.f32 %v3895_v20, %v8284_v18  ;;  %v4700_v16 = vadd.f32 %v7926_v11, %v3674_v61  ;;  %v3676_v40 = vpop.f32.mrb[47].mxu1 }
 0x415   : > { %4061 = vst.msk [vmem:[%s7935_s24 + $0x30] sm:$0xff] %vm257_vm0, %v4029_v39  ;;  %v3900_v10 = vadd.f32 %v4700_v16, %v7787_v58  ;;  %v8294_v16 = vld [vmem:[#allocation20_spill] sm:$0xff] }
 0x416   : > { %v3679_v51 = vpop.f32.mrb[48].mxu1 }
 0x417   : > { %v4030_v32 = vadd.f32 %v3900_v10, %v8285_v15  ;;  %v4701_v42 = vadd.f32 %v7926_v11, %v3679_v51  ;;  %v3681_v12 = vpop.f32.mrb[49].mxu1 }
 0x419   : > { %4062 = vst.msk [vmem:[%s7935_s24 + $0x38] sm:$0xff] %vm257_vm0, %v4030_v32  ;;  %v3905_v38 = vadd.f32 %v4701_v42, %v7802_v8  ;;  %v8295_v32 = vld [vmem:[#allocation21_spill] sm:$0xff] }
 0x41a   : > { %v3684_v13 = vpop.f32.mrb[50].mxu1 }
 0x41b   : > { %v4031_v3 = vadd.f32 %v3905_v38, %v8286_v55  ;;  %v4702_v37 = vadd.f32 %v7926_v11, %v3684_v13  ;;  %v3686_v54 = vpop.f32.mrb[51].mxu1  ;;  %v8296_v55 = vld [vmem:[#allocation22_spill] sm:$0xff] }
 0x41d   : > { %4063 = vst.msk [vmem:[%s7935_s24 + $0x40] sm:$0xff] %vm257_vm0, %v4031_v3  ;;  %v3910_v58 = vadd.f32 %v4702_v37, %v7799_v6 }
 0x41e   : > { %v3689_v49 = vpop.f32.mrb[52].mxu1 }
 0x41f   : > { %v4032_v7 = vadd.f32 %v3910_v58, %v8287_v2  ;;  %v4703_v57 = vadd.f32 %v7926_v11, %v3689_v49  ;;  %v3691_v1 = vpop.f32.mrb[53].mxu1  ;;  %v8297_v49 = vld [vmem:[#allocation23_spill] sm:$0xff] }
 0x421   : > { %4064 = vst.msk [vmem:[%s7935_s24 + $0x48] sm:$0xff] %vm257_vm0, %v4032_v7  ;;  %v3915_v8 = vadd.f32 %v4703_v57, %v7814_v50 }
 0x422   : > { %v3694_v30 = vpop.f32.mrb[54].mxu1 }
 0x423   : > { %v4033_v44 = vadd.f32 %v3915_v8, %v8288_v34  ;;  %v4704_v25 = vadd.f32 %v7926_v11, %v3694_v30  ;;  %v3696_v52 = vpop.f32.mrb[55].mxu1 }
 0x425   : > { %4065 = vst.msk [vmem:[%s7935_s24 + $0x50] sm:$0xff] %vm257_vm0, %v4033_v44  ;;  %v3920_v6 = vadd.f32 %v4704_v25, %v7811_v46 }
 0x426   : > { %v3699_v48 = vpop.f32.mrb[56].mxu1 }
 0x427   : > { %v4034_v24 = vadd.f32 %v3920_v6, %v8289_v23  ;;  %v4705_v45 = vadd.f32 %v7926_v11, %v3699_v48  ;;  %v3701_v5 = vpop.f32.mrb[57].mxu1 }
 0x429   : > { %4066 = vst.msk [vmem:[%s7935_s24 + $0x58] sm:$0xff] %vm257_vm0, %v4034_v24  ;;  %v3925_v50 = vadd.f32 %v4705_v45, %v7824_v22 }
 0x42a   : > { %v3704_v9 = vpop.f32.mrb[58].mxu1 }
 0x42b   : > { %v4035_v56 = vadd.f32 %v3925_v50, %v8290_v63  ;;  %v4706_v36 = vadd.f32 %v7926_v11, %v3704_v9  ;;  %v3706_v26 = vpop.f32.mrb[59].mxu1 }
 0x42d   : > { %4067 = vst.msk [vmem:[%s7935_s24 + $0x60] sm:$0xff] %vm257_vm0, %v4035_v56  ;;  %v3930_v46 = vadd.f32 %v4706_v36, %v7821_v59 }
 0x42e   : > { %v3709_v28 = vpop.f32.mrb[60].mxu1 }
 0x42f   : > { %v4036_v14 = vadd.f32 %v3930_v46, %v8291_v60  ;;  %v4707_v47 = vadd.f32 %v7926_v11, %v3709_v28  ;;  %v3711_v17 = vpop.f32.mrb[61].mxu1 }
 0x431   : > { %4068 = vst.msk [vmem:[%s7935_s24 + $0x68] sm:$0xff] %vm257_vm0, %v4036_v14  ;;  %v3935_v22 = vadd.f32 %v4707_v47, %v7834_v0 }
 0x432   : > { %v3714_v31 = vpop.f32.mrb[62].mxu1 }
 0x433   : > { %v4037_v19 = vadd.f32 %v3935_v22, %v8292_v41  ;;  %v4708_v33 = vadd.f32 %v7926_v11, %v3714_v31  ;;  %v3716_v27 = vpop.f32.mrb[63].mxu1  ;;  %v8298_v31 = vld [vmem:[#allocation25_spill] sm:$0xff] }
 0x435   : > { %4069 = vst.msk [vmem:[%s7935_s24 + $0x70] sm:$0xff] %vm257_vm0, %v4037_v19  ;;  %v3940_v59 = vadd.f32 %v4708_v33, %v7831_v29  ;;  %v8299_v33 = vld [vmem:[#allocation24_spill] sm:$0xff] }
 0x436   : > { %v3719_v43 = vpop.f32.mrb[64].mxu1 }
 0x437   : > { %v4038_v20 = vadd.f32 %v3940_v59, %v8293_v53  ;;  %v4709_v61 = vadd.f32 %v7926_v11, %v3719_v43  ;;  %v3721_v18 = vpop.f32.mrb[65].mxu1 }
 0x438   : > { %v8300_v18 = vld [vmem:[#allocation27_spill] sm:$0xff] }
 0x439   : > { %4070 = vst.msk [vmem:[%s7935_s24 + $0x78] sm:$0xff] %vm257_vm0, %v4038_v20  ;;  %v3945_v0 = vadd.f32 %v4709_v61, %v7844_v4 }
 0x43a   : > { %v3724_v39 = vpop.f32.mrb[66].mxu1 }
 0x43b   : > { %v4039_v40 = vadd.f32 %v3945_v0, %v8294_v16  ;;  %v4710_v10 = vadd.f32 %v7926_v11, %v3724_v39  ;;  %v3726_v51 = vpop.f32.mrb[67].mxu1  ;;  %v8301_v16 = vld [vmem:[#allocation26_spill] sm:$0xff] }
 0x43d   : > { %4071 = vst.msk [vmem:[%s7935_s24 + $0x80] sm:$0xff] %vm257_vm0, %v4039_v40  ;;  %v3950_v29 = vadd.f32 %v4710_v10, %v7841_v62 }
 0x43e   : > { %v3729_v15 = vpop.f32.mrb[68].mxu1 }
 0x43f   : > { %v4040_v42 = vadd.f32 %v3950_v29, %v8295_v32  ;;  %v4711_v12 = vadd.f32 %v7926_v11, %v3729_v15  ;;  %v3731_v38 = vpop.f32.mrb[69].mxu1 }
 0x441   : > { %4072 = vst.msk [vmem:[%s7935_s24 + $0x88] sm:$0xff] %vm257_vm0, %v4040_v42  ;;  %v3955_v4 = vadd.f32 %v4711_v12, %v7854_v21  ;;  %v8302_v42 = vld [vmem:[#allocation29_spill] sm:$0xff] }
 0x442   : > { %v3734_v13 = vpop.f32.mrb[70].mxu1 }
 0x443   : > { %v4041_v3 = vadd.f32 %v3955_v4, %v8296_v55  ;;  %v4712_v37 = vadd.f32 %v7926_v11, %v3734_v13  ;;  %v3736_v54 = vpop.f32.mrb[71].mxu1  ;;  %v8303_v4 = vld [vmem:[#allocation28_spill] sm:$0xff] }
 0x445   : > { %4073 = vst.msk [vmem:[%s7935_s24 + $0x90] sm:$0xff] %vm257_vm0, %v4041_v3  ;;  %v3960_v62 = vadd.f32 %v4712_v37, %v7851_v35 }
 0x446   : > { %v3739_v58 = vpop.f32.mrb[72].mxu1 }
 0x447   : > { %v4042_v2 = vadd.f32 %v3960_v62, %v8297_v49  ;;  %v3741_v7 = vpop.f32.mrb[73].mxu1  ;;  %v4713_v28 = vadd.f32 %v7926_v11, %v3739_v58  ;;  %v8304_v58 = vld [vmem:[#allocation32_spill] sm:$0xff] }
 0x448   : > { %v8305_v7 = vld [vmem:[#allocation30_spill] sm:$0xff] }
 0x449   : > { %4074 = vst.msk [vmem:[%s7935_s24 + $0x98] sm:$0xff] %vm257_vm0, %v4042_v2 }
 0x44a   : > { %v3744_v57 = vpop.f32.mrb[74].mxu1 }
 0x44b   : > { %v3746_v1 = vpop.f32.mrb[75].mxu1  ;;  %v4714_v46 = vadd.f32 %v7926_v11, %v3744_v57 }
 0x44e   : > { %v3749_v8 = vpop.f32.mrb[76].mxu1 }
 0x44f   : > { %v3751_v21 = vpop.f32.mrb[77].mxu1  ;;  %v4715_v19 = vadd.f32 %v7926_v11, %v3749_v8 }
 0x452   : > { %v3754_v30 = vpop.f32.mrb[78].mxu1 }
 0x453   : > { %v3756_v34 = vpop.f32.mrb[79].mxu1  ;;  %v4716_v22 = vadd.f32 %v7926_v11, %v3754_v30 }
 0x456   : > { %v3759_v44 = vpop.f32.mrb[80].mxu1 }
 0x457   : > { %v3761_v25 = vpop.f32.mrb[81].mxu1  ;;  %v4717_v39 = vadd.f32 %v7926_v11, %v3759_v44  ;;  %v8306_v44 = vld [vmem:[#allocation35_spill] sm:$0xff] }
 0x45a   : > { %v3764_v52 = vpop.f32.mrb[82].mxu1 }
 0x45b   : > { %v3766_v6 = vpop.f32.mrb[83].mxu1  ;;  %v4718_v61 = vadd.f32 %v7926_v11, %v3764_v52 }
 0x45c   : > { %v8307_v6 = vld [vmem:[#allocation34_spill] sm:$0xff] }
 0x45e   : > { %v3769_v48 = vpop.f32.mrb[84].mxu1 }
 0x45f   : > { %v3771_v23 = vpop.f32.mrb[85].mxu1  ;;  %v4719_v38 = vadd.f32 %v7926_v11, %v3769_v48 }
 0x462   : > { %v3774_v24 = vpop.f32.mrb[86].mxu1 }
 0x463   : > { %v3776_v35 = vpop.f32.mrb[87].mxu1  ;;  %v4720_v32 = vadd.f32 %v7926_v11, %v3774_v24 }
 0x466   : > { %v3779_v45 = vpop.f32.mrb[88].mxu1 }
 0x467   : > { %v3781_v5 = vpop.f32.mrb[89].mxu1  ;;  %v4721_v2 = vadd.f32 %v7926_v11, %v3779_v45 }
 0x468   : > { %v8308_v5 = vld [vmem:[#allocation41_spill] sm:$0xff] }
 0x46a   : > { %v3784_v50 = vpop.f32.mrb[90].mxu1 }
 0x46b   : > { %v3786_v9 = vpop.f32.mrb[91].mxu1  ;;  %v4722_v62 = vadd.f32 %v7926_v11, %v3784_v50 }
 0x46c   : > { %v8309_v9 = vld [vmem:[#allocation38_spill] sm:$0xff] }
 0x46e   : > { %v3789_v63 = vpop.f32.mrb[92].mxu1 }
 0x46f   : > { %v3791_v56 = vpop.f32.mrb[93].mxu1  ;;  %v4723_v52 = vadd.f32 %v7926_v11, %v3789_v63 }
 0x472   : > { %v3794_v36 = vpop.f32.mrb[94].mxu1 }
 0x473   : > { %v3796_v26 = vpop.f32.mrb[95].mxu1  ;;  %v4724_v34 = vadd.f32 %v7926_v11, %v3794_v36 }
 0x476   : > { %v4413_v60 = vpop.f32.mrb[96].mxu1 }
 0x477   : > { %v3970_v14 = vadd.f32 %v4714_v46, %v4413_v60  ;;  %v3964_v47 = vpop.f32.mrb[97].mxu1 }
 0x478   : > { %v3965_v17 = vadd.f32 %v4713_v28, %v3964_v47 }
 0x479   : > { %v4044_v41 = vadd.f32 %v3970_v14, %v8298_v31 }
 0x47a   : > { %v4043_v27 = vadd.f32 %v3965_v17, %v8299_v33  ;;  %v4416_v59 = vpop.f32.mrb[98].mxu1 }
 0x47b   : > { %4076 = vst.msk [vmem:[%s7935_s24 + $0xa8] sm:$0xff] %vm257_vm0, %v4044_v41  ;;  %v3980_v43 = vadd.f32 %v4716_v22, %v4416_v59  ;;  %v3974_v53 = vpop.f32.mrb[99].mxu1 }
 0x47c   : > { %4075 = vst.msk [vmem:[%s7935_s24 + $0xa0] sm:$0xff] %vm257_vm0, %v4043_v27  ;;  %v3975_v20 = vadd.f32 %v4715_v19, %v3974_v53 }
 0x47d   : > { %v4046_v0 = vadd.f32 %v3980_v43, %v8300_v18 }
 0x47e   : > { %v4045_v40 = vadd.f32 %v3975_v20, %v8301_v16  ;;  %v4419_v10 = vpop.f32.mrb[100].mxu1 }
 0x47f   : > { %4078 = vst.msk [vmem:[%s7935_s24 + $0xb8] sm:$0xff] %vm257_vm0, %v4046_v0  ;;  %v3990_v51 = vadd.f32 %v4718_v61, %v4419_v10  ;;  %v3984_v29 = vpop.f32.mrb[101].mxu1 }
 0x480   : > { %4077 = vst.msk [vmem:[%s7935_s24 + $0xb0] sm:$0xff] %vm257_vm0, %v4045_v40  ;;  %v3985_v15 = vadd.f32 %v4717_v39, %v3984_v29 }
 0x481   : > { %v4048_v12 = vadd.f32 %v3990_v51, %v8302_v42 }
 0x482   : > { %v4047_v13 = vadd.f32 %v3985_v15, %v8303_v4  ;;  %v4422_v55 = vpop.f32.mrb[102].mxu1 }
 0x483   : > { %4080 = vst.msk [vmem:[%s7935_s24 + $0xc8] sm:$0xff] %vm257_vm0, %v4048_v12  ;;  %v4000_v3 = vadd.f32 %v4720_v32, %v4422_v55  ;;  %v3994_v37 = vpop.f32.mrb[103].mxu1 }
 0x484   : > { %4079 = vst.msk [vmem:[%s7935_s24 + $0xc0] sm:$0xff] %vm257_vm0, %v4047_v13  ;;  %v3995_v54 = vadd.f32 %v4719_v38, %v3994_v37 }
 0x485   : > { %v4050_v49 = vadd.f32 %v4000_v3, %v8304_v58 }
 0x486   : > { %v4049_v57 = vadd.f32 %v3995_v54, %v8305_v7  ;;  %v4425_v1 = vpop.f32.mrb[104].mxu1 }
 0x487   : > { %4082 = vst.msk [vmem:[%s7935_s24 + $0xd8] sm:$0xff] %vm257_vm0, %v4050_v49  ;;  %v4010_v8 = vadd.f32 %v4722_v62, %v4425_v1  ;;  %v4004_v21 = vpop.f32.mrb[105].mxu1 }
 0x488   : > { %4081 = vst.msk [vmem:[%s7935_s24 + $0xd0] sm:$0xff] %vm257_vm0, %v4049_v57  ;;  %v4005_v30 = vadd.f32 %v4721_v2, %v4004_v21 }
 0x489   : > { %v4052_v25 = vadd.f32 %v4010_v8, %v8306_v44 }
 0x48a   : > { %v4051_v48 = vadd.f32 %v4005_v30, %v8307_v6  ;;  %v4428_v23 = vpop.f32.mrb[106].mxu1 }
 0x48b   : > { %4084 = vst.msk [vmem:[%s7935_s24 + $0xe8] sm:$0xff] %vm257_vm0, %v4052_v25  ;;  %v4020_v24 = vadd.f32 %v4724_v34, %v4428_v23  ;;  %v4014_v35 = vpop.f32.mrb[107].mxu1 }
 0x48c   : > { %4083 = vst.msk [vmem:[%s7935_s24 + $0xe0] sm:$0xff] %vm257_vm0, %v4051_v48  ;;  %v4015_v45 = vadd.f32 %v4723_v52, %v4014_v35 }
 0x48d   : > { %v4054_v50 = vadd.f32 %v4020_v24, %v8308_v5 }
 0x48e   : > { %v4053_v56 = vadd.f32 %v4015_v45, %v8309_v9 }
 0x48f   : > { %4086 = vst.msk [vmem:[%s7935_s24 + $0xf8] sm:$0xff] %vm257_vm0, %v4054_v50 }
 0x490   : > { %4085 = vst.msk [vmem:[%s7935_s24 + $0xf0] sm:$0xff] %vm257_vm0, %v4053_v56 }
 0x491 PF: > { %s15_s18 = sadd.s32 1, %s5512_s18  }
 0x492   : > { %p12_p4 = scmp.ge.s32.totalorder %s15_s18, 4  }
 0x494   :  { %14 = sbr.rel (!%p12_p4) target bundleno = 1 (0x1), region = 74 }

</bundles_post_ra>
